<compile_context>
chip_gen: v7x
topology: tpu7x:2x2x1
jax: 0.10.0
libtpu: 0.0.40
codegen_flags: <defaults>
</compile_context>

<pallas_src>
import math
import numpy as np
import jax
import jax.numpy as jnp
from jax.experimental import pallas as pl
from jax.experimental.pallas import tpu as pltpu

# ---- hyperparameters (the `hp` object of the reference code) ----
NUM_HIDDEN        = 32
EMBED_DIM         = 32          # == NUM_HIDDEN (required for stacked conv weights)
ENC_MAXLEN        = 16
NUM_ATTN_LAYERS   = 2
NUM_ATTN_HEADS    = 4
HEAD_DIM          = NUM_HIDDEN // NUM_ATTN_HEADS
ENC_CONV1D_LAYERS = 3
ENC_CONV1D_KERNEL = 5
CONV_PAD          = ENC_CONV1D_KERNEL // 2
VOCAB_SIZE        = 50
VOCAB_PAD         = 128         # lane-dense padded vocab for the log-softmax
NEG_INF           = -1e30
LN_EPS            = 1e-5        # torch.nn.LayerNorm default
BN_EPS            = 1e-5        # torch.nn.BatchNorm1d default


# ------------------------------ kernel helpers ---------------------------------
def _layer_norm(y, g, b):
    mu = jnp.mean(y, axis=-1, keepdims=True)
    var = jnp.mean((y - mu) ** 2, axis=-1, keepdims=True)
    return (y - mu) * jax.lax.rsqrt(var + LN_EPS) * g + b


# ------------------------------ fused Pallas kernel -----------------------------
def fused_bert_kernel(alpha_ref,                 # SMEM (1, 1)
                      x_ref, pos_ref,            # (1, T, H) blocked over batch
                      cw_ref, cb_ref,            # (3, K, Cin, Cout), (3, 1, Cout)  BN folded
                      pw_ref, pb_ref,            # (H, H), (1, H)
                      wqkv_ref,                  # (L, heads, H, 3*dh)
                      wfx_ref, wfc_ref, bf_ref,  # (L, H, H), (L, heads, dh, H), (L, 1, H)
                      lng_ref, lnb_ref,          # (L, 1, H) x2
                      w1_ref, b1_ref,            # (L, H, 4H), (L, 1, 4H)
                      w2_ref, b2_ref,            # (L, 4H, H), (L, 1, H)
                      fg_ref, fb_ref,            # (L, 1, H) x2
                      mw_ref, mb_ref,            # (H, VOCAB_PAD), (1, VOCAB_PAD)
                      logp_ref, attn_ref,        # (1, T, VOCAB_PAD), (1, L, heads, T, T)
                      pad_ref):                  # VMEM scratch (T + 2*CONV_PAD, H)
    T = x_ref.shape[1]
    x = x_ref[0]                                            # (T, C) activation, VMEM-resident

    # ---- EncoderPrenet: 3 x (Conv1d k=5 pad=2 -> folded-BN -> ReLU) ------------
    pad_ref[...] = jnp.zeros_like(pad_ref)                  # zero halos once
    for l in range(ENC_CONV1D_LAYERS):
        pad_ref[CONV_PAD:CONV_PAD + T, :] = x               # in-kernel halo padding
        xpad = pad_ref[...]                                 # (T + K - 1, C)
        acc = jnp.dot(xpad[0:T, :], cw_ref[l, 0],
                      preferred_element_type=jnp.float32)
        for k in range(1, ENC_CONV1D_KERNEL):               # static unroll over taps
            acc = acc + jnp.dot(xpad[k:k + T, :], cw_ref[l, k],
                                preferred_element_type=jnp.float32)
        x = jnp.maximum(acc + cb_ref[l], 0.0)               # bias has BN folded in; ReLU

    # ---- Prenet projection + alpha * pos + x (pos_dropout = identity) ---------
    x = jnp.dot(x, pw_ref[...], preferred_element_type=jnp.float32) + pb_ref[...]
    x = alpha_ref[0, 0] * pos_ref[0] + x                    # alpha read from SMEM

    # ---- Transformer encoder layers (mask / query_mask = None, eval mode) ------
    scale = 1.0 / math.sqrt(HEAD_DIM)
    for l in range(NUM_ATTN_LAYERS):
        # fused, head-batched QKV projection: (heads, T, H) @ (heads, H, 3*dh)
        xh = jnp.broadcast_to(x[None], (NUM_ATTN_HEADS, T, NUM_HIDDEN))
        qkv = jax.lax.dot_general(xh, wqkv_ref[l], (((2,), (1,)), ((0,), (0,))),
                                  preferred_element_type=jnp.float32)   # (heads,T,3dh)
        q = qkv[:, :, 0:HEAD_DIM]
        k = qkv[:, :, HEAD_DIM:2 * HEAD_DIM]
        v = qkv[:, :, 2 * HEAD_DIM:3 * HEAD_DIM]

        # scores / softmax, batched over heads
        s = jax.lax.dot_general(q, k, (((2,), (2,)), ((0,), (0,))),
                                preferred_element_type=jnp.float32) * scale  # (h,T,T)
        s = s - jnp.max(s, axis=-1, keepdims=True)
        e = jnp.exp(s)
        probs = e / jnp.sum(e, axis=-1, keepdims=True)
        attn_ref[0, l] = probs                               # attn_dropout = identity

        # context, then fold the head-major concat through per-head wf slices
        ctx = jax.lax.dot_general(probs, v, (((2,), (1,)), ((0,), (0,))),
                                  preferred_element_type=jnp.float32)   # (heads,T,dh)
        yc = jax.lax.dot_general(ctx, wfc_ref[l], (((2,), (1,)), ((0,), (0,))),
                                 preferred_element_type=jnp.float32)    # (heads,T,H)
        y = (jnp.dot(x, wfx_ref[l], preferred_element_type=jnp.float32)
             + jnp.sum(yc, axis=0) + bf_ref[l] + x)          # final linear + residual
        x = _layer_norm(y, lng_ref[l], lnb_ref[l])

        # PositionWiseFeedForward: 1x1 conv (H->4H) ReLU, 1x1 conv (4H->H), +res, LN
        h1 = jnp.maximum(
            jnp.dot(x, w1_ref[l], preferred_element_type=jnp.float32) + b1_ref[l], 0.0)
        h2 = jnp.dot(h1, w2_ref[l], preferred_element_type=jnp.float32) + b2_ref[l]
        x = _layer_norm(h2 + x, fg_ref[l], fb_ref[l])

    # ---- MaskedLanguageModel head: Linear(H, V) + LogSoftmax (lane-dense 128) --
    logits = jnp.dot(x, mw_ref[...], preferred_element_type=jnp.float32) + mb_ref[...]
    m = jnp.max(logits, axis=-1, keepdims=True)              # padded lanes are -1e30
    lse = m + jnp.log(jnp.sum(jnp.exp(logits - m), axis=-1, keepdims=True))
    logp_ref[0] = logits - lse


# ------------------------------ trace-time weight packing ------------------------
def _prep_fused_weights(params):
    # fold eval-mode BatchNorm into conv weights / bias
    cw, cb = [], []
    for c in params['convs']:
        scale = c['gamma'] * jax.lax.rsqrt(c['var'] + BN_EPS)        # (1, Cout)
        cw.append(c['w'] * scale[None])                              # (K, Cin, Cout)
        cb.append((c['b'] - c['mean']) * scale + c['beta'])          # (1, Cout)
    conv_w = jnp.stack(cw)                                           # (3, K, Cin, Cout)
    conv_b = jnp.stack(cb)                                           # (3, 1, Cout)

    dh = HEAD_DIM
    wqkv, wfx, wfc, bf, lng, lnb = [], [], [], [], [], []
    w1, b1, w2, b2, fg, fb = [], [], [], [], [], []
    for p in params['layers']:
        # head-major fused QKV weight: (heads, H, 3*dh)
        wqkv.append(jnp.stack([
            jnp.concatenate([p['wq'][:, h * dh:(h + 1) * dh],
                             p['wk'][:, h * dh:(h + 1) * dh],
                             p['wv'][:, h * dh:(h + 1) * dh]], axis=-1)
            for h in range(NUM_ATTN_HEADS)]))
        # final linear on cat([x, ctx]): x part + per-head ctx parts
        wfx.append(p['wf'][:NUM_HIDDEN, :])                          # (H, H)
        wfc.append(jnp.stack([p['wf'][NUM_HIDDEN + h * dh: NUM_HIDDEN + (h + 1) * dh, :]
                              for h in range(NUM_ATTN_HEADS)]))      # (heads, dh, H)
        bf.append(p['bf']); lng.append(p['ln_g']); lnb.append(p['ln_b'])
        w1.append(p['w1']); b1.append(p['b1']); w2.append(p['w2']); b2.append(p['b2'])
        fg.append(p['ffn_ln_g']); fb.append(p['ffn_ln_b'])

    # MLM head padded to 128 lanes: zero weight cols, -inf-like bias on padded lanes
    mlm_w = jnp.zeros((NUM_HIDDEN, VOCAB_PAD), jnp.float32).at[:, :VOCAB_SIZE].set(
        params['mlm_w'])
    mlm_b = jnp.full((1, VOCAB_PAD), NEG_INF, jnp.float32).at[:, :VOCAB_SIZE].set(
        params['mlm_b'])

    return [conv_w, conv_b, params['proj_w'], params['proj_b'],
            jnp.stack(wqkv), jnp.stack(wfx), jnp.stack(wfc), jnp.stack(bf),
            jnp.stack(lng), jnp.stack(lnb),
            jnp.stack(w1), jnp.stack(b1), jnp.stack(w2), jnp.stack(b2),
            jnp.stack(fg), jnp.stack(fb), mlm_w, mlm_b]


def _full_spec(a):
    nd = a.ndim
    return pl.BlockSpec(a.shape, lambda b, nd=nd: (0,) * nd)


# ------------------------------ full forward pass --------------------------------
def bert_mlm_forward(params, tokens, pos_ids):
    B, T = tokens.shape
    # Embedding lookups are plain-JAX glue (gather).
    x_emb = jnp.take(params['embed'], tokens, axis=0)        # (B, T, E)
    pos = jnp.take(params['pos_table'], pos_ids, axis=0)     # (B, T, H)
    weights = _prep_fused_weights(params)

    in_specs = ([pl.BlockSpec(memory_space=pltpu.MemorySpace.SMEM),          # alpha scalar
                 pl.BlockSpec((1, T, x_emb.shape[2]), lambda b: (b, 0, 0)),  # embeddings
                 pl.BlockSpec((1, T, NUM_HIDDEN), lambda b: (b, 0, 0))]      # positions
                + [_full_spec(w) for w in weights])

    logp_pad, attn_all = pl.pallas_call(
        fused_bert_kernel,
        out_shape=(jax.ShapeDtypeStruct((B, T, VOCAB_PAD), jnp.float32),
                   jax.ShapeDtypeStruct((B, NUM_ATTN_LAYERS, NUM_ATTN_HEADS, T, T),
                                        jnp.float32)),
        grid=(B,),
        in_specs=in_specs,
        out_specs=(pl.BlockSpec((1, T, VOCAB_PAD), lambda b: (b, 0, 0)),
                   pl.BlockSpec((1, NUM_ATTN_LAYERS, NUM_ATTN_HEADS, T, T),
                                lambda b: (b, 0, 0, 0, 0))),
        scratch_shapes=[pltpu.VMEM((T + 2 * CONV_PAD, NUM_HIDDEN), jnp.float32)],
        compiler_params=pltpu.CompilerParams(dimension_semantics=("parallel",)),
    )(params['alpha'], x_emb, pos, *weights)

    log_probs = logp_pad[:, :, :VOCAB_SIZE]                  # drop padded vocab lanes
    attns = []
    for l in range(NUM_ATTN_LAYERS):
        a = attn_all[:, l]                                   # (B, heads, T, T)
        # match torch: head-major flatten then .view(heads*B // 4, 4, T, T)
        attns.append(jnp.transpose(a, (1, 0, 2, 3)).reshape(
            NUM_ATTN_HEADS * B // 4, 4, T, T))
    return log_probs, attns


# ------------------------------ parameters --------------------------------------
def sinusoid_table(n_position, d_hid, padding_idx=0):
    pos = np.arange(n_position, dtype=np.float64)[:, None]
    hid = np.arange(d_hid)[None, :]
    table = pos / np.power(10000.0, 2 * (hid // 2) / d_hid)
    table[:, 0::2] = np.sin(table[:, 0::2])
    table[:, 1::2] = np.cos(table[:, 1::2])
    if padding_idx is not None:
        table[padding_idx] = 0.0
    return jnp.asarray(table, dtype=jnp.float32)


def init_params(key):
    keys = jax.random.split(key, 128)
    it = iter(keys)

    def xavier(shape, fan_in, fan_out):
        bound = math.sqrt(6.0 / (fan_in + fan_out))
        return jax.random.uniform(next(it), shape, jnp.float32, -bound, bound)

    def small(shape):
        return jax.random.uniform(next(it), shape, jnp.float32, -0.05, 0.05)

    params = {}
    emb = 0.02 * jax.random.normal(next(it), (VOCAB_SIZE, EMBED_DIM), jnp.float32)
    params['embed'] = emb.at[0].set(0.0)                    # padding_idx = 0
    params['pos_table'] = sinusoid_table(ENC_MAXLEN, NUM_HIDDEN, padding_idx=0)
    params['alpha'] = jnp.ones((1, 1), jnp.float32)         # nn.Parameter(ones(1))

    convs = []
    cin = EMBED_DIM
    for _ in range(ENC_CONV1D_LAYERS):
        cout = NUM_HIDDEN
        convs.append(dict(
            w=xavier((ENC_CONV1D_KERNEL, cin, cout),
                     cin * ENC_CONV1D_KERNEL, cout * ENC_CONV1D_KERNEL),
            b=small((1, cout)),
            gamma=jnp.ones((1, cout), jnp.float32),
            beta=jnp.zeros((1, cout), jnp.float32),
            mean=jnp.zeros((1, cout), jnp.float32),   # BatchNorm running stats (fresh init)
            var=jnp.ones((1, cout), jnp.float32),
        ))
        cin = cout
    params['convs'] = convs
    params['proj_w'] = xavier((NUM_HIDDEN, NUM_HIDDEN), NUM_HIDDEN, NUM_HIDDEN)
    params['proj_b'] = small((1, NUM_HIDDEN))

    layers = []
    for _ in range(NUM_ATTN_LAYERS):
        layers.append(dict(
            wk=xavier((NUM_HIDDEN, NUM_HIDDEN), NUM_HIDDEN, NUM_HIDDEN),
            wv=xavier((NUM_HIDDEN, NUM_HIDDEN), NUM_HIDDEN, NUM_HIDDEN),
            wq=xavier((NUM_HIDDEN, NUM_HIDDEN), NUM_HIDDEN, NUM_HIDDEN),
            wf=xavier((2 * NUM_HIDDEN, NUM_HIDDEN), 2 * NUM_HIDDEN, NUM_HIDDEN),
            bf=small((1, NUM_HIDDEN)),
            ln_g=jnp.ones((1, NUM_HIDDEN), jnp.float32),
            ln_b=jnp.zeros((1, NUM_HIDDEN), jnp.float32),
            w1=xavier((NUM_HIDDEN, 4 * NUM_HIDDEN), NUM_HIDDEN, 4 * NUM_HIDDEN),
            b1=small((1, 4 * NUM_HIDDEN)),
            w2=xavier((4 * NUM_HIDDEN, NUM_HIDDEN), 4 * NUM_HIDDEN, NUM_HIDDEN),
            b2=small((1, NUM_HIDDEN)),
            ffn_ln_g=jnp.ones((1, NUM_HIDDEN), jnp.float32),
            ffn_ln_b=jnp.zeros((1, NUM_HIDDEN), jnp.float32),
        ))
    params['layers'] = layers
    params['mlm_w'] = xavier((NUM_HIDDEN, VOCAB_SIZE), NUM_HIDDEN, VOCAB_SIZE)
    params['mlm_b'] = small((1, VOCAB_SIZE))
    return params


if __name__ == "__main__":
    key = jax.random.PRNGKey(0)
    pk, xk = jax.random.split(key, 2)
    params = init_params(pk)

    B, T = 2, 8
    tokens = jax.random.randint(xk, (B, T), 1, VOCAB_SIZE).astype(jnp.int32)
    pos_ids = jnp.broadcast_to(jnp.arange(1, T + 1, dtype=jnp.int32), (B, T))

    fwd = jax.jit(bert_mlm_forward)
    log_probs, attn_list = fwd(params, tokens, pos_ids)
    jax.block_until_ready(log_probs)
    for a in attn_list:
        jax.block_until_ready(a)

    assert log_probs.shape == (B, T, VOCAB_SIZE)
    assert len(attn_list) == NUM_ATTN_LAYERS
    # sanity: log-softmax rows must exponentiate to ~1 despite the padded vocab lanes
    prob_sum = jnp.sum(jnp.exp(log_probs), axis=-1)
    assert bool(jnp.all(jnp.abs(prob_sum - 1.0) < 1e-4))
    # sanity: attention rows are valid softmaxes
    attn_sum = jnp.sum(attn_list[0], axis=-1)
    assert bool(jnp.all(jnp.abs(attn_sum - 1.0) < 1e-4))
    print("KERNEL_OK")
</pallas_src>

<mosaic_0001>
module attributes {stable_mosaic.version = 11 : i64} {
  func.func @fused_bert_kernel(%arg0: i32, %arg1: memref<1x1xf32, #tpu.memory_space<smem>>, %arg2: memref<1x8x32xf32, #tpu.memory_space<vmem>>, %arg3: memref<1x8x32xf32, #tpu.memory_space<vmem>>, %arg4: memref<3x5x32x32xf32, #tpu.memory_space<vmem>>, %arg5: memref<3x1x32xf32, #tpu.memory_space<vmem>>, %arg6: memref<32x32xf32, #tpu.memory_space<vmem>>, %arg7: memref<1x32xf32, #tpu.memory_space<vmem>>, %arg8: memref<2x4x32x24xf32, #tpu.memory_space<vmem>>, %arg9: memref<2x32x32xf32, #tpu.memory_space<vmem>>, %arg10: memref<2x4x8x32xf32, #tpu.memory_space<vmem>>, %arg11: memref<2x1x32xf32, #tpu.memory_space<vmem>>, %arg12: memref<2x1x32xf32, #tpu.memory_space<vmem>>, %arg13: memref<2x1x32xf32, #tpu.memory_space<vmem>>, %arg14: memref<2x32x128xf32, #tpu.memory_space<vmem>>, %arg15: memref<2x1x128xf32, #tpu.memory_space<vmem>>, %arg16: memref<2x128x32xf32, #tpu.memory_space<vmem>>, %arg17: memref<2x1x32xf32, #tpu.memory_space<vmem>>, %arg18: memref<2x1x32xf32, #tpu.memory_space<vmem>>, %arg19: memref<2x1x32xf32, #tpu.memory_space<vmem>>, %arg20: memref<32x128xf32, #tpu.memory_space<vmem>>, %arg21: memref<1x128xf32, #tpu.memory_space<vmem>>, %arg22: memref<1x8x128xf32, #tpu.memory_space<vmem>>, %arg23: memref<1x2x4x8x8xf32, #tpu.memory_space<vmem>>, %arg24: memref<12x32xf32, #tpu.memory_space<vmem>>) attributes {dimension_semantics = [#tpu.dimension_semantics<parallel>], iteration_bounds = array<i64: 2>, scalar_prefetch = 0 : i64, scratch_operands = 1 : i64, tpu.core_type = #tpu.core_type<tc>, window_params = [{transform_indices = @transform_0, window_bounds = array<i64: 1, 1>}, {transform_indices = @transform_1, window_bounds = array<i64: 1, 8, 32>}, {transform_indices = @transform_2, window_bounds = array<i64: 1, 8, 32>}, {pipeline_mode = #tpu.pipeline_mode<synchronous>, transform_indices = @transform_3, window_bounds = array<i64: 3, 5, 32, 32>}, {pipeline_mode = #tpu.pipeline_mode<synchronous>, transform_indices = @transform_4, window_bounds = array<i64: 3, 1, 32>}, {pipeline_mode = #tpu.pipeline_mode<synchronous>, transform_indices = @transform_5, window_bounds = array<i64: 32, 32>}, {pipeline_mode = #tpu.pipeline_mode<synchronous>, transform_indices = @transform_6, window_bounds = array<i64: 1, 32>}, {pipeline_mode = #tpu.pipeline_mode<synchronous>, transform_indices = @transform_7, window_bounds = array<i64: 2, 4, 32, 24>}, {pipeline_mode = #tpu.pipeline_mode<synchronous>, transform_indices = @transform_8, window_bounds = array<i64: 2, 32, 32>}, {pipeline_mode = #tpu.pipeline_mode<synchronous>, transform_indices = @transform_9, window_bounds = array<i64: 2, 4, 8, 32>}, {pipeline_mode = #tpu.pipeline_mode<synchronous>, transform_indices = @transform_10, window_bounds = array<i64: 2, 1, 32>}, {pipeline_mode = #tpu.pipeline_mode<synchronous>, transform_indices = @transform_11, window_bounds = array<i64: 2, 1, 32>}, {pipeline_mode = #tpu.pipeline_mode<synchronous>, transform_indices = @transform_12, window_bounds = array<i64: 2, 1, 32>}, {pipeline_mode = #tpu.pipeline_mode<synchronous>, transform_indices = @transform_13, window_bounds = array<i64: 2, 32, 128>}, {pipeline_mode = #tpu.pipeline_mode<synchronous>, transform_indices = @transform_14, window_bounds = array<i64: 2, 1, 128>}, {pipeline_mode = #tpu.pipeline_mode<synchronous>, transform_indices = @transform_15, window_bounds = array<i64: 2, 128, 32>}, {pipeline_mode = #tpu.pipeline_mode<synchronous>, transform_indices = @transform_16, window_bounds = array<i64: 2, 1, 32>}, {pipeline_mode = #tpu.pipeline_mode<synchronous>, transform_indices = @transform_17, window_bounds = array<i64: 2, 1, 32>}, {pipeline_mode = #tpu.pipeline_mode<synchronous>, transform_indices = @transform_18, window_bounds = array<i64: 2, 1, 32>}, {pipeline_mode = #tpu.pipeline_mode<synchronous>, transform_indices = @transform_19, window_bounds = array<i64: 32, 128>}, {pipeline_mode = #tpu.pipeline_mode<synchronous>, transform_indices = @transform_20, window_bounds = array<i64: 1, 128>}, {transform_indices = @transform_21, window_bounds = array<i64: 1, 8, 128>}, {transform_indices = @transform_22, window_bounds = array<i64: 1, 2, 4, 8, 8>}]} {
    %c0 = arith.constant 0 : index
    %c0_0 = arith.constant 0 : index
    %c0_1 = arith.constant 0 : index
    %0 = vector.load %arg2[%c0, %c0_0, %c0_1] : memref<1x8x32xf32, #tpu.memory_space<vmem>>, vector<1x8x32xf32>
    %1 = vector.shape_cast %0 : vector<1x8x32xf32> to vector<8x32xf32>
    %cst = arith.constant 0.000000e+00 : f32
    %2 = vector.broadcast %cst : f32 to vector<12x32xf32>
    %c0_2 = arith.constant 0 : index
    %c0_3 = arith.constant 0 : index
    %3 = vector.load %arg24[%c0_2, %c0_3] : memref<12x32xf32, #tpu.memory_space<vmem>>, vector<12x32xf32>
    tpu.vector_store %arg24[%c0_2, %c0_3], %2 {strides = array<i32>} : memref<12x32xf32, #tpu.memory_space<vmem>>, vector<12x32xf32>,
    %c2 = arith.constant 2 : index
    %c0_4 = arith.constant 0 : index
    %4 = vector.load %arg24[%c2, %c0_4] : memref<12x32xf32, #tpu.memory_space<vmem>>, vector<8x32xf32>
    tpu.vector_store %arg24[%c2, %c0_4], %1 {strides = array<i32>} : memref<12x32xf32, #tpu.memory_space<vmem>>, vector<8x32xf32>,
    %c0_5 = arith.constant 0 : index
    %c0_6 = arith.constant 0 : index
    %5 = vector.load %arg24[%c0_5, %c0_6] : memref<12x32xf32, #tpu.memory_space<vmem>>, vector<12x32xf32>
    %6 = vector.extract_strided_slice %5 {offsets = [0, 0], sizes = [8, 32], strides = [1, 1]} : vector<12x32xf32> to vector<8x32xf32>
    %c0_7 = arith.constant 0 : index
    %c0_8 = arith.constant 0 : index
    %c0_9 = arith.constant 0 : index
    %c0_10 = arith.constant 0 : index
    %7 = vector.load %arg4[%c0_7, %c0_8, %c0_9, %c0_10] : memref<3x5x32x32xf32, #tpu.memory_space<vmem>>, vector<1x1x32x32xf32>
    %8 = vector.shape_cast %7 : vector<1x1x32x32xf32> to vector<32x32xf32>
    %cst_11 = arith.constant dense<0.000000e+00> : vector<8x32xf32>
    %9 = tpu.matmul %6, %8, %cst_11 {dimension_numbers = #tpu.dot_dimension_numbers<[1], [0], [0], [1], [0, 0, 1, 1], [], []>} : vector<8x32xf32>, vector<32x32xf32>, vector<8x32xf32> -> vector<8x32xf32>
    %10 = vector.extract_strided_slice %5 {offsets = [1, 0], sizes = [8, 32], strides = [1, 1]} : vector<12x32xf32> to vector<8x32xf32>
    %c0_12 = arith.constant 0 : index
    %c1 = arith.constant 1 : index
    %c0_13 = arith.constant 0 : index
    %c0_14 = arith.constant 0 : index
    %11 = vector.load %arg4[%c0_12, %c1, %c0_13, %c0_14] : memref<3x5x32x32xf32, #tpu.memory_space<vmem>>, vector<1x1x32x32xf32>
    %12 = vector.shape_cast %11 : vector<1x1x32x32xf32> to vector<32x32xf32>
    %cst_15 = arith.constant dense<0.000000e+00> : vector<8x32xf32>
    %13 = tpu.matmul %10, %12, %cst_15 {dimension_numbers = #tpu.dot_dimension_numbers<[1], [0], [0], [1], [0, 0, 1, 1], [], []>} : vector<8x32xf32>, vector<32x32xf32>, vector<8x32xf32> -> vector<8x32xf32>
    %14 = arith.addf %9, %13 : vector<8x32xf32>
    %15 = vector.extract_strided_slice %5 {offsets = [2, 0], sizes = [8, 32], strides = [1, 1]} : vector<12x32xf32> to vector<8x32xf32>
    %c0_16 = arith.constant 0 : index
    %c2_17 = arith.constant 2 : index
    %c0_18 = arith.constant 0 : index
    %c0_19 = arith.constant 0 : index
    %16 = vector.load %arg4[%c0_16, %c2_17, %c0_18, %c0_19] : memref<3x5x32x32xf32, #tpu.memory_space<vmem>>, vector<1x1x32x32xf32>
    %17 = vector.shape_cast %16 : vector<1x1x32x32xf32> to vector<32x32xf32>
    %cst_20 = arith.constant dense<0.000000e+00> : vector<8x32xf32>
    %18 = tpu.matmul %15, %17, %cst_20 {dimension_numbers = #tpu.dot_dimension_numbers<[1], [0], [0], [1], [0, 0, 1, 1], [], []>} : vector<8x32xf32>, vector<32x32xf32>, vector<8x32xf32> -> vector<8x32xf32>
    %19 = arith.addf %14, %18 : vector<8x32xf32>
    %20 = vector.extract_strided_slice %5 {offsets = [3, 0], sizes = [8, 32], strides = [1, 1]} : vector<12x32xf32> to vector<8x32xf32>
    %c0_21 = arith.constant 0 : index
    %c3 = arith.constant 3 : index
    %c0_22 = arith.constant 0 : index
    %c0_23 = arith.constant 0 : index
    %21 = vector.load %arg4[%c0_21, %c3, %c0_22, %c0_23] : memref<3x5x32x32xf32, #tpu.memory_space<vmem>>, vector<1x1x32x32xf32>
    %22 = vector.shape_cast %21 : vector<1x1x32x32xf32> to vector<32x32xf32>
    %cst_24 = arith.constant dense<0.000000e+00> : vector<8x32xf32>
    %23 = tpu.matmul %20, %22, %cst_24 {dimension_numbers = #tpu.dot_dimension_numbers<[1], [0], [0], [1], [0, 0, 1, 1], [], []>} : vector<8x32xf32>, vector<32x32xf32>, vector<8x32xf32> -> vector<8x32xf32>
    %24 = arith.addf %19, %23 : vector<8x32xf32>
    %25 = vector.extract_strided_slice %5 {offsets = [4, 0], sizes = [8, 32], strides = [1, 1]} : vector<12x32xf32> to vector<8x32xf32>
    %c0_25 = arith.constant 0 : index
    %c4 = arith.constant 4 : index
    %c0_26 = arith.constant 0 : index
    %c0_27 = arith.constant 0 : index
    %26 = vector.load %arg4[%c0_25, %c4, %c0_26, %c0_27] : memref<3x5x32x32xf32, #tpu.memory_space<vmem>>, vector<1x1x32x32xf32>
    %27 = vector.shape_cast %26 : vector<1x1x32x32xf32> to vector<32x32xf32>
    %cst_28 = arith.constant dense<0.000000e+00> : vector<8x32xf32>
    %28 = tpu.matmul %25, %27, %cst_28 {dimension_numbers = #tpu.dot_dimension_numbers<[1], [0], [0], [1], [0, 0, 1, 1], [], []>} : vector<8x32xf32>, vector<32x32xf32>, vector<8x32xf32> -> vector<8x32xf32>
    %29 = arith.addf %24, %28 : vector<8x32xf32>
    %c0_29 = arith.constant 0 : index
    %c0_30 = arith.constant 0 : index
    %c0_31 = arith.constant 0 : index
    %30 = vector.load %arg5[%c0_29, %c0_30, %c0_31] : memref<3x1x32xf32, #tpu.memory_space<vmem>>, vector<1x1x32xf32>
    %31 = vector.shape_cast %30 : vector<1x1x32xf32> to vector<1x32xf32>
    %32 = vector.broadcast %31 : vector<1x32xf32> to vector<8x32xf32>
    %33 = arith.addf %29, %32 : vector<8x32xf32>
    %cst_32 = arith.constant 0.000000e+00 : f32
    %34 = vector.broadcast %cst_32 : f32 to vector<8x32xf32>
    %35 = arith.maximumf %33, %34 : vector<8x32xf32>
    %c2_33 = arith.constant 2 : index
    %c0_34 = arith.constant 0 : index
    %36 = vector.load %arg24[%c2_33, %c0_34] : memref<12x32xf32, #tpu.memory_space<vmem>>, vector<8x32xf32>
    tpu.vector_store %arg24[%c2_33, %c0_34], %35 {strides = array<i32>} : memref<12x32xf32, #tpu.memory_space<vmem>>, vector<8x32xf32>,
    %c0_35 = arith.constant 0 : index
    %c0_36 = arith.constant 0 : index
    %37 = vector.load %arg24[%c0_35, %c0_36] : memref<12x32xf32, #tpu.memory_space<vmem>>, vector<12x32xf32>
    %38 = vector.extract_strided_slice %37 {offsets = [0, 0], sizes = [8, 32], strides = [1, 1]} : vector<12x32xf32> to vector<8x32xf32>
    %c1_37 = arith.constant 1 : index
    %c0_38 = arith.constant 0 : index
    %c0_39 = arith.constant 0 : index
    %c0_40 = arith.constant 0 : index
    %39 = vector.load %arg4[%c1_37, %c0_38, %c0_39, %c0_40] : memref<3x5x32x32xf32, #tpu.memory_space<vmem>>, vector<1x1x32x32xf32>
    %40 = vector.shape_cast %39 : vector<1x1x32x32xf32> to vector<32x32xf32>
    %cst_41 = arith.constant dense<0.000000e+00> : vector<8x32xf32>
    %41 = tpu.matmul %38, %40, %cst_41 {dimension_numbers = #tpu.dot_dimension_numbers<[1], [0], [0], [1], [0, 0, 1, 1], [], []>} : vector<8x32xf32>, vector<32x32xf32>, vector<8x32xf32> -> vector<8x32xf32>
    %42 = vector.extract_strided_slice %37 {offsets = [1, 0], sizes = [8, 32], strides = [1, 1]} : vector<12x32xf32> to vector<8x32xf32>
    %c1_42 = arith.constant 1 : index
    %c1_43 = arith.constant 1 : index
    %c0_44 = arith.constant 0 : index
    %c0_45 = arith.constant 0 : index
    %43 = vector.load %arg4[%c1_42, %c1_43, %c0_44, %c0_45] : memref<3x5x32x32xf32, #tpu.memory_space<vmem>>, vector<1x1x32x32xf32>
    %44 = vector.shape_cast %43 : vector<1x1x32x32xf32> to vector<32x32xf32>
    %cst_46 = arith.constant dense<0.000000e+00> : vector<8x32xf32>
    %45 = tpu.matmul %42, %44, %cst_46 {dimension_numbers = #tpu.dot_dimension_numbers<[1], [0], [0], [1], [0, 0, 1, 1], [], []>} : vector<8x32xf32>, vector<32x32xf32>, vector<8x32xf32> -> vector<8x32xf32>
    %46 = arith.addf %41, %45 : vector<8x32xf32>
    %47 = vector.extract_strided_slice %37 {offsets = [2, 0], sizes = [8, 32], strides = [1, 1]} : vector<12x32xf32> to vector<8x32xf32>
    %c1_47 = arith.constant 1 : index
    %c2_48 = arith.constant 2 : index
    %c0_49 = arith.constant 0 : index
    %c0_50 = arith.constant 0 : index
    %48 = vector.load %arg4[%c1_47, %c2_48, %c0_49, %c0_50] : memref<3x5x32x32xf32, #tpu.memory_space<vmem>>, vector<1x1x32x32xf32>
    %49 = vector.shape_cast %48 : vector<1x1x32x32xf32> to vector<32x32xf32>
    %cst_51 = arith.constant dense<0.000000e+00> : vector<8x32xf32>
    %50 = tpu.matmul %47, %49, %cst_51 {dimension_numbers = #tpu.dot_dimension_numbers<[1], [0], [0], [1], [0, 0, 1, 1], [], []>} : vector<8x32xf32>, vector<32x32xf32>, vector<8x32xf32> -> vector<8x32xf32>
    %51 = arith.addf %46, %50 : vector<8x32xf32>
    %52 = vector.extract_strided_slice %37 {offsets = [3, 0], sizes = [8, 32], strides = [1, 1]} : vector<12x32xf32> to vector<8x32xf32>
    %c1_52 = arith.constant 1 : index
    %c3_53 = arith.constant 3 : index
    %c0_54 = arith.constant 0 : index
    %c0_55 = arith.constant 0 : index
    %53 = vector.load %arg4[%c1_52, %c3_53, %c0_54, %c0_55] : memref<3x5x32x32xf32, #tpu.memory_space<vmem>>, vector<1x1x32x32xf32>
    %54 = vector.shape_cast %53 : vector<1x1x32x32xf32> to vector<32x32xf32>
    %cst_56 = arith.constant dense<0.000000e+00> : vector<8x32xf32>
    %55 = tpu.matmul %52, %54, %cst_56 {dimension_numbers = #tpu.dot_dimension_numbers<[1], [0], [0], [1], [0, 0, 1, 1], [], []>} : vector<8x32xf32>, vector<32x32xf32>, vector<8x32xf32> -> vector<8x32xf32>
    %56 = arith.addf %51, %55 : vector<8x32xf32>
    %57 = vector.extract_strided_slice %37 {offsets = [4, 0], sizes = [8, 32], strides = [1, 1]} : vector<12x32xf32> to vector<8x32xf32>
    %c1_57 = arith.constant 1 : index
    %c4_58 = arith.constant 4 : index
    %c0_59 = arith.constant 0 : index
    %c0_60 = arith.constant 0 : index
    %58 = vector.load %arg4[%c1_57, %c4_58, %c0_59, %c0_60] : memref<3x5x32x32xf32, #tpu.memory_space<vmem>>, vector<1x1x32x32xf32>
    %59 = vector.shape_cast %58 : vector<1x1x32x32xf32> to vector<32x32xf32>
    %cst_61 = arith.constant dense<0.000000e+00> : vector<8x32xf32>
    %60 = tpu.matmul %57, %59, %cst_61 {dimension_numbers = #tpu.dot_dimension_numbers<[1], [0], [0], [1], [0, 0, 1, 1], [], []>} : vector<8x32xf32>, vector<32x32xf32>, vector<8x32xf32> -> vector<8x32xf32>
    %61 = arith.addf %56, %60 : vector<8x32xf32>
    %c1_62 = arith.constant 1 : index
    %c0_63 = arith.constant 0 : index
    %c0_64 = arith.constant 0 : index
    %62 = vector.load %arg5[%c1_62, %c0_63, %c0_64] : memref<3x1x32xf32, #tpu.memory_space<vmem>>, vector<1x1x32xf32>
    %63 = vector.shape_cast %62 : vector<1x1x32xf32> to vector<1x32xf32>
    %64 = vector.broadcast %63 : vector<1x32xf32> to vector<8x32xf32>
    %65 = arith.addf %61, %64 : vector<8x32xf32>
    %cst_65 = arith.constant 0.000000e+00 : f32
    %66 = vector.broadcast %cst_65 : f32 to vector<8x32xf32>
    %67 = arith.maximumf %65, %66 : vector<8x32xf32>
    %c2_66 = arith.constant 2 : index
    %c0_67 = arith.constant 0 : index
    %68 = vector.load %arg24[%c2_66, %c0_67] : memref<12x32xf32, #tpu.memory_space<vmem>>, vector<8x32xf32>
    tpu.vector_store %arg24[%c2_66, %c0_67], %67 {strides = array<i32>} : memref<12x32xf32, #tpu.memory_space<vmem>>, vector<8x32xf32>,
    %c0_68 = arith.constant 0 : index
    %c0_69 = arith.constant 0 : index
    %69 = vector.load %arg24[%c0_68, %c0_69] : memref<12x32xf32, #tpu.memory_space<vmem>>, vector<12x32xf32>
    %70 = vector.extract_strided_slice %69 {offsets = [0, 0], sizes = [8, 32], strides = [1, 1]} : vector<12x32xf32> to vector<8x32xf32>
    %c2_70 = arith.constant 2 : index
    %c0_71 = arith.constant 0 : index
    %c0_72 = arith.constant 0 : index
    %c0_73 = arith.constant 0 : index
    %71 = vector.load %arg4[%c2_70, %c0_71, %c0_72, %c0_73] : memref<3x5x32x32xf32, #tpu.memory_space<vmem>>, vector<1x1x32x32xf32>
    %72 = vector.shape_cast %71 : vector<1x1x32x32xf32> to vector<32x32xf32>
    %cst_74 = arith.constant dense<0.000000e+00> : vector<8x32xf32>
    %73 = tpu.matmul %70, %72, %cst_74 {dimension_numbers = #tpu.dot_dimension_numbers<[1], [0], [0], [1], [0, 0, 1, 1], [], []>} : vector<8x32xf32>, vector<32x32xf32>, vector<8x32xf32> -> vector<8x32xf32>
    %74 = vector.extract_strided_slice %69 {offsets = [1, 0], sizes = [8, 32], strides = [1, 1]} : vector<12x32xf32> to vector<8x32xf32>
    %c2_75 = arith.constant 2 : index
    %c1_76 = arith.constant 1 : index
    %c0_77 = arith.constant 0 : index
    %c0_78 = arith.constant 0 : index
    %75 = vector.load %arg4[%c2_75, %c1_76, %c0_77, %c0_78] : memref<3x5x32x32xf32, #tpu.memory_space<vmem>>, vector<1x1x32x32xf32>
    %76 = vector.shape_cast %75 : vector<1x1x32x32xf32> to vector<32x32xf32>
    %cst_79 = arith.constant dense<0.000000e+00> : vector<8x32xf32>
    %77 = tpu.matmul %74, %76, %cst_79 {dimension_numbers = #tpu.dot_dimension_numbers<[1], [0], [0], [1], [0, 0, 1, 1], [], []>} : vector<8x32xf32>, vector<32x32xf32>, vector<8x32xf32> -> vector<8x32xf32>
    %78 = arith.addf %73, %77 : vector<8x32xf32>
    %79 = vector.extract_strided_slice %69 {offsets = [2, 0], sizes = [8, 32], strides = [1, 1]} : vector<12x32xf32> to vector<8x32xf32>
    %c2_80 = arith.constant 2 : index
    %c2_81 = arith.constant 2 : index
    %c0_82 = arith.constant 0 : index
    %c0_83 = arith.constant 0 : index
    %80 = vector.load %arg4[%c2_80, %c2_81, %c0_82, %c0_83] : memref<3x5x32x32xf32, #tpu.memory_space<vmem>>, vector<1x1x32x32xf32>
    %81 = vector.shape_cast %80 : vector<1x1x32x32xf32> to vector<32x32xf32>
    %cst_84 = arith.constant dense<0.000000e+00> : vector<8x32xf32>
    %82 = tpu.matmul %79, %81, %cst_84 {dimension_numbers = #tpu.dot_dimension_numbers<[1], [0], [0], [1], [0, 0, 1, 1], [], []>} : vector<8x32xf32>, vector<32x32xf32>, vector<8x32xf32> -> vector<8x32xf32>
    %83 = arith.addf %78, %82 : vector<8x32xf32>
    %84 = vector.extract_strided_slice %69 {offsets = [3, 0], sizes = [8, 32], strides = [1, 1]} : vector<12x32xf32> to vector<8x32xf32>
    %c2_85 = arith.constant 2 : index
    %c3_86 = arith.constant 3 : index
    %c0_87 = arith.constant 0 : index
    %c0_88 = arith.constant 0 : index
    %85 = vector.load %arg4[%c2_85, %c3_86, %c0_87, %c0_88] : memref<3x5x32x32xf32, #tpu.memory_space<vmem>>, vector<1x1x32x32xf32>
    %86 = vector.shape_cast %85 : vector<1x1x32x32xf32> to vector<32x32xf32>
    %cst_89 = arith.constant dense<0.000000e+00> : vector<8x32xf32>
    %87 = tpu.matmul %84, %86, %cst_89 {dimension_numbers = #tpu.dot_dimension_numbers<[1], [0], [0], [1], [0, 0, 1, 1], [], []>} : vector<8x32xf32>, vector<32x32xf32>, vector<8x32xf32> -> vector<8x32xf32>
    %88 = arith.addf %83, %87 : vector<8x32xf32>
    %89 = vector.extract_strided_slice %69 {offsets = [4, 0], sizes = [8, 32], strides = [1, 1]} : vector<12x32xf32> to vector<8x32xf32>
    %c2_90 = arith.constant 2 : index
    %c4_91 = arith.constant 4 : index
    %c0_92 = arith.constant 0 : index
    %c0_93 = arith.constant 0 : index
    %90 = vector.load %arg4[%c2_90, %c4_91, %c0_92, %c0_93] : memref<3x5x32x32xf32, #tpu.memory_space<vmem>>, vector<1x1x32x32xf32>
    %91 = vector.shape_cast %90 : vector<1x1x32x32xf32> to vector<32x32xf32>
    %cst_94 = arith.constant dense<0.000000e+00> : vector<8x32xf32>
    %92 = tpu.matmul %89, %91, %cst_94 {dimension_numbers = #tpu.dot_dimension_numbers<[1], [0], [0], [1], [0, 0, 1, 1], [], []>} : vector<8x32xf32>, vector<32x32xf32>, vector<8x32xf32> -> vector<8x32xf32>
    %93 = arith.addf %88, %92 : vector<8x32xf32>
    %c2_95 = arith.constant 2 : index
    %c0_96 = arith.constant 0 : index
    %c0_97 = arith.constant 0 : index
    %94 = vector.load %arg5[%c2_95, %c0_96, %c0_97] : memref<3x1x32xf32, #tpu.memory_space<vmem>>, vector<1x1x32xf32>
    %95 = vector.shape_cast %94 : vector<1x1x32xf32> to vector<1x32xf32>
    %96 = vector.broadcast %95 : vector<1x32xf32> to vector<8x32xf32>
    %97 = arith.addf %93, %96 : vector<8x32xf32>
    %cst_98 = arith.constant 0.000000e+00 : f32
    %98 = vector.broadcast %cst_98 : f32 to vector<8x32xf32>
    %99 = arith.maximumf %97, %98 : vector<8x32xf32>
    %c0_99 = arith.constant 0 : index
    %c0_100 = arith.constant 0 : index
    %100 = vector.load %arg6[%c0_99, %c0_100] : memref<32x32xf32, #tpu.memory_space<vmem>>, vector<32x32xf32>
    %cst_101 = arith.constant dense<0.000000e+00> : vector<8x32xf32>
    %101 = tpu.matmul %99, %100, %cst_101 {dimension_numbers = #tpu.dot_dimension_numbers<[1], [0], [0], [1], [0, 0, 1, 1], [], []>} : vector<8x32xf32>, vector<32x32xf32>, vector<8x32xf32> -> vector<8x32xf32>
    %c0_102 = arith.constant 0 : index
    %c0_103 = arith.constant 0 : index
    %102 = vector.load %arg7[%c0_102, %c0_103] : memref<1x32xf32, #tpu.memory_space<vmem>>, vector<1x32xf32>
    %103 = vector.broadcast %102 : vector<1x32xf32> to vector<8x32xf32>
    %104 = arith.addf %101, %103 : vector<8x32xf32>
    %c0_104 = arith.constant 0 : index
    %c0_105 = arith.constant 0 : index
    %105 = memref.load %arg1[%c0_104, %c0_105] : memref<1x1xf32, #tpu.memory_space<smem>>
    %c0_106 = arith.constant 0 : index
    %c0_107 = arith.constant 0 : index
    %c0_108 = arith.constant 0 : index
    %106 = vector.load %arg3[%c0_106, %c0_107, %c0_108] : memref<1x8x32xf32, #tpu.memory_space<vmem>>, vector<1x8x32xf32>
    %107 = vector.shape_cast %106 : vector<1x8x32xf32> to vector<8x32xf32>
    %108 = vector.broadcast %105 : f32 to vector<8x32xf32>
    %109 = arith.mulf %108, %107 : vector<8x32xf32>
    %110 = arith.addf %109, %104 : vector<8x32xf32>
    %111 = vector.shape_cast %110 : vector<8x32xf32> to vector<1x8x32xf32>
    %112 = vector.shape_cast %111 : vector<1x8x32xf32> to vector<1x8x32xf32>
    %113 = vector.broadcast %112 : vector<1x8x32xf32> to vector<4x8x32xf32>
    %c0_109 = arith.constant 0 : index
    %c0_110 = arith.constant 0 : index
    %c0_111 = arith.constant 0 : index
    %c0_112 = arith.constant 0 : index
    %114 = vector.load %arg8[%c0_109, %c0_110, %c0_111, %c0_112] : memref<2x4x32x24xf32, #tpu.memory_space<vmem>>, vector<1x4x32x24xf32>
    %115 = vector.shape_cast %114 : vector<1x4x32x24xf32> to vector<4x32x24xf32>
    %cst_113 = arith.constant dense<0.000000e+00> : vector<4x8x24xf32>
    %116 = tpu.matmul %113, %115, %cst_113 {dimension_numbers = #tpu.dot_dimension_numbers<[2], [1], [1], [2], [0, 0, 0, 1, 1, 2], [0], [0]>} : vector<4x8x32xf32>, vector<4x32x24xf32>, vector<4x8x24xf32> -> vector<4x8x24xf32>
    %117 = vector.extract_strided_slice %116 {offsets = [0, 0, 0], sizes = [4, 8, 8], strides = [1, 1, 1]} : vector<4x8x24xf32> to vector<4x8x8xf32>
    %118 = vector.extract_strided_slice %116 {offsets = [0, 0, 8], sizes = [4, 8, 8], strides = [1, 1, 1]} : vector<4x8x24xf32> to vector<4x8x8xf32>
    %119 = vector.extract_strided_slice %116 {offsets = [0, 0, 16], sizes = [4, 8, 8], strides = [1, 1, 1]} : vector<4x8x24xf32> to vector<4x8x8xf32>
    %cst_114 = arith.constant dense<0.000000e+00> : vector<4x8x8xf32>
    %120 = tpu.matmul %117, %118, %cst_114 {dimension_numbers = #tpu.dot_dimension_numbers<[2], [2], [1], [1], [0, 0, 0, 1, 1, 1], [0], [0]>} : vector<4x8x8xf32>, vector<4x8x8xf32>, vector<4x8x8xf32> -> vector<4x8x8xf32>
    %cst_115 = arith.constant 0.353553385 : f32
    %121 = vector.broadcast %cst_115 : f32 to vector<4x8x8xf32>
    %122 = arith.mulf %120, %121 : vector<4x8x8xf32>
    %cst_116 = arith.constant dense<0xFF800000> : vector<4x8xf32>
    %123 = vector.multi_reduction <maximumf>, %122, %cst_116 [2] : vector<4x8x8xf32> to vector<4x8xf32>
    %124 = vector.shape_cast %123 : vector<4x8xf32> to vector<4x8x1xf32>
    %125 = vector.broadcast %124 : vector<4x8x1xf32> to vector<4x8x8xf32>
    %126 = arith.subf %122, %125 : vector<4x8x8xf32>
    %127 = math.exp %126 : vector<4x8x8xf32>
    %cst_117 = arith.constant dense<0.000000e+00> : vector<4x8xf32>
    %128 = vector.multi_reduction <add>, %127, %cst_117 [2] : vector<4x8x8xf32> to vector<4x8xf32>
    %129 = vector.shape_cast %128 : vector<4x8xf32> to vector<4x8x1xf32>
    %130 = vector.broadcast %129 : vector<4x8x1xf32> to vector<4x8x8xf32>
    %131 = arith.divf %127, %130 : vector<4x8x8xf32>
    %c0_118 = arith.constant 0 : index
    %c0_119 = arith.constant 0 : index
    %c0_120 = arith.constant 0 : index
    %c0_121 = arith.constant 0 : index
    %c0_122 = arith.constant 0 : index
    %132 = vector.load %arg23[%c0_118, %c0_119, %c0_120, %c0_121, %c0_122] : memref<1x2x4x8x8xf32, #tpu.memory_space<vmem>>, vector<1x1x4x8x8xf32>
    %133 = vector.shape_cast %132 : vector<1x1x4x8x8xf32> to vector<4x8x8xf32>
    %134 = vector.shape_cast %131 : vector<4x8x8xf32> to vector<1x1x4x8x8xf32>
    tpu.vector_store %arg23[%c0_118, %c0_119, %c0_120, %c0_121, %c0_122], %134 {strides = array<i32>} : memref<1x2x4x8x8xf32, #tpu.memory_space<vmem>>, vector<1x1x4x8x8xf32>,
    %cst_123 = arith.constant dense<0.000000e+00> : vector<4x8x8xf32>
    %135 = tpu.matmul %131, %119, %cst_123 {dimension_numbers = #tpu.dot_dimension_numbers<[2], [1], [1], [2], [0, 0, 0, 1, 1, 2], [0], [0]>} : vector<4x8x8xf32>, vector<4x8x8xf32>, vector<4x8x8xf32> -> vector<4x8x8xf32>
    %c0_124 = arith.constant 0 : index
    %c0_125 = arith.constant 0 : index
    %c0_126 = arith.constant 0 : index
    %c0_127 = arith.constant 0 : index
    %136 = vector.load %arg10[%c0_124, %c0_125, %c0_126, %c0_127] : memref<2x4x8x32xf32, #tpu.memory_space<vmem>>, vector<1x4x8x32xf32>
    %137 = vector.shape_cast %136 : vector<1x4x8x32xf32> to vector<4x8x32xf32>
    %cst_128 = arith.constant dense<0.000000e+00> : vector<4x8x32xf32>
    %138 = tpu.matmul %135, %137, %cst_128 {dimension_numbers = #tpu.dot_dimension_numbers<[2], [1], [1], [2], [0, 0, 0, 1, 1, 2], [0], [0]>} : vector<4x8x8xf32>, vector<4x8x32xf32>, vector<4x8x32xf32> -> vector<4x8x32xf32>
    %c0_129 = arith.constant 0 : index
    %c0_130 = arith.constant 0 : index
    %c0_131 = arith.constant 0 : index
    %139 = vector.load %arg9[%c0_129, %c0_130, %c0_131] : memref<2x32x32xf32, #tpu.memory_space<vmem>>, vector<1x32x32xf32>
    %140 = vector.shape_cast %139 : vector<1x32x32xf32> to vector<32x32xf32>
    %cst_132 = arith.constant dense<0.000000e+00> : vector<8x32xf32>
    %141 = tpu.matmul %110, %140, %cst_132 {dimension_numbers = #tpu.dot_dimension_numbers<[1], [0], [0], [1], [0, 0, 1, 1], [], []>} : vector<8x32xf32>, vector<32x32xf32>, vector<8x32xf32> -> vector<8x32xf32>
    %cst_133 = arith.constant dense<0.000000e+00> : vector<8x32xf32>
    %142 = vector.multi_reduction <add>, %138, %cst_133 [0] : vector<4x8x32xf32> to vector<8x32xf32>
    %143 = arith.addf %141, %142 : vector<8x32xf32>
    %c0_134 = arith.constant 0 : index
    %c0_135 = arith.constant 0 : index
    %c0_136 = arith.constant 0 : index
    %144 = vector.load %arg11[%c0_134, %c0_135, %c0_136] : memref<2x1x32xf32, #tpu.memory_space<vmem>>, vector<1x1x32xf32>
    %145 = vector.shape_cast %144 : vector<1x1x32xf32> to vector<1x32xf32>
    %146 = vector.broadcast %145 : vector<1x32xf32> to vector<8x32xf32>
    %147 = arith.addf %143, %146 : vector<8x32xf32>
    %148 = arith.addf %147, %110 : vector<8x32xf32>
    %c0_137 = arith.constant 0 : index
    %c0_138 = arith.constant 0 : index
    %c0_139 = arith.constant 0 : index
    %149 = vector.load %arg12[%c0_137, %c0_138, %c0_139] : memref<2x1x32xf32, #tpu.memory_space<vmem>>, vector<1x1x32xf32>
    %150 = vector.shape_cast %149 : vector<1x1x32xf32> to vector<1x32xf32>
    %c0_140 = arith.constant 0 : index
    %c0_141 = arith.constant 0 : index
    %c0_142 = arith.constant 0 : index
    %151 = vector.load %arg13[%c0_140, %c0_141, %c0_142] : memref<2x1x32xf32, #tpu.memory_space<vmem>>, vector<1x1x32xf32>
    %152 = vector.shape_cast %151 : vector<1x1x32xf32> to vector<1x32xf32>
    %cst_143 = arith.constant dense<0.000000e+00> : vector<8xf32>
    %153 = vector.multi_reduction <add>, %148, %cst_143 [1] : vector<8x32xf32> to vector<8xf32>
    %154 = vector.shape_cast %153 : vector<8xf32> to vector<8x1xf32>
    %cst_144 = arith.constant 3.200000e+01 : f32
    %155 = vector.broadcast %cst_144 : f32 to vector<8x1xf32>
    %156 = arith.divf %154, %155 : vector<8x1xf32>
    %157 = vector.broadcast %156 : vector<8x1xf32> to vector<8x32xf32>
    %158 = arith.subf %148, %157 : vector<8x32xf32>
    %159 = arith.mulf %158, %158 : vector<8x32xf32>
    %cst_145 = arith.constant dense<0.000000e+00> : vector<8xf32>
    %160 = vector.multi_reduction <add>, %159, %cst_145 [1] : vector<8x32xf32> to vector<8xf32>
    %161 = vector.shape_cast %160 : vector<8xf32> to vector<8x1xf32>
    %cst_146 = arith.constant 3.200000e+01 : f32
    %162 = vector.broadcast %cst_146 : f32 to vector<8x1xf32>
    %163 = arith.divf %161, %162 : vector<8x1xf32>
    %164 = vector.broadcast %156 : vector<8x1xf32> to vector<8x32xf32>
    %165 = arith.subf %148, %164 : vector<8x32xf32>
    %cst_147 = arith.constant 9.99999974E-6 : f32
    %166 = vector.broadcast %cst_147 : f32 to vector<8x1xf32>
    %167 = arith.addf %163, %166 : vector<8x1xf32>
    %168 = math.rsqrt %167 : vector<8x1xf32>
    %169 = vector.broadcast %168 : vector<8x1xf32> to vector<8x32xf32>
    %170 = arith.mulf %165, %169 : vector<8x32xf32>
    %171 = vector.broadcast %150 : vector<1x32xf32> to vector<8x32xf32>
    %172 = arith.mulf %170, %171 : vector<8x32xf32>
    %173 = vector.broadcast %152 : vector<1x32xf32> to vector<8x32xf32>
    %174 = arith.addf %172, %173 : vector<8x32xf32>
    %c0_148 = arith.constant 0 : index
    %c0_149 = arith.constant 0 : index
    %c0_150 = arith.constant 0 : index
    %175 = vector.load %arg14[%c0_148, %c0_149, %c0_150] : memref<2x32x128xf32, #tpu.memory_space<vmem>>, vector<1x32x128xf32>
    %176 = vector.shape_cast %175 : vector<1x32x128xf32> to vector<32x128xf32>
    %cst_151 = arith.constant dense<0.000000e+00> : vector<8x128xf32>
    %177 = tpu.matmul %174, %176, %cst_151 {dimension_numbers = #tpu.dot_dimension_numbers<[1], [0], [0], [1], [0, 0, 1, 1], [], []>} : vector<8x32xf32>, vector<32x128xf32>, vector<8x128xf32> -> vector<8x128xf32>
    %c0_152 = arith.constant 0 : index
    %c0_153 = arith.constant 0 : index
    %c0_154 = arith.constant 0 : index
    %178 = vector.load %arg15[%c0_152, %c0_153, %c0_154] : memref<2x1x128xf32, #tpu.memory_space<vmem>>, vector<1x1x128xf32>
    %179 = vector.shape_cast %178 : vector<1x1x128xf32> to vector<1x128xf32>
    %180 = vector.broadcast %179 : vector<1x128xf32> to vector<8x128xf32>
    %181 = arith.addf %177, %180 : vector<8x128xf32>
    %cst_155 = arith.constant 0.000000e+00 : f32
    %182 = vector.broadcast %cst_155 : f32 to vector<8x128xf32>
    %183 = arith.maximumf %181, %182 : vector<8x128xf32>
    %c0_156 = arith.constant 0 : index
    %c0_157 = arith.constant 0 : index
    %c0_158 = arith.constant 0 : index
    %184 = vector.load %arg16[%c0_156, %c0_157, %c0_158] : memref<2x128x32xf32, #tpu.memory_space<vmem>>, vector<1x128x32xf32>
    %185 = vector.shape_cast %184 : vector<1x128x32xf32> to vector<128x32xf32>
    %cst_159 = arith.constant dense<0.000000e+00> : vector<8x32xf32>
    %186 = tpu.matmul %183, %185, %cst_159 {dimension_numbers = #tpu.dot_dimension_numbers<[1], [0], [0], [1], [0, 0, 1, 1], [], []>} : vector<8x128xf32>, vector<128x32xf32>, vector<8x32xf32> -> vector<8x32xf32>
    %c0_160 = arith.constant 0 : index
    %c0_161 = arith.constant 0 : index
    %c0_162 = arith.constant 0 : index
    %187 = vector.load %arg17[%c0_160, %c0_161, %c0_162] : memref<2x1x32xf32, #tpu.memory_space<vmem>>, vector<1x1x32xf32>
    %188 = vector.shape_cast %187 : vector<1x1x32xf32> to vector<1x32xf32>
    %189 = vector.broadcast %188 : vector<1x32xf32> to vector<8x32xf32>
    %190 = arith.addf %186, %189 : vector<8x32xf32>
    %191 = arith.addf %190, %174 : vector<8x32xf32>
    %c0_163 = arith.constant 0 : index
    %c0_164 = arith.constant 0 : index
    %c0_165 = arith.constant 0 : index
    %192 = vector.load %arg18[%c0_163, %c0_164, %c0_165] : memref<2x1x32xf32, #tpu.memory_space<vmem>>, vector<1x1x32xf32>
    %193 = vector.shape_cast %192 : vector<1x1x32xf32> to vector<1x32xf32>
    %c0_166 = arith.constant 0 : index
    %c0_167 = arith.constant 0 : index
    %c0_168 = arith.constant 0 : index
    %194 = vector.load %arg19[%c0_166, %c0_167, %c0_168] : memref<2x1x32xf32, #tpu.memory_space<vmem>>, vector<1x1x32xf32>
    %195 = vector.shape_cast %194 : vector<1x1x32xf32> to vector<1x32xf32>
    %cst_169 = arith.constant dense<0.000000e+00> : vector<8xf32>
    %196 = vector.multi_reduction <add>, %191, %cst_169 [1] : vector<8x32xf32> to vector<8xf32>
    %197 = vector.shape_cast %196 : vector<8xf32> to vector<8x1xf32>
    %cst_170 = arith.constant 3.200000e+01 : f32
    %198 = vector.broadcast %cst_170 : f32 to vector<8x1xf32>
    %199 = arith.divf %197, %198 : vector<8x1xf32>
    %200 = vector.broadcast %199 : vector<8x1xf32> to vector<8x32xf32>
    %201 = arith.subf %191, %200 : vector<8x32xf32>
    %202 = arith.mulf %201, %201 : vector<8x32xf32>
    %cst_171 = arith.constant dense<0.000000e+00> : vector<8xf32>
    %203 = vector.multi_reduction <add>, %202, %cst_171 [1] : vector<8x32xf32> to vector<8xf32>
    %204 = vector.shape_cast %203 : vector<8xf32> to vector<8x1xf32>
    %cst_172 = arith.constant 3.200000e+01 : f32
    %205 = vector.broadcast %cst_172 : f32 to vector<8x1xf32>
    %206 = arith.divf %204, %205 : vector<8x1xf32>
    %207 = vector.broadcast %199 : vector<8x1xf32> to vector<8x32xf32>
    %208 = arith.subf %191, %207 : vector<8x32xf32>
    %cst_173 = arith.constant 9.99999974E-6 : f32
    %209 = vector.broadcast %cst_173 : f32 to vector<8x1xf32>
    %210 = arith.addf %206, %209 : vector<8x1xf32>
    %211 = math.rsqrt %210 : vector<8x1xf32>
    %212 = vector.broadcast %211 : vector<8x1xf32> to vector<8x32xf32>
    %213 = arith.mulf %208, %212 : vector<8x32xf32>
    %214 = vector.broadcast %193 : vector<1x32xf32> to vector<8x32xf32>
    %215 = arith.mulf %213, %214 : vector<8x32xf32>
    %216 = vector.broadcast %195 : vector<1x32xf32> to vector<8x32xf32>
    %217 = arith.addf %215, %216 : vector<8x32xf32>
    %218 = vector.shape_cast %217 : vector<8x32xf32> to vector<1x8x32xf32>
    %219 = vector.shape_cast %218 : vector<1x8x32xf32> to vector<1x8x32xf32>
    %220 = vector.broadcast %219 : vector<1x8x32xf32> to vector<4x8x32xf32>
    %c1_174 = arith.constant 1 : index
    %c0_175 = arith.constant 0 : index
    %c0_176 = arith.constant 0 : index
    %c0_177 = arith.constant 0 : index
    %221 = vector.load %arg8[%c1_174, %c0_175, %c0_176, %c0_177] : memref<2x4x32x24xf32, #tpu.memory_space<vmem>>, vector<1x4x32x24xf32>
    %222 = vector.shape_cast %221 : vector<1x4x32x24xf32> to vector<4x32x24xf32>
    %cst_178 = arith.constant dense<0.000000e+00> : vector<4x8x24xf32>
    %223 = tpu.matmul %220, %222, %cst_178 {dimension_numbers = #tpu.dot_dimension_numbers<[2], [1], [1], [2], [0, 0, 0, 1, 1, 2], [0], [0]>} : vector<4x8x32xf32>, vector<4x32x24xf32>, vector<4x8x24xf32> -> vector<4x8x24xf32>
    %224 = vector.extract_strided_slice %223 {offsets = [0, 0, 0], sizes = [4, 8, 8], strides = [1, 1, 1]} : vector<4x8x24xf32> to vector<4x8x8xf32>
    %225 = vector.extract_strided_slice %223 {offsets = [0, 0, 8], sizes = [4, 8, 8], strides = [1, 1, 1]} : vector<4x8x24xf32> to vector<4x8x8xf32>
    %226 = vector.extract_strided_slice %223 {offsets = [0, 0, 16], sizes = [4, 8, 8], strides = [1, 1, 1]} : vector<4x8x24xf32> to vector<4x8x8xf32>
    %cst_179 = arith.constant dense<0.000000e+00> : vector<4x8x8xf32>
    %227 = tpu.matmul %224, %225, %cst_179 {dimension_numbers = #tpu.dot_dimension_numbers<[2], [2], [1], [1], [0, 0, 0, 1, 1, 1], [0], [0]>} : vector<4x8x8xf32>, vector<4x8x8xf32>, vector<4x8x8xf32> -> vector<4x8x8xf32>
    %cst_180 = arith.constant 0.353553385 : f32
    %228 = vector.broadcast %cst_180 : f32 to vector<4x8x8xf32>
    %229 = arith.mulf %227, %228 : vector<4x8x8xf32>
    %cst_181 = arith.constant dense<0xFF800000> : vector<4x8xf32>
    %230 = vector.multi_reduction <maximumf>, %229, %cst_181 [2] : vector<4x8x8xf32> to vector<4x8xf32>
    %231 = vector.shape_cast %230 : vector<4x8xf32> to vector<4x8x1xf32>
    %232 = vector.broadcast %231 : vector<4x8x1xf32> to vector<4x8x8xf32>
    %233 = arith.subf %229, %232 : vector<4x8x8xf32>
    %234 = math.exp %233 : vector<4x8x8xf32>
    %cst_182 = arith.constant dense<0.000000e+00> : vector<4x8xf32>
    %235 = vector.multi_reduction <add>, %234, %cst_182 [2] : vector<4x8x8xf32> to vector<4x8xf32>
    %236 = vector.shape_cast %235 : vector<4x8xf32> to vector<4x8x1xf32>
    %237 = vector.broadcast %236 : vector<4x8x1xf32> to vector<4x8x8xf32>
    %238 = arith.divf %234, %237 : vector<4x8x8xf32>
    %c0_183 = arith.constant 0 : index
    %c1_184 = arith.constant 1 : index
    %c0_185 = arith.constant 0 : index
    %c0_186 = arith.constant 0 : index
    %c0_187 = arith.constant 0 : index
    %239 = vector.load %arg23[%c0_183, %c1_184, %c0_185, %c0_186, %c0_187] : memref<1x2x4x8x8xf32, #tpu.memory_space<vmem>>, vector<1x1x4x8x8xf32>
    %240 = vector.shape_cast %239 : vector<1x1x4x8x8xf32> to vector<4x8x8xf32>
    %241 = vector.shape_cast %238 : vector<4x8x8xf32> to vector<1x1x4x8x8xf32>
    tpu.vector_store %arg23[%c0_183, %c1_184, %c0_185, %c0_186, %c0_187], %241 {strides = array<i32>} : memref<1x2x4x8x8xf32, #tpu.memory_space<vmem>>, vector<1x1x4x8x8xf32>,
    %cst_188 = arith.constant dense<0.000000e+00> : vector<4x8x8xf32>
    %242 = tpu.matmul %238, %226, %cst_188 {dimension_numbers = #tpu.dot_dimension_numbers<[2], [1], [1], [2], [0, 0, 0, 1, 1, 2], [0], [0]>} : vector<4x8x8xf32>, vector<4x8x8xf32>, vector<4x8x8xf32> -> vector<4x8x8xf32>
    %c1_189 = arith.constant 1 : index
    %c0_190 = arith.constant 0 : index
    %c0_191 = arith.constant 0 : index
    %c0_192 = arith.constant 0 : index
    %243 = vector.load %arg10[%c1_189, %c0_190, %c0_191, %c0_192] : memref<2x4x8x32xf32, #tpu.memory_space<vmem>>, vector<1x4x8x32xf32>
    %244 = vector.shape_cast %243 : vector<1x4x8x32xf32> to vector<4x8x32xf32>
    %cst_193 = arith.constant dense<0.000000e+00> : vector<4x8x32xf32>
    %245 = tpu.matmul %242, %244, %cst_193 {dimension_numbers = #tpu.dot_dimension_numbers<[2], [1], [1], [2], [0, 0, 0, 1, 1, 2], [0], [0]>} : vector<4x8x8xf32>, vector<4x8x32xf32>, vector<4x8x32xf32> -> vector<4x8x32xf32>
    %c1_194 = arith.constant 1 : index
    %c0_195 = arith.constant 0 : index
    %c0_196 = arith.constant 0 : index
    %246 = vector.load %arg9[%c1_194, %c0_195, %c0_196] : memref<2x32x32xf32, #tpu.memory_space<vmem>>, vector<1x32x32xf32>
    %247 = vector.shape_cast %246 : vector<1x32x32xf32> to vector<32x32xf32>
    %cst_197 = arith.constant dense<0.000000e+00> : vector<8x32xf32>
    %248 = tpu.matmul %217, %247, %cst_197 {dimension_numbers = #tpu.dot_dimension_numbers<[1], [0], [0], [1], [0, 0, 1, 1], [], []>} : vector<8x32xf32>, vector<32x32xf32>, vector<8x32xf32> -> vector<8x32xf32>
    %cst_198 = arith.constant dense<0.000000e+00> : vector<8x32xf32>
    %249 = vector.multi_reduction <add>, %245, %cst_198 [0] : vector<4x8x32xf32> to vector<8x32xf32>
    %250 = arith.addf %248, %249 : vector<8x32xf32>
    %c1_199 = arith.constant 1 : index
    %c0_200 = arith.constant 0 : index
    %c0_201 = arith.constant 0 : index
    %251 = vector.load %arg11[%c1_199, %c0_200, %c0_201] : memref<2x1x32xf32, #tpu.memory_space<vmem>>, vector<1x1x32xf32>
    %252 = vector.shape_cast %251 : vector<1x1x32xf32> to vector<1x32xf32>
    %253 = vector.broadcast %252 : vector<1x32xf32> to vector<8x32xf32>
    %254 = arith.addf %250, %253 : vector<8x32xf32>
    %255 = arith.addf %254, %217 : vector<8x32xf32>
    %c1_202 = arith.constant 1 : index
    %c0_203 = arith.constant 0 : index
    %c0_204 = arith.constant 0 : index
    %256 = vector.load %arg12[%c1_202, %c0_203, %c0_204] : memref<2x1x32xf32, #tpu.memory_space<vmem>>, vector<1x1x32xf32>
    %257 = vector.shape_cast %256 : vector<1x1x32xf32> to vector<1x32xf32>
    %c1_205 = arith.constant 1 : index
    %c0_206 = arith.constant 0 : index
    %c0_207 = arith.constant 0 : index
    %258 = vector.load %arg13[%c1_205, %c0_206, %c0_207] : memref<2x1x32xf32, #tpu.memory_space<vmem>>, vector<1x1x32xf32>
    %259 = vector.shape_cast %258 : vector<1x1x32xf32> to vector<1x32xf32>
    %cst_208 = arith.constant dense<0.000000e+00> : vector<8xf32>
    %260 = vector.multi_reduction <add>, %255, %cst_208 [1] : vector<8x32xf32> to vector<8xf32>
    %261 = vector.shape_cast %260 : vector<8xf32> to vector<8x1xf32>
    %cst_209 = arith.constant 3.200000e+01 : f32
    %262 = vector.broadcast %cst_209 : f32 to vector<8x1xf32>
    %263 = arith.divf %261, %262 : vector<8x1xf32>
    %264 = vector.broadcast %263 : vector<8x1xf32> to vector<8x32xf32>
    %265 = arith.subf %255, %264 : vector<8x32xf32>
    %266 = arith.mulf %265, %265 : vector<8x32xf32>
    %cst_210 = arith.constant dense<0.000000e+00> : vector<8xf32>
    %267 = vector.multi_reduction <add>, %266, %cst_210 [1] : vector<8x32xf32> to vector<8xf32>
    %268 = vector.shape_cast %267 : vector<8xf32> to vector<8x1xf32>
    %cst_211 = arith.constant 3.200000e+01 : f32
    %269 = vector.broadcast %cst_211 : f32 to vector<8x1xf32>
    %270 = arith.divf %268, %269 : vector<8x1xf32>
    %271 = vector.broadcast %263 : vector<8x1xf32> to vector<8x32xf32>
    %272 = arith.subf %255, %271 : vector<8x32xf32>
    %cst_212 = arith.constant 9.99999974E-6 : f32
    %273 = vector.broadcast %cst_212 : f32 to vector<8x1xf32>
    %274 = arith.addf %270, %273 : vector<8x1xf32>
    %275 = math.rsqrt %274 : vector<8x1xf32>
    %276 = vector.broadcast %275 : vector<8x1xf32> to vector<8x32xf32>
    %277 = arith.mulf %272, %276 : vector<8x32xf32>
    %278 = vector.broadcast %257 : vector<1x32xf32> to vector<8x32xf32>
    %279 = arith.mulf %277, %278 : vector<8x32xf32>
    %280 = vector.broadcast %259 : vector<1x32xf32> to vector<8x32xf32>
    %281 = arith.addf %279, %280 : vector<8x32xf32>
    %c1_213 = arith.constant 1 : index
    %c0_214 = arith.constant 0 : index
    %c0_215 = arith.constant 0 : index
    %282 = vector.load %arg14[%c1_213, %c0_214, %c0_215] : memref<2x32x128xf32, #tpu.memory_space<vmem>>, vector<1x32x128xf32>
    %283 = vector.shape_cast %282 : vector<1x32x128xf32> to vector<32x128xf32>
    %cst_216 = arith.constant dense<0.000000e+00> : vector<8x128xf32>
    %284 = tpu.matmul %281, %283, %cst_216 {dimension_numbers = #tpu.dot_dimension_numbers<[1], [0], [0], [1], [0, 0, 1, 1], [], []>} : vector<8x32xf32>, vector<32x128xf32>, vector<8x128xf32> -> vector<8x128xf32>
    %c1_217 = arith.constant 1 : index
    %c0_218 = arith.constant 0 : index
    %c0_219 = arith.constant 0 : index
    %285 = vector.load %arg15[%c1_217, %c0_218, %c0_219] : memref<2x1x128xf32, #tpu.memory_space<vmem>>, vector<1x1x128xf32>
    %286 = vector.shape_cast %285 : vector<1x1x128xf32> to vector<1x128xf32>
    %287 = vector.broadcast %286 : vector<1x128xf32> to vector<8x128xf32>
    %288 = arith.addf %284, %287 : vector<8x128xf32>
    %cst_220 = arith.constant 0.000000e+00 : f32
    %289 = vector.broadcast %cst_220 : f32 to vector<8x128xf32>
    %290 = arith.maximumf %288, %289 : vector<8x128xf32>
    %c1_221 = arith.constant 1 : index
    %c0_222 = arith.constant 0 : index
    %c0_223 = arith.constant 0 : index
    %291 = vector.load %arg16[%c1_221, %c0_222, %c0_223] : memref<2x128x32xf32, #tpu.memory_space<vmem>>, vector<1x128x32xf32>
    %292 = vector.shape_cast %291 : vector<1x128x32xf32> to vector<128x32xf32>
    %cst_224 = arith.constant dense<0.000000e+00> : vector<8x32xf32>
    %293 = tpu.matmul %290, %292, %cst_224 {dimension_numbers = #tpu.dot_dimension_numbers<[1], [0], [0], [1], [0, 0, 1, 1], [], []>} : vector<8x128xf32>, vector<128x32xf32>, vector<8x32xf32> -> vector<8x32xf32>
    %c1_225 = arith.constant 1 : index
    %c0_226 = arith.constant 0 : index
    %c0_227 = arith.constant 0 : index
    %294 = vector.load %arg17[%c1_225, %c0_226, %c0_227] : memref<2x1x32xf32, #tpu.memory_space<vmem>>, vector<1x1x32xf32>
    %295 = vector.shape_cast %294 : vector<1x1x32xf32> to vector<1x32xf32>
    %296 = vector.broadcast %295 : vector<1x32xf32> to vector<8x32xf32>
    %297 = arith.addf %293, %296 : vector<8x32xf32>
    %298 = arith.addf %297, %281 : vector<8x32xf32>
    %c1_228 = arith.constant 1 : index
    %c0_229 = arith.constant 0 : index
    %c0_230 = arith.constant 0 : index
    %299 = vector.load %arg18[%c1_228, %c0_229, %c0_230] : memref<2x1x32xf32, #tpu.memory_space<vmem>>, vector<1x1x32xf32>
    %300 = vector.shape_cast %299 : vector<1x1x32xf32> to vector<1x32xf32>
    %c1_231 = arith.constant 1 : index
    %c0_232 = arith.constant 0 : index
    %c0_233 = arith.constant 0 : index
    %301 = vector.load %arg19[%c1_231, %c0_232, %c0_233] : memref<2x1x32xf32, #tpu.memory_space<vmem>>, vector<1x1x32xf32>
    %302 = vector.shape_cast %301 : vector<1x1x32xf32> to vector<1x32xf32>
    %cst_234 = arith.constant dense<0.000000e+00> : vector<8xf32>
    %303 = vector.multi_reduction <add>, %298, %cst_234 [1] : vector<8x32xf32> to vector<8xf32>
    %304 = vector.shape_cast %303 : vector<8xf32> to vector<8x1xf32>
    %cst_235 = arith.constant 3.200000e+01 : f32
    %305 = vector.broadcast %cst_235 : f32 to vector<8x1xf32>
    %306 = arith.divf %304, %305 : vector<8x1xf32>
    %307 = vector.broadcast %306 : vector<8x1xf32> to vector<8x32xf32>
    %308 = arith.subf %298, %307 : vector<8x32xf32>
    %309 = arith.mulf %308, %308 : vector<8x32xf32>
    %cst_236 = arith.constant dense<0.000000e+00> : vector<8xf32>
    %310 = vector.multi_reduction <add>, %309, %cst_236 [1] : vector<8x32xf32> to vector<8xf32>
    %311 = vector.shape_cast %310 : vector<8xf32> to vector<8x1xf32>
    %cst_237 = arith.constant 3.200000e+01 : f32
    %312 = vector.broadcast %cst_237 : f32 to vector<8x1xf32>
    %313 = arith.divf %311, %312 : vector<8x1xf32>
    %314 = vector.broadcast %306 : vector<8x1xf32> to vector<8x32xf32>
    %315 = arith.subf %298, %314 : vector<8x32xf32>
    %cst_238 = arith.constant 9.99999974E-6 : f32
    %316 = vector.broadcast %cst_238 : f32 to vector<8x1xf32>
    %317 = arith.addf %313, %316 : vector<8x1xf32>
    %318 = math.rsqrt %317 : vector<8x1xf32>
    %319 = vector.broadcast %318 : vector<8x1xf32> to vector<8x32xf32>
    %320 = arith.mulf %315, %319 : vector<8x32xf32>
    %321 = vector.broadcast %300 : vector<1x32xf32> to vector<8x32xf32>
    %322 = arith.mulf %320, %321 : vector<8x32xf32>
    %323 = vector.broadcast %302 : vector<1x32xf32> to vector<8x32xf32>
    %324 = arith.addf %322, %323 : vector<8x32xf32>
    %c0_239 = arith.constant 0 : index
    %c0_240 = arith.constant 0 : index
    %325 = vector.load %arg20[%c0_239, %c0_240] : memref<32x128xf32, #tpu.memory_space<vmem>>, vector<32x128xf32>
    %cst_241 = arith.constant dense<0.000000e+00> : vector<8x128xf32>
    %326 = tpu.matmul %324, %325, %cst_241 {dimension_numbers = #tpu.dot_dimension_numbers<[1], [0], [0], [1], [0, 0, 1, 1], [], []>} : vector<8x32xf32>, vector<32x128xf32>, vector<8x128xf32> -> vector<8x128xf32>
    %c0_242 = arith.constant 0 : index
    %c0_243 = arith.constant 0 : index
    %327 = vector.load %arg21[%c0_242, %c0_243] : memref<1x128xf32, #tpu.memory_space<vmem>>, vector<1x128xf32>
    %328 = vector.broadcast %327 : vector<1x128xf32> to vector<8x128xf32>
    %329 = arith.addf %326, %328 : vector<8x128xf32>
    %cst_244 = arith.constant dense<0xFF800000> : vector<8xf32>
    %330 = vector.multi_reduction <maximumf>, %329, %cst_244 [1] : vector<8x128xf32> to vector<8xf32>
    %331 = vector.shape_cast %330 : vector<8xf32> to vector<8x1xf32>
    %332 = vector.broadcast %331 : vector<8x1xf32> to vector<8x128xf32>
    %333 = arith.subf %329, %332 : vector<8x128xf32>
    %334 = math.exp %333 : vector<8x128xf32>
    %cst_245 = arith.constant dense<0.000000e+00> : vector<8xf32>
    %335 = vector.multi_reduction <add>, %334, %cst_245 [1] : vector<8x128xf32> to vector<8xf32>
    %336 = vector.shape_cast %335 : vector<8xf32> to vector<8x1xf32>
    %337 = math.log %336 : vector<8x1xf32>
    %338 = arith.addf %331, %337 : vector<8x1xf32>
    %339 = vector.broadcast %338 : vector<8x1xf32> to vector<8x128xf32>
    %340 = arith.subf %329, %339 : vector<8x128xf32>
    %c0_246 = arith.constant 0 : index
    %c0_247 = arith.constant 0 : index
    %c0_248 = arith.constant 0 : index
    %341 = vector.load %arg22[%c0_246, %c0_247, %c0_248] : memref<1x8x128xf32, #tpu.memory_space<vmem>>, vector<1x8x128xf32>
    %342 = vector.shape_cast %341 : vector<1x8x128xf32> to vector<8x128xf32>
    %343 = vector.shape_cast %340 : vector<8x128xf32> to vector<1x8x128xf32>
    tpu.vector_store %arg22[%c0_246, %c0_247, %c0_248], %343 {strides = array<i32>} : memref<1x8x128xf32, #tpu.memory_space<vmem>>, vector<1x8x128xf32>,
    return
  }
  func.func @transform_0(%arg0: i32) -> (i32, i32) {
    %c0_i32 = arith.constant 0 : i32
    %c0_i32_0 = arith.constant 0 : i32
    %c0_i32_1 = arith.constant 0 : i32
    return %c0_i32, %c0_i32_0 : i32, i32
  }
  func.func @transform_1(%arg0: i32) -> (i32, i32, i32) {
    %c0_i32 = arith.constant 0 : i32
    %c0_i32_0 = arith.constant 0 : i32
    %c0_i32_1 = arith.constant 0 : i32
    return %arg0, %c0_i32, %c0_i32_0 : i32, i32, i32
  }
  func.func @transform_2(%arg0: i32) -> (i32, i32, i32) {
    %c0_i32 = arith.constant 0 : i32
    %c0_i32_0 = arith.constant 0 : i32
    %c0_i32_1 = arith.constant 0 : i32
    return %arg0, %c0_i32, %c0_i32_0 : i32, i32, i32
  }
  func.func @transform_3(%arg0: i32) -> (i32, i32, i32, i32) {
    %c0_i32 = arith.constant 0 : i32
    %c0_i32_0 = arith.constant 0 : i32
    %c0_i32_1 = arith.constant 0 : i32
    %c0_i32_2 = arith.constant 0 : i32
    %c0_i32_3 = arith.constant 0 : i32
    return %c0_i32, %c0_i32_0, %c0_i32_1, %c0_i32_2 : i32, i32, i32, i32
  }
  func.func @transform_4(%arg0: i32) -> (i32, i32, i32) {
    %c0_i32 = arith.constant 0 : i32
    %c0_i32_0 = arith.constant 0 : i32
    %c0_i32_1 = arith.constant 0 : i32
    %c0_i32_2 = arith.constant 0 : i32
    return %c0_i32, %c0_i32_0, %c0_i32_1 : i32, i32, i32
  }
  func.func @transform_5(%arg0: i32) -> (i32, i32) {
    %c0_i32 = arith.constant 0 : i32
    %c0_i32_0 = arith.constant 0 : i32
    %c0_i32_1 = arith.constant 0 : i32
    return %c0_i32, %c0_i32_0 : i32, i32
  }
  func.func @transform_6(%arg0: i32) -> (i32, i32) {
    %c0_i32 = arith.constant 0 : i32
    %c0_i32_0 = arith.constant 0 : i32
    %c0_i32_1 = arith.constant 0 : i32
    return %c0_i32, %c0_i32_0 : i32, i32
  }
  func.func @transform_7(%arg0: i32) -> (i32, i32, i32, i32) {
    %c0_i32 = arith.constant 0 : i32
    %c0_i32_0 = arith.constant 0 : i32
    %c0_i32_1 = arith.constant 0 : i32
    %c0_i32_2 = arith.constant 0 : i32
    %c0_i32_3 = arith.constant 0 : i32
    return %c0_i32, %c0_i32_0, %c0_i32_1, %c0_i32_2 : i32, i32, i32, i32
  }
  func.func @transform_8(%arg0: i32) -> (i32, i32, i32) {
    %c0_i32 = arith.constant 0 : i32
    %c0_i32_0 = arith.constant 0 : i32
    %c0_i32_1 = arith.constant 0 : i32
    %c0_i32_2 = arith.constant 0 : i32
    return %c0_i32, %c0_i32_0, %c0_i32_1 : i32, i32, i32
  }
  func.func @transform_9(%arg0: i32) -> (i32, i32, i32, i32) {
    %c0_i32 = arith.constant 0 : i32
    %c0_i32_0 = arith.constant 0 : i32
    %c0_i32_1 = arith.constant 0 : i32
    %c0_i32_2 = arith.constant 0 : i32
    %c0_i32_3 = arith.constant 0 : i32
    return %c0_i32, %c0_i32_0, %c0_i32_1, %c0_i32_2 : i32, i32, i32, i32
  }
  func.func @transform_10(%arg0: i32) -> (i32, i32, i32) {
    %c0_i32 = arith.constant 0 : i32
    %c0_i32_0 = arith.constant 0 : i32
    %c0_i32_1 = arith.constant 0 : i32
    %c0_i32_2 = arith.constant 0 : i32
    return %c0_i32, %c0_i32_0, %c0_i32_1 : i32, i32, i32
  }
  func.func @transform_11(%arg0: i32) -> (i32, i32, i32) {
    %c0_i32 = arith.constant 0 : i32
    %c0_i32_0 = arith.constant 0 : i32
    %c0_i32_1 = arith.constant 0 : i32
    %c0_i32_2 = arith.constant 0 : i32
    return %c0_i32, %c0_i32_0, %c0_i32_1 : i32, i32, i32
  }
  func.func @transform_12(%arg0: i32) -> (i32, i32, i32) {
    %c0_i32 = arith.constant 0 : i32
    %c0_i32_0 = arith.constant 0 : i32
    %c0_i32_1 = arith.constant 0 : i32
    %c0_i32_2 = arith.constant 0 : i32
    return %c0_i32, %c0_i32_0, %c0_i32_1 : i32, i32, i32
  }
  func.func @transform_13(%arg0: i32) -> (i32, i32, i32) {
    %c0_i32 = arith.constant 0 : i32
    %c0_i32_0 = arith.constant 0 : i32
    %c0_i32_1 = arith.constant 0 : i32
    %c0_i32_2 = arith.constant 0 : i32
    return %c0_i32, %c0_i32_0, %c0_i32_1 : i32, i32, i32
  }
  func.func @transform_14(%arg0: i32) -> (i32, i32, i32) {
    %c0_i32 = arith.constant 0 : i32
    %c0_i32_0 = arith.constant 0 : i32
    %c0_i32_1 = arith.constant 0 : i32
    %c0_i32_2 = arith.constant 0 : i32
    return %c0_i32, %c0_i32_0, %c0_i32_1 : i32, i32, i32
  }
  func.func @transform_15(%arg0: i32) -> (i32, i32, i32) {
    %c0_i32 = arith.constant 0 : i32
    %c0_i32_0 = arith.constant 0 : i32
    %c0_i32_1 = arith.constant 0 : i32
    %c0_i32_2 = arith.constant 0 : i32
    return %c0_i32, %c0_i32_0, %c0_i32_1 : i32, i32, i32
  }
  func.func @transform_16(%arg0: i32) -> (i32, i32, i32) {
    %c0_i32 = arith.constant 0 : i32
    %c0_i32_0 = arith.constant 0 : i32
    %c0_i32_1 = arith.constant 0 : i32
    %c0_i32_2 = arith.constant 0 : i32
    return %c0_i32, %c0_i32_0, %c0_i32_1 : i32, i32, i32
  }
  func.func @transform_17(%arg0: i32) -> (i32, i32, i32) {
    %c0_i32 = arith.constant 0 : i32
    %c0_i32_0 = arith.constant 0 : i32
    %c0_i32_1 = arith.constant 0 : i32
    %c0_i32_2 = arith.constant 0 : i32
    return %c0_i32, %c0_i32_0, %c0_i32_1 : i32, i32, i32
  }
  func.func @transform_18(%arg0: i32) -> (i32, i32, i32) {
    %c0_i32 = arith.constant 0 : i32
    %c0_i32_0 = arith.constant 0 : i32
    %c0_i32_1 = arith.constant 0 : i32
    %c0_i32_2 = arith.constant 0 : i32
    return %c0_i32, %c0_i32_0, %c0_i32_1 : i32, i32, i32
  }
  func.func @transform_19(%arg0: i32) -> (i32, i32) {
    %c0_i32 = arith.constant 0 : i32
    %c0_i32_0 = arith.constant 0 : i32
    %c0_i32_1 = arith.constant 0 : i32
    return %c0_i32, %c0_i32_0 : i32, i32
  }
  func.func @transform_20(%arg0: i32) -> (i32, i32) {
    %c0_i32 = arith.constant 0 : i32
    %c0_i32_0 = arith.constant 0 : i32
    %c0_i32_1 = arith.constant 0 : i32
    return %c0_i32, %c0_i32_0 : i32, i32
  }
  func.func @transform_21(%arg0: i32) -> (i32, i32, i32) {
    %c0_i32 = arith.constant 0 : i32
    %c0_i32_0 = arith.constant 0 : i32
    %c0_i32_1 = arith.constant 0 : i32
    return %arg0, %c0_i32, %c0_i32_0 : i32, i32, i32
  }
  func.func @transform_22(%arg0: i32) -> (i32, i32, i32, i32, i32) {
    %c0_i32 = arith.constant 0 : i32
    %c0_i32_0 = arith.constant 0 : i32
    %c0_i32_1 = arith.constant 0 : i32
    %c0_i32_2 = arith.constant 0 : i32
    %c0_i32_3 = arith.constant 0 : i32
    return %arg0, %c0_i32, %c0_i32_0, %c0_i32_1, %c0_i32_2 : i32, i32, i32, i32, i32
  }
}

</mosaic_0001>

<bundles_post_ra>
// kernel: bert_mlm_forward.1
= control target key start
LH: loop header
LB: loop body
LE: loop exit
PB: predicated region body
PF: predicated region fallthrough
CT: control target
= control target key end

     0   :  { %s7931_s0 = inlined_call_operand.<no memory space> [shape: f32[1,1], index: 0, kind: input, shape index: {}]   ;;  %s7932_s1 = inlined_call_operand.vmem [shape: f32[2,8,32], index: 1, kind: input, shape index: {}]   ;;  %s7933_s2 = inlined_call_operand.vmem [shape: f32[2,8,32], index: 2, kind: input, shape index: {}]   ;;  %s7934_s3 = inlined_call_operand.vmem [shape: f32[3,5,32,32], index: 3, kind: input, shape index: {}]   ;;  %s7935_s4 = inlined_call_operand.vmem [shape: f32[3,1,32], index: 4, kind: input, shape index: {}]   ;;  %s7936_s5 = inlined_call_operand.vmem [shape: f32[32,32], index: 5, kind: input, shape index: {}]   ;;  %s7937_s6 = inlined_call_operand.vmem [shape: f32[1,32], index: 6, kind: input, shape index: {}]   ;;  %s7938_s7 = inlined_call_operand.vmem [shape: f32[2,4,32,24], index: 7, kind: input, shape index: {}]   ;;  %s7939_s8 = inlined_call_operand.vmem [shape: f32[2,32,32], index: 8, kind: input, shape index: {}]   ;;  %s7940_s9 = inlined_call_operand.vmem [shape: f32[2,4,8,32], index: 9, kind: input, shape index: {}]   ;;  %s7941_s10 = inlined_call_operand.vmem [shape: f32[2,1,32], index: 10, kind: input, shape index: {}]   ;;  %s7942_s11 = inlined_call_operand.vmem [shape: f32[2,1,32], index: 11, kind: input, shape index: {}]   ;;  %s7943_s12 = inlined_call_operand.vmem [shape: f32[2,1,32], index: 12, kind: input, shape index: {}]   ;;  %s7944_s13 = inlined_call_operand.vmem [shape: f32[2,32,128], index: 13, kind: input, shape index: {}]   ;;  %s7945_s14 = inlined_call_operand.vmem [shape: f32[2,1,128], index: 14, kind: input, shape index: {}]   ;;  %s7946_s15 = inlined_call_operand.vmem [shape: f32[2,128,32], index: 15, kind: input, shape index: {}]   ;;  %s7947_s16 = inlined_call_operand.vmem [shape: f32[2,1,32], index: 16, kind: input, shape index: {}]   ;;  %s7948_s17 = inlined_call_operand.vmem [shape: f32[2,1,32], index: 17, kind: input, shape index: {}]   ;;  %s7949_s18 = inlined_call_operand.vmem [shape: f32[2,1,32], index: 18, kind: input, shape index: {}]   ;;  %s7950_s19 = inlined_call_operand.vmem [shape: f32[32,128], index: 19, kind: input, shape index: {}]   ;;  %s7951_s20 = inlined_call_operand.vmem [shape: f32[1,128], index: 20, kind: input, shape index: {}]   ;;  %s7952_s21 = inlined_call_operand.hbm [shape: f32[2,8,128], index: 21, kind: output, shape index: {0}]   ;;  %s7953_s22 = inlined_call_operand.vmem [shape: f32[2,2,4,8,8], index: 22, kind: output, shape index: {1}]  }
   0x1   :  { %7971 = sst [smem:[#allocation15_spill]] %s7931_s0 }
   0x2   :  { %7972 = sst [smem:[#allocation16_spill]] %s7932_s1  ;;  %s7980_s29 = sld [smem:[#allocation15_spill]] }
   0x3   :  { %7973 = sst [smem:[#allocation17_spill]] %s7933_s2 }
   0x4   :  { %7974 = sst [smem:[#allocation18_spill]] %s7934_s3 }
   0x5   :  { %7975 = sst [smem:[#allocation19_spill]] %s7935_s4 }
   0x6   :  { %7976 = sst [smem:[#allocation20_spill]] %s7936_s5 }
   0x7   :  { %7977 = sst [smem:[#allocation21_spill]] %s7937_s6 }
   0x8   :  { %7978 = sst [smem:[#allocation22_spill]] %s7951_s20 }
   0x9   :  { %7979 = sst [smem:[#allocation23_spill]] %s7952_s21 }
   0xa   :  { %28 = sst [smem:[#allocation3]] %s7980_s29 }
   0xb   :  { %29 = vsyncpa [#allocation5], 0 }
   0xc   :  { %31 = vsyncpa [#allocation5 + $0x1], 0  ;;  %s6893_s30 = smov 0   ;;  %s6895_s4 = smov 0  }
   0xd   :  { %s6897_s0 = smov 0   ;;  %s6899_s23 = smov 0  }
   0xe LB: > { %7981 = sst [smem:[#allocation7_spill]] %s6755_s30  ;;  %s6914_s1 = sadd.s32 4294967295, %s6767_s23   ;;  %s6767_s23 = sphi %s6899_s23, %s8006_s23   ;;  %s6763_s0 = sphi %s6897_s0, %s8008_s0   ;;  %s6759_s4 = sphi %s6895_s4, %s8010_s4   ;;  %s6755_s30 = sphi %s6893_s30, %s8009_s30  }
   0xf   : > { %7982 = sst [smem:[#allocation8_spill]] %s6763_s0  ;;  %s5452_s5 = sadd.s32 4294967294, %s6767_s23  }
  0x10   : > { %7983 = sst [smem:[#allocation9_spill]] %s6767_s23  ;;  %s6918_s24 = sadd.s32 1, %s6767_s23  }
  0x11   : > { %7984 = sst [smem:[#allocation10_spill]] %s6914_s1  ;;  %s495_s6 = sadd.s32 1, %s6763_s0 }
  0x12   : > { %7985 = sst [smem:[#allocation11_spill]] %s6918_s24  ;;  %s492_s25 = ssub.s32 %s6767_s23, %s6918_s24 }
  0x13   : > { %p505_p0 = scmp.ne.s32.totalorder %s6763_s0, %s6759_s4  ;;  %p493_p1 = scmp.eq.s32.totalorder %s492_s25, 0 }
  0x14   : > { %p506_p2 = scmp.eq.s32.totalorder %s6914_s1, 1  ;;  %p511_p3 = scmp.ne.s32.totalorder %s6759_s4, %s6755_s30 }
  0x15   : > { %p512_p4 = scmp.eq.s32.totalorder %s5452_s5, 1  ;;  %p5455_p7 = scmp.ge.s32.totalorder %s6767_s23, 1 }
  0x16   : > { %s6929_s26 = scalar_select %p493_p1, %s6763_s0, %s495_s6  }
  0x17   : > { %p6931_p5 = por %p506_p2, %p505_p0  ;;  %p6935_p6 = por %p512_p4, %p511_p3 }
  0x18   : > { %7986 = sst [smem:[#allocation12_spill]] %s6929_s26  ;;  %p627_p8 = scmp.lt.s32.totalorder %s6767_s23, 3 }
  0x19   : > { %s7987_s2 = scalar_select %p6931_p5, 1, 0 }
  0x1a   : > { %s7989_s27 = scalar_select %p6935_p6, 1, 0 }
  0x1b   : > { %7988 = sst [smem:[#allocation13_spill]] %s7987_s2  ;;  %p628_p9 = pnand %p5455_p7, %p627_p8 }
  0x1c   : > { %7990 = sst [smem:[#allocation14_spill]] %s7989_s27  ;;  %s7991_s29 = sld [smem:[#allocation18_spill]] (!%p628_p9)  ;;  %v6769_v3 = vmov (!%p628_p9), 0.0|0.0   ;;  %vm6770_vm0 = vmmov (!%p628_p9), 0   ;;  %v6771_v6 = vmov (!%p628_p9), 0.0   ;;  %vm711_vm1 = vcmask (!%p628_p9), 261120  }
  0x1d   : > { %631 = sbr.rel (%p628_p9) target bundleno = 6273 (0x1881), region = 104  ;;  %6395 = vmatprep.subr.bf16.mxu1 (!%p628_p9), %v6769_v3  ;;  %5894 = vmatprep.mubr.msk.f32.mxu1 (!%p628_p9), %vm6770_vm0, %v6771_v6  ;;  %p697_p10 = scmp.lt.s32.totalorder (!%p628_p9), %s6914_s1, 1  ;;  %vm713_vm2 = vcmask (!%p628_p9), 257024   ;;  %712 = vst.msk [vmem:[#allocation2] sm:$0xff] (!%p628_p9), %vm711_vm1, %v6771_v6  ;;  %vm729_vm3 = vcmask (!%p628_p9), 1046528   ;;  %vm882_vm4 = vcmask (!%p628_p9), 1045504  }
  0x1e   : > { %714 = vst.msk [vmem:[#allocation2 + $0x8] sm:$0xf] (!%p628_p9), %vm713_vm2, %v6771_v6  ;;  %6407 = vmatprep.subr.bf16.mxu0 (!%p628_p9), %v6769_v3  ;;  %5916 = vmatprep.mubr.msk.f32.mxu0 (!%p628_p9), %vm6770_vm0, %v6771_v6  ;;  %s7992_s27 = sld [smem:[#allocation16_spill]] (!%p628_p9)  ;;  %vm1046_vm5 = vcmask (!%p628_p9), 1043456   ;;  %vm964_vm6 = vcmask (!%p628_p9), 1044480   ;;  %s7995_s25 = sld [smem:[#allocation20_spill]] (!%p628_p9) }
  0x1f   : > { %s2046_s0 = sld [smem:[#allocation3]] (!%p628_p9)  ;;  %s7997_s5 = sld [smem:[#allocation17_spill]] (!%p628_p9)  ;;  %vm2353_vm7 = vcmask (!%p628_p9), 64512  }
  0x20   : > { %s6773_s21 = smov (!%p628_p9), 112  }
  0x22   : > { %v5461_v0 = vld [vmem:[%s7991_s29 + $0x20] sm:$0xff] (!%p628_p9)  ;;  %v5462_v1 = vld [vmem:[%s7991_s29 + $0x28] sm:$0xff] (!%p628_p9)  ;;  %v5463_v2 = vld [vmem:[%s7991_s29 + $0x30] sm:$0xff] (!%p628_p9) }
  0x23   : > { %v6396_v4 = vpack.c.bf16 (!%p628_p9), %v5462_v1, %v5461_v0  ;;  %v5464_v5 = vld [vmem:[%s7991_s29 + $0x38] sm:$0xff] (!%p628_p9)  ;;  %v5467_v7 = vld [vmem:[%s7991_s29 + $0x40] sm:$0xff] (!%p628_p9)  ;;  %v5468_v8 = vld [vmem:[%s7991_s29 + $0x48] sm:$0xff] (!%p628_p9) }
  0x24   : > { %v6399_v9 = vpack.c.bf16 %v5464_v5, %v5463_v2  ;;  %s6970_s28 = scalar_select %p697_p10, %s6914_s1, 1  ;;  %v6408_v10 = vpack.c.bf16 %v5468_v8, %v5467_v7  ;;  %v5469_v11 = vld [vmem:[%s7991_s29 + $0x50] sm:$0xff]  ;;  %v5470_v12 = vld [vmem:[%s7991_s29 + $0x58] sm:$0xff]  ;;  %v718_v15 = vld [vmem:[%s7991_s29] sm:$0xff] }
  0x25   : > { %6397 = vmatpush3.bf16.msra.mxu1 %v6396_v4  ;;  %v6411_v13 = vpack.c.bf16 %v5470_v12, %v5469_v11  ;;  %v719_v16 = vld [vmem:[%s7991_s29 + $0x8] sm:$0xff]  ;;  %v5477_v17 = vld [vmem:[%s7991_s29 + $0x80] sm:$0xff]  ;;  %v720_v26 = vld [vmem:[%s7991_s29 + $0x10] sm:$0xff] }
  0x26   : > { %6398 = vmatprep.subr.bf16.mxu1 %v6769_v3  ;;  %s7962_s3 = sshll.u32 %s6970_s28, 3  ;;  %6409 = vmatpush3.bf16.msra.mxu0 %v6408_v10  ;;  %v5478_v18 = vld [vmem:[%s7991_s29 + $0x88] sm:$0xff]  ;;  %v6402_v21 = vpack.c.bf16 %v719_v16, %v718_v15  ;;  %v721_v27 = vld [vmem:[%s7991_s29 + $0x18] sm:$0xff]  ;;  %v5479_v31 = vld [vmem:[%s7991_s29 + $0x90] sm:$0xff]  ;;  %s7996_s23 = sshll.u32 %s6970_s28, 3 }
  0x27   : > { %s700_s30 = scalar_lea.vmem %s7992_s27, %s7962_s3  ;;  %6410 = vmatprep.subr.bf16.mxu0 %v6769_v3  ;;  %v6420_v28 = vpack.c.bf16 %v5478_v18, %v5477_v17  ;;  %v5480_v32 = vld [vmem:[%s7991_s29 + $0x98] sm:$0xff]  ;;  %v6405_v33 = vpack.c.bf16 %v721_v27, %v720_v26  ;;  %v5472_v34 = vld [vmem:[%s7991_s29 + $0x60] sm:$0xff]  ;;  %v5473_v35 = vld [vmem:[%s7991_s29 + $0x68] sm:$0xff]  ;;  %s704_s6 = scalar_lea.vmem %s7997_s5, %s7996_s23 }
  0x28   : > { %v710_v14 = vld [vmem:[%s700_s30] sm:$0xff]  ;;  %v6423_v36 = vpack.c.bf16 %v5480_v32, %v5479_v31  ;;  %v6414_v39 = vpack.c.bf16 %v5473_v35, %v5472_v34  ;;  %v5474_v40 = vld [vmem:[%s7991_s29 + $0x70] sm:$0xff]  ;;  %v5475_v41 = vld [vmem:[%s7991_s29 + $0x78] sm:$0xff]  ;;  %s7993_s30 = sld [smem:[#allocation19_spill]]  ;;  %s5658_s26 = sshll.u32 %s6970_s28, 6 }
  0x29   : > { %6400 = vmatpush3.bf16.msra.mxu1 %v6399_v9  ;;  %715 = vst.msk [vmem:[#allocation2 + $0x2] sm:$0xff] %vm711_vm1, %v710_v14  ;;  %v6417_v43 = vpack.c.bf16 %v5475_v41, %v5474_v40  ;;  %v5483_v47 = vld [vmem:[%s7991_s29 + $0xa0] sm:$0xff]  ;;  %v5484_v48 = vld [vmem:[%s7991_s29 + $0xa8] sm:$0xff]  ;;  %v5485_v52 = vld [vmem:[%s7991_s29 + $0xb0] sm:$0xff]  ;;  %s7394_s23 = scalar_lea.vmem %s7953_s22, %s5658_s26  ;;  %s687_s27 = sand.u32 1, %s6759_s4  }
  0x2a   : > { %6401 = vmatprep.subr.bf16.mxu1 %v6769_v3  ;;  %6412 = vmatpush3.bf16.msra.mxu0 %v6411_v13  ;;  %v6432_v49 = vpack.c.bf16 %v5484_v48, %v5483_v47  ;;  %v5487_v50 = vld [vmem:[%s7991_s29 + $0xc0] sm:$0xff]  ;;  %v5488_v51 = vld [vmem:[%s7991_s29 + $0xc8] sm:$0xff]  ;;  %v5486_v54 = vld [vmem:[%s7991_s29 + $0xb8] sm:$0xff]  ;;  %s5335_s1 = scalar_lea.sflag [#allocation5], %s687_s27  ;;  %s6774_s5 = smov [#allocation4]  }
  0x2b   : > { %6419 = vmatprep.subr.bf16.mxu0 %v6769_v3  ;;  %v6426_v53 = vpack.c.bf16 %v5488_v51, %v5487_v50  ;;  %v5489_v55 = vld [vmem:[%s7991_s29 + $0xd0] sm:$0xff]  ;;  %v5490_v56 = vld [vmem:[%s7991_s29 + $0xd8] sm:$0xff]  ;;  %v6435_v57 = vpack.c.bf16 %v5486_v54, %v5485_v52  ;;  %v5498_v14 = vld [vmem:[%s7991_s29 + $0x100] sm:$0xff]  ;;  %s6709_s26 = sshll.u32 %s6774_s5, 4  ;;  %s6710_s26 = int_to_ptr.vmem [resolvable:$false] %s6709_s26 }
  0x2c   : > { %v6429_v58 = vpack.c.bf16 %v5490_v56, %v5489_v55  ;;  %v5499_v15 = vld [vmem:[%s7991_s29 + $0x108] sm:$0xff]  ;;  %v5493_v17 = vld [vmem:[%s7991_s29 + $0xe0] sm:$0xff]  ;;  %v5495_v27 = vld [vmem:[%s7991_s29 + $0xf0] sm:$0xff] }
  0x2d   : > { %v6444_v16 = vpack.c.bf16 %v5499_v15, %v5498_v14  ;;  %v5494_v18 = vld [vmem:[%s7991_s29 + $0xe8] sm:$0xff]  ;;  %v5506_v40 = vld [vmem:[%s7991_s29 + $0x138] sm:$0xff]  ;;  %v5512_v51 = vld [vmem:[%s7991_s29 + $0x150] sm:$0xff] }
  0x2e   : > { %s7994_s24 = smov %s7993_s30  ;;  %v5482_v10 = vld [vmem:[%s7993_s30] ss:$0 sm:$0xff]  ;;  %v5504_v34 = vld [vmem:[%s7991_s29 + $0x128] sm:$0xff]  ;;  %v5516_v54 = vld [vmem:[%s7991_s29 + $0x170] sm:$0xff] }
  0x2f   : > { %v5511_v47 = vld [vmem:[%s7991_s29 + $0x148] sm:$0xff]  ;;  %v5517_v55 = vld [vmem:[%s7991_s29 + $0x178] sm:$0xff] }
  0x30   : > { %v716_v19 = vld [vmem:[#allocation2] sm:$0xff]  ;;  %v717_v20 = vld [vmem:[#allocation2 + $0x8] sm:$0xf] }
  0x31   : > { %v730_v22 = vrot.slane %v716_v19, 1  ;;  %v731_v23 = vrot.slane %v717_v20, 1  ;;  %v883_v24 = vrot.slane %v716_v19, 2  ;;  %v884_v25 = vrot.slane %v717_v20, 2  ;;  %v5515_v50 = vld [vmem:[%s7991_s29 + $0x168] sm:$0xff] }
  0x32   : > { %v1047_v37 = vrot.slane %v716_v19, 4  ;;  %v1048_v38 = vrot.slane %v717_v20, 4  ;;  %v965_v44 = vrot.slane %v716_v19, 3  ;;  %v966_v45 = vrot.slane %v717_v20, 3  ;;  %v5501_v20 = vld [vmem:[%s7991_s29 + $0x118] sm:$0xff]  ;;  %v5526_v14 = vld [vmem:[%s7991_s29 + $0x1a8] sm:$0xff] }
  0x33   : > { %v732_v29 = vsel %vm729_vm3, %v730_v22, %v731_v23  ;;  %v885_v30 = vsel %vm882_vm4, %v883_v24, %v884_v25  ;;  %v6438_v25 = vpack.c.bf16 %v5494_v18, %v5493_v17  ;;  %v5521_v17 = vld [vmem:[%s7991_s29 + $0x188] sm:$0xff]  ;;  %v5527_v18 = vld [vmem:[%s7991_s29 + $0x1b0] sm:$0xff] }
  0x34   : > { %5895 = vmatmul.mubr.msk.f32.vlgmr.msra.gmra.mrb[0].mxu1 %vm711_vm1, %v732_v29  ;;  %5917 = vmatmul.mubr.msk.f32.vlgmr.msra.gmra.mrb[0].mxu0 %vm711_vm1, %v885_v30  ;;  %v1049_v42 = vsel %vm1046_vm5, %v1047_v37, %v1048_v38  ;;  %v967_v46 = vsel %vm964_vm6, %v965_v44, %v966_v45 }
  0x35   : > { %6403 = vmatpush3.bf16.msra.mxu1 %v6402_v21  ;;  %5905 = vmatprep.mubr.msk.f32.mxu1 %vm6770_vm0, %v6771_v6 }
  0x36   : > { %6404 = vmatprep.subr.bf16.mxu1 %v6769_v3  ;;  %6421 = vmatpush3.bf16.msra.mxu0 %v6420_v28  ;;  %v5496_v28 = vld [vmem:[%s7991_s29 + $0xf8] sm:$0xff] }
  0x37   : > { %6422 = vmatprep.subr.bf16.mxu0 %v6769_v3  ;;  %5938 = vmatprep.mubr.msk.f32.mxu0 %vm6770_vm0, %v6771_v6  ;;  %v6441_v32 = vpack.c.bf16 %v5496_v28, %v5495_v27  ;;  %v5523_v27 = vld [vmem:[%s7991_s29 + $0x198] sm:$0xff] }
  0x39   : > { %6406 = vmatpush3.bf16.msra.mxu1 %v6405_v33  ;;  %v5503_v33 = vld [vmem:[%s7991_s29 + $0x120] sm:$0xff] }
  0x3a   : > { %6413 = vmatprep.subr.bf16.mxu1 %v6769_v3  ;;  %6424 = vmatpush3.bf16.msra.mxu0 %v6423_v36  ;;  %v6450_v38 = vpack.c.bf16 %v5504_v34, %v5503_v33  ;;  %v5531_v33 = vld [vmem:[%s7991_s29 + $0x1c8] sm:$0xff] }
  0x3b   : > { %6431 = vmatprep.subr.bf16.mxu0 %v6769_v3 }
  0x3c   : > { %5906 = vmatmul.mubr.msk.f32.vlgmr.msra.gmra.mrb[2].mxu1 %vm711_vm1, %v716_v19  ;;  %v5500_v19 = vld [vmem:[%s7991_s29 + $0x110] sm:$0xff] }
  0x3d   : > { %6415 = vmatpush3.bf16.msra.mxu1 %v6414_v39  ;;  %5927 = vmatprep.mubr.msk.f32.mxu1 %vm6770_vm0, %v6771_v6  ;;  %v6447_v26 = vpack.c.bf16 %v5501_v20, %v5500_v19  ;;  %v5505_v39 = vld [vmem:[%s7991_s29 + $0x130] sm:$0xff]  ;;  %v5528_v19 = vld [vmem:[%s7991_s29 + $0x1b8] sm:$0xff] }
  0x3e   : > { %6416 = vmatprep.subr.bf16.mxu1 %v6769_v3  ;;  %5939 = vmatmul.mubr.msk.f32.vlgmr.msra.gmra.mrb[2].mxu0 %vm711_vm1, %v1049_v42  ;;  %v6453_v42 = vpack.c.bf16 %v5506_v40, %v5505_v39  ;;  %v5533_v39 = vld [vmem:[%s7991_s29 + $0x1d8] sm:$0xff] }
  0x3f   : > { %5960 = vmatprep.mubr.msk.f32.mxu0 %vm6770_vm0, %v6771_v6  ;;  %6433 = vmatpush3.bf16.msra.mxu0 %v6432_v49  ;;  %v5514_v49 = vld [vmem:[%s7991_s29 + $0x160] sm:$0xff] }
  0x40   : > { %6434 = vmatprep.subr.bf16.mxu0 %v6769_v3  ;;  %v6456_v52 = vpack.c.bf16 %v5515_v50, %v5514_v49  ;;  %v1965_v49 = vld [vmem:[%s7995_s25 + $0x18] sm:$0xff] }
  0x41   : > { %6418 = vmatpush3.bf16.msra.mxu1 %v6417_v43 }
  0x42   : > { %6425 = vmatprep.subr.bf16.mxu1 %v6769_v3 }
  0x43   : > { %6436 = vmatpush3.bf16.msra.mxu0 %v6435_v57  ;;  %v6459_v57 = vpack.c.bf16 %v5517_v55, %v5516_v54 }
  0x44   : > { %5928 = vmatmul.mubr.msk.f32.vlgmr.msra.gmra.mrb[4].mxu1 %vm711_vm1, %v967_v46  ;;  %6443 = vmatprep.subr.bf16.mxu0 %v6769_v3  ;;  %v5510_v46 = vld [vmem:[%s7991_s29 + $0x140] sm:$0xff] }
  0x45   : > { %5949 = vmatprep.mubr.msk.f32.mxu1 %vm6770_vm0, %v6771_v6  ;;  %6427 = vmatpush3.bf16.msra.mxu1 %v6426_v53  ;;  %v6462_v48 = vpack.c.bf16 %v5511_v47, %v5510_v46  ;;  %v5513_v53 = vld [vmem:[%s7991_s29 + $0x158] sm:$0xff]  ;;  %v1963_v46 = vld [vmem:[%s7995_s25 + $0x8] sm:$0xff] }
  0x46   : > { %6428 = vmatprep.subr.bf16.mxu1 %v6769_v3  ;;  %v6465_v56 = vpack.c.bf16 %v5513_v53, %v5512_v51  ;;  %v2051_v51 = vld [vmem:[%s7938_s7] sm:$0xff] }
  0x49   : > { %6430 = vmatpush3.bf16.msra.mxu1 %v6429_v58 }
  0x4a   : > { %6437 = vmatprep.subr.bf16.mxu1 %v6769_v3 }
 0x107   : > { %v801_v59 = vpop.f32.mrb[0].mxu1  ;;  %v954_v60 = vpop.f32.mrb[0].mxu0 }
 0x108   : > { %v5896_v61 = vpop.f32.mrb[1].mxu1  ;;  %v5918_v62 = vpop.f32.mrb[1].mxu0 }
 0x10f   : > { %v873_v63 = vpop.f32.mrb[2].mxu1 }
 0x110   : > { %v874_v0 = vadd.f32 %v873_v63, %v801_v59  ;;  %v5907_v1 = vpop.f32.mrb[3].mxu1 }
 0x111   : > { %v1118_v2 = vpop.f32.mrb[2].mxu0 }
 0x112   : > { %v958_v4 = vadd.f32 %v954_v60, %v874_v0  ;;  %v5940_v5 = vpop.f32.mrb[3].mxu0 }
 0x117   : > { %v1036_v7 = vpop.f32.mrb[4].mxu1 }
 0x118   : > { %v1040_v8 = vadd.f32 %v1036_v7, %v958_v4  ;;  %v5929_v9 = vpop.f32.mrb[5].mxu1 }
 0x11a   : > { %v1122_v11 = vadd.f32 %v1118_v2, %v1040_v8  ;;  %v5509_v8 = vld [vmem:[%s7994_s24 + $0x1] ss:$0 sm:$0xff] }
 0x11c   : > { %v1130_v12 = vadd.f32 %v5482_v10, %v1122_v11 }
 0x11e   : > { %v1131_v13 = vmax.f32 %v1130_v12, 0.0 }
 0x120   : > { %1132 = vst.msk [vmem:[#allocation2 + $0x2] sm:$0xff] %vm711_vm1, %v1131_v13  ;;  %v5525_v13 = vld [vmem:[%s7991_s29 + $0x1a0] sm:$0xff] }
 0x121   : > { %v6474_v15 = vpack.c.bf16 %v5526_v14, %v5525_v13  ;;  %v2054_v13 = vld [vmem:[%s7938_s7 + $0x18] sm:$0xff]  ;;  %v2057_v14 = vld [vmem:[%s7938_s7 + $0x30] sm:$0xff] }
 0x127   : > { %v1133_v21 = vld [vmem:[#allocation2] sm:$0xff]  ;;  %v1134_v22 = vld [vmem:[#allocation2 + $0x8] sm:$0xf] }
 0x128   : > { %5961 = vmatmul.mubr.msk.f32.vlgmr.msra.gmra.mrb[4].mxu0 %vm711_vm1, %v1133_v21  ;;  %v1147_v23 = vrot.slane %v1133_v21, 1  ;;  %v1148_v24 = vrot.slane %v1134_v22, 1  ;;  %v1380_v30 = vrot.slane %v1133_v21, 3  ;;  %v1381_v31 = vrot.slane %v1134_v22, 3 }
 0x129   : > { %6445 = vmatpush3.bf16.msra.mxu0 %v6444_v16  ;;  %5982 = vmatprep.mubr.msk.f32.mxu0 %vm6770_vm0, %v6771_v6  ;;  %v1299_v35 = vrot.slane %v1133_v21, 2  ;;  %v1300_v36 = vrot.slane %v1134_v22, 2  ;;  %v1461_v43 = vrot.slane %v1133_v21, 4  ;;  %v1462_v44 = vrot.slane %v1134_v22, 4  ;;  %v5520_v16 = vld [vmem:[%s7991_s29 + $0x180] sm:$0xff] }
 0x12a   : > { %v1149_v29 = vsel %vm729_vm3, %v1147_v23, %v1148_v24  ;;  %6446 = vmatprep.subr.bf16.mxu0 %v6769_v3  ;;  %v1382_v37 = vsel %vm964_vm6, %v1380_v30, %v1381_v31  ;;  %v6468_v24 = vpack.c.bf16 %v5521_v17, %v5520_v16  ;;  %v2058_v16 = vld [vmem:[%s7938_s7 + $0x38] sm:$0xff] }
 0x12b   : > { %5950 = vmatmul.mubr.msk.f32.vlgmr.msra.gmra.mrb[6].mxu1 %vm711_vm1, %v1149_v29  ;;  %v1301_v41 = vsel %vm882_vm4, %v1299_v35, %v1300_v36  ;;  %v1463_v45 = vsel %vm1046_vm5, %v1461_v43, %v1462_v44  ;;  %v6501_v17 = vpack.c.bf16 %v2058_v16, %v2057_v14 }
 0x12c   : > { %6439 = vmatpush3.bf16.msra.mxu1 %v6438_v25  ;;  %5971 = vmatprep.mubr.msk.f32.mxu1 %vm6770_vm0, %v6771_v6  ;;  %v6477_v25 = vpack.c.bf16 %v5528_v19, %v5527_v18  ;;  %v2047_v18 = vld [vmem:[%s704_s6] sm:$0xff]  ;;  %v2048_v19 = vstv %s2046_s0  ;;  %s6772_s6 = smov 120  }
 0x12d   : > { %6448 = vmatpush3.bf16.msra.mxu0 %v6447_v26  ;;  %6440 = vmatprep.subr.bf16.mxu1 %v6769_v3  ;;  %v5522_v26 = vld [vmem:[%s7991_s29 + $0x190] sm:$0xff] }
 0x12e   : > { %6455 = vmatprep.subr.bf16.mxu0 %v6769_v3  ;;  %v6471_v31 = vpack.c.bf16 %v5523_v27, %v5522_v26 }
 0x130   : > { %6442 = vmatpush3.bf16.msra.mxu1 %v6441_v32  ;;  %5983 = vmatmul.mubr.msk.f32.vlgmr.msra.gmra.mrb[6].mxu0 %vm711_vm1, %v1382_v37  ;;  %v5530_v32 = vld [vmem:[%s7991_s29 + $0x1c0] sm:$0xff] }
 0x131   : > { %6449 = vmatprep.subr.bf16.mxu1 %v6769_v3  ;;  %6004 = vmatprep.mubr.msk.f32.mxu0 %vm6770_vm0, %v6771_v6  ;;  %v6480_v37 = vpack.c.bf16 %v5531_v33, %v5530_v32  ;;  %v2062_v33 = vld [vmem:[%s7938_s7 + $0x58] sm:$0xff] }
 0x132   : > { %6457 = vmatpush3.bf16.msra.mxu0 %v6456_v52  ;;  %v2052_v52 = vld [vmem:[%s7938_s7 + $0x8] sm:$0xff] }
 0x133   : > { %5972 = vmatmul.mubr.msk.f32.vlgmr.msra.gmra.mrb[8].mxu1 %vm711_vm1, %v1301_v41  ;;  %6458 = vmatprep.subr.bf16.mxu0 %v6769_v3  ;;  %v6492_v53 = vpack.c.bf16 %v2052_v52, %v2051_v51 }
 0x134   : > { %6451 = vmatpush3.bf16.msra.mxu1 %v6450_v38  ;;  %5993 = vmatprep.mubr.msk.f32.mxu1 %vm6770_vm0, %v6771_v6  ;;  %v5532_v38 = vld [vmem:[%s7991_s29 + $0x1d0] sm:$0xff] }
 0x135   : > { %6452 = vmatprep.subr.bf16.mxu1 %v6769_v3  ;;  %v6483_v41 = vpack.c.bf16 %v5533_v39, %v5532_v38 }
 0x136   : > { %6460 = vmatpush3.bf16.msra.mxu0 %v6459_v57 }
 0x137   : > { %6467 = vmatprep.subr.bf16.mxu0 %v6769_v3 }
 0x138   : > { %6454 = vmatpush3.bf16.msra.mxu1 %v6453_v42 }
 0x139   : > { %6461 = vmatprep.subr.bf16.mxu1 %v6769_v3 }
 0x13b   : > { %5994 = vmatmul.mubr.msk.f32.vlgmr.msra.gmra.mrb[10].mxu1 %vm711_vm1, %v1463_v45  ;;  %v1962_v45 = vld [vmem:[%s7995_s25] sm:$0xff] }
 0x13c   : > { %6015 = vmatprep.mubr.msk.f32.mxu1 %vm6770_vm0, %v6771_v6  ;;  %6463 = vmatpush3.bf16.msra.mxu1 %v6462_v48  ;;  %v6486_v47 = vpack.c.bf16 %v1963_v46, %v1962_v45  ;;  %v1964_v48 = vld [vmem:[%s7995_s25 + $0x10] sm:$0xff]  ;;  %s8002_s25 = sld [smem:[#allocation23_spill]] }
 0x13d   : > { %6464 = vmatprep.subr.bf16.mxu1 %v6769_v3  ;;  %v6489_v50 = vpack.c.bf16 %v1965_v49, %v1964_v48 }
 0x140   : > { %6466 = vmatpush3.bf16.msra.mxu1 %v6465_v56 }
 0x141   : > { %6473 = vmatprep.subr.bf16.mxu1 %v6769_v3 }
 0x1fb   : > { %v1290_v58 = vpop.f32.mrb[4].mxu0 }
 0x1fc   : > { %v5962_v59 = vpop.f32.mrb[5].mxu0 }
 0x1fe   : > { %v1218_v60 = vpop.f32.mrb[6].mxu1 }
 0x1ff   : > { %v1291_v61 = vadd.f32 %v1290_v58, %v1218_v60  ;;  %v5951_v62 = vpop.f32.mrb[7].mxu1 }
 0x203   : > { %v1451_v63 = vpop.f32.mrb[6].mxu0 }
 0x204   : > { %v5984_v0 = vpop.f32.mrb[7].mxu0 }
 0x206   : > { %v1370_v1 = vpop.f32.mrb[8].mxu1 }
 0x207   : > { %v1374_v2 = vadd.f32 %v1370_v1, %v1291_v61  ;;  %v5973_v4 = vpop.f32.mrb[9].mxu1 }
 0x209   : > { %v1455_v5 = vadd.f32 %v1451_v63, %v1374_v2  ;;  %v5536_v2 = vld [vmem:[%s7994_s24 + $0x2] ss:$0 sm:$0xff]  ;;  %s7998_s24 = sld [smem:[#allocation21_spill]] }
 0x20e   : > { %v1532_v7 = vpop.f32.mrb[10].mxu1 }
 0x20f   : > { %v1536_v9 = vadd.f32 %v1532_v7, %v1455_v5  ;;  %v5995_v10 = vpop.f32.mrb[11].mxu1  ;;  %v2055_v7 = vld [vmem:[%s7938_s7 + $0x20] sm:$0xff] }
 0x211   : > { %v1545_v11 = vadd.f32 %v5509_v8, %v1536_v9  ;;  %v2056_v8 = vld [vmem:[%s7938_s7 + $0x28] sm:$0xff] }
 0x212   : > { %v6498_v10 = vpack.c.bf16 %v2056_v8, %v2055_v7 }
 0x213   : > { %v1546_v12 = vmax.f32 %v1545_v11, 0.0 }
 0x215   : > { %1547 = vst.msk [vmem:[#allocation2 + $0x2] sm:$0xff] %vm711_vm1, %v1546_v12  ;;  %v2053_v12 = vld [vmem:[%s7938_s7 + $0x10] sm:$0xff] }
 0x21c   : > { %v1548_v20 = vld [vmem:[#allocation2] sm:$0xff]  ;;  %v1549_v21 = vld [vmem:[#allocation2 + $0x8] sm:$0xf] }
 0x21d   : > { %6016 = vmatmul.mubr.msk.f32.vlgmr.msra.gmra.mrb[12].mxu1 %vm711_vm1, %v1548_v20  ;;  %v1562_v22 = vrot.slane %v1548_v20, 1  ;;  %v1563_v23 = vrot.slane %v1549_v21, 1  ;;  %v1795_v29 = vrot.slane %v1548_v20, 3  ;;  %v1796_v30 = vrot.slane %v1549_v21, 3 }
 0x21e   : > { %6475 = vmatpush3.bf16.msra.mxu1 %v6474_v15  ;;  %6037 = vmatprep.mubr.msk.f32.mxu1 %vm6770_vm0, %v6771_v6  ;;  %v1714_v34 = vrot.slane %v1548_v20, 2  ;;  %v1715_v35 = vrot.slane %v1549_v21, 2  ;;  %v1876_v42 = vrot.slane %v1548_v20, 4  ;;  %v1877_v43 = vrot.slane %v1549_v21, 4  ;;  %v5537_v20 = vld [vmem:[%s7998_s24] ss:$0 sm:$0xff] }
 0x21f   : > { %v1564_v28 = vsel %vm729_vm3, %v1562_v22, %v1563_v23  ;;  %6476 = vmatprep.subr.bf16.mxu1 %v6769_v3  ;;  %v1797_v36 = vsel %vm964_vm6, %v1795_v29, %v1796_v30  ;;  %v6495_v15 = vpack.c.bf16 %v2054_v13, %v2053_v12  ;;  %v2059_v21 = vld [vmem:[%s7938_s7 + $0x40] sm:$0xff]  ;;  %v2049_v22 = vmul.f32 %v2048_v19, %v2047_v18  ;;  %v2060_v23 = vld [vmem:[%s7938_s7 + $0x48] sm:$0xff] }
 0x220   : > { %6005 = vmatmul.mubr.msk.f32.vlgmr.msra.gmra.mrb[8].mxu0 %vm711_vm1, %v1564_v28  ;;  %v1716_v40 = vsel %vm882_vm4, %v1714_v34, %v1715_v35  ;;  %v1878_v44 = vsel %vm1046_vm5, %v1876_v42, %v1877_v43  ;;  %v6504_v29 = vpack.c.bf16 %v2060_v23, %v2059_v21  ;;  %v2065_v34 = vld [vmem:[%s7938_s7 + $0x70] sm:$0xff]  ;;  %v2066_v35 = vld [vmem:[%s7938_s7 + $0x78] sm:$0xff] }
 0x221   : > { %6469 = vmatpush3.bf16.msra.mxu0 %v6468_v24  ;;  %6026 = vmatprep.mubr.msk.f32.mxu0 %vm6770_vm0, %v6771_v6  ;;  %v2063_v24 = vld [vmem:[%s7938_s7 + $0x60] sm:$0xff] }
 0x222   : > { %6478 = vmatpush3.bf16.msra.mxu1 %v6477_v25  ;;  %6470 = vmatprep.subr.bf16.mxu0 %v6769_v3  ;;  %v2064_v25 = vld [vmem:[%s7938_s7 + $0x68] sm:$0xff] }
 0x223   : > { %6485 = vmatprep.subr.bf16.mxu1 %v6769_v3  ;;  %v6510_v30 = vpack.c.bf16 %v2064_v25, %v2063_v24 }
 0x225   : > { %6472 = vmatpush3.bf16.msra.mxu0 %v6471_v31  ;;  %6038 = vmatmul.mubr.msk.f32.vlgmr.msra.gmra.mrb[14].mxu1 %vm711_vm1, %v1797_v36  ;;  %v2061_v31 = vld [vmem:[%s7938_s7 + $0x50] sm:$0xff] }
 0x226   : > { %6479 = vmatprep.subr.bf16.mxu0 %v6769_v3  ;;  %6059 = vmatprep.mubr.msk.f32.mxu1 %vm6770_vm0, %v6771_v6  ;;  %v6507_v36 = vpack.c.bf16 %v2062_v33, %v2061_v31 }
 0x227   : > { %6487 = vmatpush3.bf16.msra.mxu1 %v6486_v47 }
 0x228   : > { %6027 = vmatmul.mubr.msk.f32.vlgmr.msra.gmra.mrb[10].mxu0 %vm711_vm1, %v1716_v40  ;;  %6488 = vmatprep.subr.bf16.mxu1 %v6769_v3 }
 0x229   : > { %6481 = vmatpush3.bf16.msra.mxu0 %v6480_v37  ;;  %6048 = vmatprep.mubr.msk.f32.mxu0 %vm6770_vm0, %v6771_v6  ;;  %v6513_v37 = vpack.c.bf16 %v2066_v35, %v2065_v34 }
 0x22a   : > { %6482 = vmatprep.subr.bf16.mxu0 %v6769_v3 }
 0x22b   : > { %6490 = vmatpush3.bf16.msra.mxu1 %v6489_v50 }
 0x22c   : > { %6497 = vmatprep.subr.bf16.mxu1 %v6769_v3 }
 0x22d   : > { %6484 = vmatpush3.bf16.msra.mxu0 %v6483_v41 }
 0x22e   : > { %6491 = vmatprep.subr.bf16.mxu0 %v6769_v3 }
 0x230   : > { %6049 = vmatmul.mubr.msk.f32.vlgmr.msra.gmra.mrb[12].mxu0 %vm711_vm1, %v1878_v44 }
 0x231   : > { %6070 = vmatprep.mubr.msk.f32.mxu0 %vm6770_vm0, %v6771_v6  ;;  %6493 = vmatpush3.bf16.msra.mxu0 %v6492_v53 }
 0x232   : > { %6494 = vmatprep.subr.bf16.mxu0 %v6769_v3 }
 0x235   : > { %6496 = vmatpush3.bf16.msra.mxu0 %v6495_v15 }
 0x236   : > { %6503 = vmatprep.subr.bf16.mxu0 %v6769_v3 }
 0x2f0   : > { %v1705_v54 = vpop.f32.mrb[12].mxu1 }
 0x2f1   : > { %v6017_v55 = vpop.f32.mrb[13].mxu1 }
 0x2f3   : > { %v1633_v56 = vpop.f32.mrb[8].mxu0 }
 0x2f4   : > { %v1706_v57 = vadd.f32 %v1705_v54, %v1633_v56  ;;  %v6006_v58 = vpop.f32.mrb[9].mxu0 }
 0x2f8   : > { %v1866_v59 = vpop.f32.mrb[14].mxu1 }
 0x2f9   : > { %v6039_v60 = vpop.f32.mrb[15].mxu1 }
 0x2fb   : > { %v1785_v61 = vpop.f32.mrb[10].mxu0 }
 0x2fc   : > { %v1789_v62 = vadd.f32 %v1785_v61, %v1706_v57  ;;  %v6028_v63 = vpop.f32.mrb[11].mxu0 }
 0x2fe   : > { %v1870_v0 = vadd.f32 %v1866_v59, %v1789_v62 }
 0x303   : > { %v1947_v1 = vpop.f32.mrb[12].mxu0 }
 0x304   : > { %v1951_v4 = vadd.f32 %v1947_v1, %v1870_v0  ;;  %v6050_v5 = vpop.f32.mrb[13].mxu0 }
 0x306   : > { %v1960_v9 = vadd.f32 %v5536_v2, %v1951_v4 }
 0x308   : > { %v1961_v11 = vmax.f32 %v1960_v9, 0.0 }
 0x30a   : > { %6060 = vmatmul.mubr.msk.f32.vlgmr.msra.gmra.mrb[16].mxu1 %vm711_vm1, %v1961_v11 }
 0x30b   : > { %6499 = vmatpush3.bf16.msra.mxu1 %v6498_v10  ;;  %6081 = vmatprep.mubr.msk.f32.mxu1 %vm6770_vm0, %v6771_v6 }
 0x30c   : > { %6500 = vmatprep.subr.bf16.mxu1 %v6769_v3 }
 0x30f   : > { %6502 = vmatpush3.bf16.msra.mxu1 %v6501_v17 }
 0x310   : > { %6509 = vmatprep.subr.bf16.mxu1 %v6769_v3 }
 0x3dd   : > { %v2042_v26 = vpop.f32.mrb[16].mxu1 }
 0x3de   : > { %v2043_v27 = vadd.f32 %v5537_v20, %v2042_v26  ;;  %v6061_v28 = vpop.f32.mrb[17].mxu1 }
 0x3e0   : > { %v7307_v32 = vadd.f32 %v2049_v22, %v2043_v27 }
 0x3e2   : > { %6071 = vmatmul.mubr.msk.f32.vlgmr.msra.gmra.mrb[14].mxu0 %vm711_vm1, %v7307_v32  ;;  %6082 = vmatmul.mubr.msk.f32.vlgmr.msra.gmra.mrb[18].mxu1 %vm711_vm1, %v7307_v32 }
 0x3e3   : > { %6505 = vmatpush3.bf16.msra.mxu0 %v6504_v29  ;;  %6511 = vmatpush3.bf16.msra.mxu1 %v6510_v30 }
 0x3e4   : > { %6506 = vmatprep.subr.bf16.mxu0 %v6769_v3  ;;  %6512 = vmatprep.subr.bf16.mxu1 %v6769_v3 }
 0x3e5   : > { %6092 = vmatprep.mubr.msk.f32.mxu0 %vm6770_vm0, %v6771_v6  ;;  %6103 = vmatprep.mubr.msk.f32.mxu1 %vm6770_vm0, %v6771_v6 }
 0x3e7   : > { %6508 = vmatpush3.bf16.msra.mxu0 %v6507_v36  ;;  %6514 = vmatpush3.bf16.msra.mxu1 %v6513_v37 }
 0x3e8   : > { %6106 = vmatprep.subr.mxu1 %v6771_v6  ;;  %6116 = vmatprep.subr.mxu0 %v6771_v6 }
 0x3ea   : > { %6093 = vmatmul.mubr.msk.f32.vlgmr.msra.gmra.mrb[16].mxu0 %vm711_vm1, %v7307_v32  ;;  %6104 = vmatmul.mubr.msk.f32.vlgmr.msra.gmra.mrb[20].mxu1 %vm711_vm1, %v7307_v32 }
 0x3eb   : > { %6108 = vmatprep.mubr.msk.f32.mxu1 %vm6770_vm0, %v6771_v6  ;;  %6118 = vmatprep.mubr.msk.f32.mxu0 %vm6770_vm0, %v6771_v6 }
 0x4b5   : > { %v2136_v38 = vpop.f32.mrb[14].mxu0  ;;  %v7338_v39 = vpop.f32.mrb[18].mxu1 }
 0x4b6   : > { %2351 = vrot.lane.b32.xlu0 %v2136_v38, %s6772_s6  ;;  %v6072_v40 = vpop.f32.mrb[15].mxu0  ;;  %v6083_v41 = vpop.f32.mrb[19].mxu1 }
 0x4b7   : > { %v3015_v41 = vld [vmem:[%s7940_s9] sm:$0xff] }
 0x4ba   : > { %2429 = vrot.lane.b32.xlu0 %v7338_v39, %s6772_s6 }
 0x4bd   : > { %v7343_v42 = vpop.f32.mrb[16].mxu0  ;;  %v7345_v43 = vpop.f32.mrb[20].mxu1 }
 0x4be   : > { %2506 = vrot.lane.b32.xlu1 %v7343_v42, %s6772_s6  ;;  %v6094_v44 = vpop.f32.mrb[17].mxu0  ;;  %v6105_v45 = vpop.f32.mrb[21].mxu1 }
 0x4c2   : > { %2583 = vrot.lane.b32.xlu1 %v7345_v43, %s6772_s6 }
 0x528   : > { %v2352_v46 = vpop.permute.xlu0 %2351 }
 0x529   : > { %6107 = vmatpush3.xpose.msk.msra.mxu1 %vm2353_vm7, %v2352_v46  ;;  %v3311_v46 = vld [vmem:[%s7939_s8] sm:$0xff] }
 0x52a   : > { %6111 = vmatprep.subr.mxu1 %v6771_v6 }
 0x52c   : > { %6109 = vmatmul.mubr.msk.f32.vlgmr.msra.gmra.mrb[22].mxu1 %vm2353_vm7, %v2136_v38  ;;  %v2430_v47 = vpop.permute.xlu0 %2429 }
 0x52d   : > { %6112 = vmatpush3.xpose.msk.msra.mxu1 %vm2353_vm7, %v2430_v47  ;;  %6113 = vmatprep.mubr.msk.f32.mxu1 %vm6770_vm0, %v6771_v6  ;;  %v3312_v47 = vld [vmem:[%s7939_s8 + $0x8] sm:$0xff] }
 0x52e   : > { %6121 = vmatprep.subr.mxu1 %v6771_v6 }
 0x530   : > { %v2507_v48 = vpop.permute.xlu1 %2506  ;;  %6114 = vmatmul.mubr.msk.f32.vlgmr.msra.gmra.mrb[24].mxu1 %vm2353_vm7, %v7338_v39 }
 0x531   : > { %6117 = vmatpush3.xpose.msk.msra.mxu0 %vm2353_vm7, %v2507_v48  ;;  %6123 = vmatprep.mubr.msk.f32.mxu1 %vm6770_vm0, %v6771_v6  ;;  %v3018_v48 = vld [vmem:[%s7940_s9 + $0x18] sm:$0xff] }
 0x532   : > { %6126 = vmatprep.subr.mxu0 %v6771_v6 }
 0x534   : > { %6119 = vmatmul.mubr.msk.f32.vlgmr.msra.gmra.mrb[18].mxu0 %vm2353_vm7, %v7343_v42  ;;  %v2584_v49 = vpop.permute.xlu1 %2583 }
 0x535   : > { %6122 = vmatpush3.xpose.msk.msra.mxu1 %vm2353_vm7, %v2584_v49  ;;  %6128 = vmatprep.mubr.msk.f32.mxu0 %vm6770_vm0, %v6771_v6 }
 0x536   : > { %6131 = vmatprep.subr.mxu1 %v6771_v6 }
 0x538   : > { %6124 = vmatmul.mubr.msk.f32.vlgmr.msra.gmra.mrb[26].mxu1 %vm2353_vm7, %v7345_v43 }
 0x539   : > { %6133 = vmatprep.mubr.msk.f32.mxu1 %vm6770_vm0, %v6771_v6 }
 0x5ff   : > { %v2424_v50 = vpop.f32.mrb[22].mxu1 }
 0x600   : > { %v2659_v51 = vmul.f32 0.35355338, %v2424_v50  ;;  %v6110_v52 = vpop.f32.mrb[23].mxu1 }
 0x601   : > { %v3313_v52 = vld [vmem:[%s7939_s8 + $0x10] sm:$0xff] }
 0x602   : > { %v2663_v53 = vsel %vm2353_vm7, %v2659_v51, -inf }
 0x603   : > { %2664 = vmax.xlane.f32.xlu0 %v2663_v53  ;;  %v2501_v54 = vpop.f32.mrb[24].mxu1  ;;  %v3314_v53 = vld [vmem:[%s7939_s8 + $0x18] sm:$0xff] }
 0x604   : > { %v2660_v55 = vmul.f32 0.35355338, %v2501_v54  ;;  %v6115_v56 = vpop.f32.mrb[25].mxu1 }
 0x605   : > { %v6519_v56 = vpack.c.bf16 %v3314_v53, %v3313_v52 }
 0x606   : > { %v2666_v57 = vsel %vm2353_vm7, %v2660_v55, -inf }
 0x607   : > { %v2578_v58 = vpop.f32.mrb[18].mxu0  ;;  %2667 = vmax.xlane.f32.xlu1 %v2666_v57 }
 0x608   : > { %v2661_v59 = vmul.f32 0.35355338, %v2578_v58  ;;  %v6120_v60 = vpop.f32.mrb[19].mxu0 }
 0x60a   : > { %v2669_v61 = vsel %vm2353_vm7, %v2661_v59, -inf }
 0x60b   : > { %2670 = vmax.xlane.f32.xlu0 %v2669_v61  ;;  %v2655_v62 = vpop.f32.mrb[26].mxu1 }
 0x60c   : > { %v2662_v63 = vmul.f32 0.35355338, %v2655_v62  ;;  %v6125_v0 = vpop.f32.mrb[27].mxu1 }
 0x60e   : > { %v2672_v1 = vsel %vm2353_vm7, %v2662_v63, -inf }
 0x60f   : > { %2673 = vmax.xlane.f32.xlu0 %v2672_v1 }
 0x618   : > { %2711 = vrot.lane.b32.xlu1 %v2136_v38, %s6773_s21 }
 0x690   : > { %v2665_v2 = vpop.xlane.xlu0 %2664 }
 0x691   : > { %v2675_v4 = vsub.f32 %v2659_v51, %v2665_v2  ;;  %v6516_v51 = vpack.c.bf16 %v3312_v47, %v3311_v46  ;;  %v3527_v46 = vld [vmem:[%s7946_s15 + $0x58] sm:$0xff] }
 0x693   : > { %v2679_v5 = vmul.f32 1.442695, %v2675_v4 }
 0x694   : > { %v2668_v7 = vpop.xlane.xlu1 %2667 }
 0x695   : > { %6661 = vpow2.f32 %v2679_v5  ;;  %v2676_v8 = vsub.f32 %v2660_v55, %v2668_v7 }
 0x697   : > { %v2681_v9 = vmul.f32 1.442695, %v2676_v8 }
 0x698   : > { %v2671_v10 = vpop.xlane.xlu0 %2670  ;;  %v2712_v11 = vpop.permute.xlu1 %2711 }
 0x699   : > { %6663 = vpow2.f32 %v2681_v9  ;;  %v2677_v12 = vsub.f32 %v2661_v59, %v2671_v10  ;;  %6127 = vmatpush3.msra.mxu0 %v2712_v11 }
 0x69a   : > { %6136 = vmatprep.subr.mxu0 %v6771_v6 }
 0x69b   : > { %v2683_v13 = vmul.f32 1.442695, %v2677_v12 }
 0x69c   : > { %v2674_v14 = vpop.xlane.xlu0 %2673 }
 0x69d   : > { %6665 = vpow2.f32 %v2683_v13  ;;  %v2678_v15 = vsub.f32 %v2662_v63, %v2674_v14  ;;  %v5560_v13 = vld [vmem:[%s7941_s10] ss:$0 sm:$0xff] }
 0x69f   : > { %v6662_v16 = vpop.eup %6661  ;;  %v2685_v17 = vmul.f32 1.442695, %v2678_v15 }
 0x6a0   : > { %v2687_v18 = vsel %vm2353_vm7, %v6662_v16, 0.0 }
 0x6a1   : > { %6667 = vpow2.f32 %v2685_v17  ;;  %2688 = vadd.xlane.f32.xlu1 %v2687_v18 }
 0x6a3   : > { %v6664_v19 = vpop.eup %6663 }
 0x6a4   : > { %v2690_v20 = vsel %vm2353_vm7, %v6664_v19, 0.0 }
 0x6a5   : > { %2691 = vadd.xlane.f32.xlu0 %v2690_v20 }
 0x6a7   : > { %v6666_v21 = vpop.eup %6665 }
 0x6a8   : > { %v2693_v22 = vsel %vm2353_vm7, %v6666_v21, 0.0 }
 0x6a9   : > { %2694 = vadd.xlane.f32.xlu1 %v2693_v22 }
 0x6ab   : > { %v6668_v23 = vpop.eup %6667 }
 0x6ac   : > { %v2696_v24 = vsel %vm2353_vm7, %v6668_v23, 0.0 }
 0x6ad   : > { %2697 = vadd.xlane.f32.xlu0 %v2696_v24  ;;  %v3431_v24 = vld [vmem:[%s7944_s13] sm:$0xff] }
 0x6ba   : > { %2863 = vrot.lane.b32.xlu1 %v7343_v42, %s6773_s21  ;;  %v3016_v42 = vld [vmem:[%s7940_s9 + $0x8] sm:$0xff] }
 0x6be   : > { %2939 = vrot.lane.b32.xlu1 %v7345_v43, %s6773_s21  ;;  %v3017_v43 = vld [vmem:[%s7940_s9 + $0x10] sm:$0xff] }
 0x6c3   : > { %2787 = vrot.lane.b32.xlu0 %v7338_v39, %s6773_s21 }
 0x72e   : > { %v2689_v25 = vpop.xlane.xlu1 %2688 }
 0x72f   : > { %6669 = vrcp.f32 %v2689_v25  ;;  %v3432_v25 = vld [vmem:[%s7944_s13 + $0x8] sm:$0xff] }
 0x732   : > { %v2692_v26 = vpop.xlane.xlu0 %2691 }
 0x733   : > { %6671 = vrcp.f32 %v2692_v26  ;;  %v6522_v26 = vpack.c.bf16 %v3432_v25, %v3431_v24 }
 0x736   : > { %v2695_v27 = vpop.xlane.xlu1 %2694 }
 0x737   : > { %6673 = vrcp.f32 %v2695_v27  ;;  %v3434_v27 = vld [vmem:[%s7944_s13 + $0x18] sm:$0xff] }
 0x739   : > { %v6670_v28 = vpop.eup %6669 }
 0x73a   : > { %v2700_v29 = vmul.f32 %v6670_v28, %v6662_v16  ;;  %v2864_v30 = vpop.permute.xlu1 %2863  ;;  %v2698_v31 = vpop.xlane.xlu0 %2697 }
 0x73b   : > { %6675 = vrcp.f32 %v2698_v31  ;;  %v3518_v31 = vld [vmem:[%s7946_s15 + $0x10] sm:$0xff] }
 0x73c   : > { %2707 = vst.msk [vmem:[%s7394_s23] sm:$0xff] %vm2353_vm7, %v2700_v29  ;;  %6129 = vmatmul.mubr.msk.f32.vlgmr.msra.gmra.mrb[20].mxu0 %vm2353_vm7, %v2700_v29  ;;  %v3516_v29 = vld [vmem:[%s7946_s15] sm:$0xff] }
 0x73d   : > { %v6672_v33 = vpop.eup %6671  ;;  %6137 = vmatpush3.msra.mxu0 %v2864_v30  ;;  %6138 = vmatprep.mubr.msk.f32.mxu0 %vm6770_vm0, %v6771_v6  ;;  %v3517_v30 = vld [vmem:[%s7946_s15 + $0x8] sm:$0xff] }
 0x73e   : > { %v2702_v34 = vmul.f32 %v6672_v33, %v6664_v19  ;;  %v2788_v35 = vpop.permute.xlu0 %2787  ;;  %6146 = vmatprep.subr.mxu0 %v6771_v6  ;;  %v2940_v36 = vpop.permute.xlu1 %2939  ;;  %v6528_v33 = vpack.c.bf16 %v3517_v30, %v3516_v29  ;;  %v5573_v29 = vld [vmem:[%s7938_s7 + $0xa8] sm:$0xff]  ;;  %v5567_v30 = vld [vmem:[%s7949_s18] ss:$0 sm:$0xff] }
 0x73f   : > { %6132 = vmatpush3.msra.mxu1 %v2788_v35 }
 0x740   : > { %2708 = vst.msk [vmem:[%s7394_s23 + $0x8] sm:$0xff] %vm2353_vm7, %v2702_v34  ;;  %6141 = vmatprep.subr.mxu1 %v6771_v6  ;;  %6134 = vmatmul.mubr.msk.f32.vlgmr.msra.gmra.mrb[28].mxu1 %vm2353_vm7, %v2702_v34  ;;  %v3519_v34 = vld [vmem:[%s7946_s15 + $0x18] sm:$0xff] }
 0x741   : > { %v6674_v37 = vpop.eup %6673  ;;  %6142 = vmatpush3.msra.mxu1 %v2940_v36  ;;  %6143 = vmatprep.mubr.msk.f32.mxu1 %vm6770_vm0, %v6771_v6  ;;  %v6531_v35 = vpack.c.bf16 %v3519_v34, %v3518_v31  ;;  %v3520_v36 = vld [vmem:[%s7946_s15 + $0x20] sm:$0xff] }
 0x742   : > { %v2704_v38 = vmul.f32 %v6674_v37, %v6666_v21  ;;  %6151 = vmatprep.subr.mxu1 %v6771_v6  ;;  %v3521_v37 = vld [vmem:[%s7946_s15 + $0x28] sm:$0xff] }
 0x744   : > { %2709 = vst.msk [vmem:[%s7394_s23 + $0x10] sm:$0xff] %vm2353_vm7, %v2704_v38  ;;  %6139 = vmatmul.mubr.msk.f32.vlgmr.msra.gmra.mrb[22].mxu0 %vm2353_vm7, %v2704_v38  ;;  %v6534_v38 = vpack.c.bf16 %v3521_v37, %v3520_v36  ;;  %v5575_v36 = vld [vmem:[%s7938_s7 + $0xb8] sm:$0xff] }
 0x745   : > { %v6676_v39 = vpop.eup %6675  ;;  %6148 = vmatprep.mubr.msk.f32.mxu0 %vm6770_vm0, %v6771_v6  ;;  %6147 = vmatpush3.msra.mxu0 %v3015_v41 }
 0x746   : > { %v2706_v40 = vmul.f32 %v6676_v39, %v6668_v23  ;;  %6156 = vmatprep.subr.mxu0 %v6771_v6  ;;  %v3522_v39 = vld [vmem:[%s7946_s15 + $0x30] sm:$0xff] }
 0x748   : > { %2710 = vst.msk [vmem:[%s7394_s23 + $0x18] sm:$0xff] %vm2353_vm7, %v2706_v40  ;;  %6144 = vmatmul.mubr.msk.f32.vlgmr.msra.gmra.mrb[30].mxu1 %vm2353_vm7, %v2706_v40  ;;  %v3523_v40 = vld [vmem:[%s7946_s15 + $0x38] sm:$0xff] }
 0x749   : > { %6153 = vmatprep.mubr.msk.f32.mxu1 %vm6770_vm0, %v6771_v6  ;;  %6152 = vmatpush3.msra.mxu1 %v3016_v42  ;;  %v6537_v41 = vpack.c.bf16 %v3523_v40, %v3522_v39  ;;  %v3524_v42 = vld [vmem:[%s7946_s15 + $0x40] sm:$0xff]  ;;  %v5577_v39 = vld [vmem:[%s7938_s7 + $0xc8] sm:$0xff] }
 0x74a   : > { %6161 = vmatprep.subr.mxu1 %v6771_v6 }
 0x80f   : > { %v2783_v44 = vpop.f32.mrb[20].mxu0 }
 0x810   : > { %v6130_v45 = vpop.f32.mrb[21].mxu0  ;;  %6149 = vmatmul.mubr.msk.f32.vlgmr.msra.gmra.mrb[24].mxu0 %vm2353_vm7, %v2783_v44 }
 0x811   : > { %6157 = vmatpush3.msra.mxu0 %v3017_v43  ;;  %6158 = vmatprep.mubr.msk.f32.mxu0 %vm6770_vm0, %v6771_v6  ;;  %v3525_v43 = vld [vmem:[%s7946_s15 + $0x48] sm:$0xff]  ;;  %v3526_v45 = vld [vmem:[%s7946_s15 + $0x50] sm:$0xff] }
 0x812   : > { %6515 = vmatprep.subr.bf16.mxu0 %v6769_v3  ;;  %v6540_v44 = vpack.c.bf16 %v3525_v43, %v3524_v42  ;;  %v6543_v47 = vpack.c.bf16 %v3527_v46, %v3526_v45  ;;  %v5579_v42 = vld [vmem:[%s7938_s7 + $0xd8] sm:$0xff]  ;;  %v5581_v45 = vld [vmem:[%s7938_s7 + $0xe8] sm:$0xff] }
 0x813   : > { %v2859_v49 = vpop.f32.mrb[28].mxu1 }
 0x814   : > { %v6135_v50 = vpop.f32.mrb[29].mxu1  ;;  %6154 = vmatmul.mubr.msk.f32.vlgmr.msra.gmra.mrb[32].mxu1 %vm2353_vm7, %v2859_v49  ;;  %v3529_v49 = vld [vmem:[%s7946_s15 + $0x68] sm:$0xff] }
 0x815   : > { %6162 = vmatpush3.msra.mxu1 %v3018_v48  ;;  %6163 = vmatprep.mubr.msk.f32.mxu1 %vm6770_vm0, %v6771_v6  ;;  %v3528_v48 = vld [vmem:[%s7946_s15 + $0x60] sm:$0xff] }
 0x816   : > { %6521 = vmatprep.subr.bf16.mxu1 %v6769_v3  ;;  %v6546_v50 = vpack.c.bf16 %v3529_v49, %v3528_v48  ;;  %v5583_v48 = vld [vmem:[%s7938_s7 + $0xf8] sm:$0xff] }
 0x817   : > { %v2935_v54 = vpop.f32.mrb[22].mxu0 }
 0x818   : > { %v6140_v55 = vpop.f32.mrb[23].mxu0  ;;  %6159 = vmatmul.mubr.msk.f32.vlgmr.msra.gmra.mrb[26].mxu0 %vm2353_vm7, %v2935_v54 }
 0x819   : > { %6517 = vmatpush3.bf16.msra.mxu0 %v6516_v51  ;;  %6174 = vmatprep.mubr.msk.f32.mxu0 %vm6770_vm0, %v6771_v6  ;;  %v5561_v55 = vld [vmem:[%s7942_s11] ss:$0 sm:$0xff] }
 0x81a   : > { %6518 = vmatprep.subr.bf16.mxu0 %v6769_v3 }
 0x81b   : > { %v3011_v57 = vpop.f32.mrb[30].mxu1 }
 0x81c   : > { %v6145_v58 = vpop.f32.mrb[31].mxu1  ;;  %6164 = vmatmul.mubr.msk.f32.vlgmr.msra.gmra.mrb[34].mxu1 %vm2353_vm7, %v3011_v57  ;;  %v5562_v57 = vld [vmem:[%s7943_s12] ss:$0 sm:$0xff] }
 0x81d   : > { %6520 = vmatpush3.bf16.msra.mxu0 %v6519_v56  ;;  %6185 = vmatprep.mubr.msk.f32.mxu1 %vm6770_vm0, %v6771_v6 }
 0x81e   : > { %6527 = vmatprep.subr.bf16.mxu0 %v6769_v3  ;;  %6523 = vmatpush3.bf16.msra.mxu1 %v6522_v26 }
 0x81f   : > { %6524 = vmatprep.subr.bf16.mxu1 %v6769_v3 }
 0x820   : > { %6175 = vmatmul.mubr.msk.f32.vlgmr.msra.gmra.mrb[28].mxu0 %vm711_vm1, %v7307_v32 }
 0x821   : > { %6220 = vmatprep.mubr.msk.f32.mxu0 %vm6770_vm0, %v6771_v6  ;;  %6529 = vmatpush3.bf16.msra.mxu0 %v6528_v33 }
 0x822   : > { %6530 = vmatprep.subr.bf16.mxu0 %v6769_v3 }
 0x825   : > { %6532 = vmatpush3.bf16.msra.mxu0 %v6531_v35  ;;  %v5574_v35 = vld [vmem:[%s7938_s7 + $0xb0] sm:$0xff] }
 0x826   : > { %6533 = vmatprep.subr.bf16.mxu0 %v6769_v3  ;;  %v6561_v37 = vpack.c.bf16 %v5575_v36, %v5574_v35 }
 0x829   : > { %6535 = vmatpush3.bf16.msra.mxu0 %v6534_v38  ;;  %v5576_v38 = vld [vmem:[%s7938_s7 + $0xc0] sm:$0xff] }
 0x82a   : > { %6536 = vmatprep.subr.bf16.mxu0 %v6769_v3  ;;  %v6564_v40 = vpack.c.bf16 %v5577_v39, %v5576_v38 }
 0x82d   : > { %6538 = vmatpush3.bf16.msra.mxu0 %v6537_v41  ;;  %v5578_v41 = vld [vmem:[%s7938_s7 + $0xd0] sm:$0xff] }
 0x82e   : > { %6539 = vmatprep.subr.bf16.mxu0 %v6769_v3  ;;  %v6567_v43 = vpack.c.bf16 %v5579_v42, %v5578_v41 }
 0x831   : > { %6541 = vmatpush3.bf16.msra.mxu0 %v6540_v44  ;;  %v5580_v44 = vld [vmem:[%s7938_s7 + $0xe0] sm:$0xff] }
 0x832   : > { %6542 = vmatprep.subr.bf16.mxu0 %v6769_v3  ;;  %v6570_v46 = vpack.c.bf16 %v5581_v45, %v5580_v44 }
 0x835   : > { %6544 = vmatpush3.bf16.msra.mxu0 %v6543_v47  ;;  %v5582_v47 = vld [vmem:[%s7938_s7 + $0xf0] sm:$0xff] }
 0x836   : > { %6545 = vmatprep.subr.bf16.mxu0 %v6769_v3  ;;  %v6573_v49 = vpack.c.bf16 %v5583_v48, %v5582_v47 }
 0x839   : > { %6547 = vmatpush3.bf16.msra.mxu0 %v6546_v50 }
 0x83a   : > { %6548 = vmatprep.subr.bf16.mxu0 %v6769_v3 }
 0x8e3   : > { %v3088_v59 = vpop.f32.mrb[24].mxu0 }
 0x8e4   : > { %v6150_v60 = vpop.f32.mrb[25].mxu0  ;;  %v3315_v62 = vsel %vm711_vm1, %v3088_v59, 0.0 }
 0x8e5   : > { %v3530_v60 = vld [vmem:[%s7946_s15 + $0x70] sm:$0xff] }
 0x8e7   : > { %v3161_v61 = vpop.f32.mrb[32].mxu1 }
 0x8e8   : > { %v3316_v63 = vsel %vm711_vm1, %v3161_v61, 0.0  ;;  %v6155_v0 = vpop.f32.mrb[33].mxu1  ;;  %v3531_v61 = vld [vmem:[%s7946_s15 + $0x78] sm:$0xff] }
 0x8e9   : > { %v3317_v1 = vadd.f32 %v3316_v63, %v3315_v62  ;;  %v6549_v62 = vpack.c.bf16 %v3531_v61, %v3530_v60  ;;  %v5563_v63 = vld [vmem:[%s7945_s14] ss:$0 sm:$0xff] }
 0x8eb   : > { %v3234_v2 = vpop.f32.mrb[26].mxu0  ;;  %6550 = vmatpush3.bf16.msra.mxu0 %v6549_v62 }
 0x8ec   : > { %v3318_v4 = vsel %vm711_vm1, %v3234_v2, 0.0  ;;  %v6160_v5 = vpop.f32.mrb[27].mxu0  ;;  %6267 = vmatprep.subr.mxu0 %v6771_v6 }
 0x8ed   : > { %v3319_v7 = vadd.f32 %v3318_v4, %v3317_v1  ;;  %v5565_v5 = vld [vmem:[%s7947_s16] ss:$0 sm:$0xff] }
 0x8ef   : > { %v3307_v8 = vpop.f32.mrb[34].mxu1 }
 0x8f0   : > { %v3320_v9 = vsel %vm711_vm1, %v3307_v8, 0.0  ;;  %v6165_v10 = vpop.f32.mrb[35].mxu1 }
 0x8f1   : > { %v3321_v11 = vadd.f32 %v3320_v9, %v3319_v7 }
 0x8f3   : > { %v3388_v12 = vpop.f32.mrb[28].mxu0 }
 0x8f4   : > { %v3389_v14 = vadd.f32 %v3388_v12, %v3321_v11  ;;  %v6176_v15 = vpop.f32.mrb[29].mxu0 }
 0x8f6   : > { %v3399_v16 = vadd.f32 %v5560_v13, %v3389_v14 }
 0x8f8   : > { %v3400_v17 = vadd.f32 %v3399_v16, %v7307_v32  ;;  %v3433_v32 = vld [vmem:[%s7944_s13 + $0x10] sm:$0xff] }
 0x8f9   : > { %v6525_v28 = vpack.c.bf16 %v3434_v27, %v3433_v32  ;;  %v5566_v32 = vld [vmem:[%s7948_s17] ss:$0 sm:$0xff] }
 0x8fa   : > { %v3403_v18 = vsel %vm711_vm1, %v3400_v17, 0.0 }
 0x8fb   : > { %3404 = vadd.xlane.f32.xlu0 %v3403_v18  ;;  %6526 = vmatpush3.bf16.msra.mxu1 %v6525_v28  ;;  %v5569_v18 = vld [vmem:[%s7938_s7 + $0x88] sm:$0xff]  ;;  %v5572_v28 = vld [vmem:[%s7938_s7 + $0xa0] sm:$0xff] }
 0x8fc   : > { %6551 = vmatprep.subr.bf16.mxu1 %v6769_v3  ;;  %v6558_v33 = vpack.c.bf16 %v5573_v29, %v5572_v28 }
 0x988   : > { %v3405_v19 = vpop.xlane.xlu0 %3404 }
 0x989   : > { %v3407_v20 = vmul.f32 0.03125, %v3405_v19 }
 0x98b   : > { %v3408_v21 = vsub.f32 %v3400_v17, %v3407_v20  ;;  %v5568_v17 = vld [vmem:[%s7938_s7 + $0x80] sm:$0xff]  ;;  %v5570_v20 = vld [vmem:[%s7938_s7 + $0x90] sm:$0xff] }
 0x98c   : > { %v6552_v19 = vpack.c.bf16 %v5569_v18, %v5568_v17 }
 0x98d   : > { %v3409_v22 = vmul.f32 %v3408_v21, %v3408_v21 }
 0x98f   : > { %v3410_v23 = vsel %vm711_vm1, %v3409_v22, 0.0 }
 0x990   : > { %3411 = vadd.xlane.f32.xlu1 %v3410_v23 }
 0xa1d   : > { %v3412_v51 = vpop.xlane.xlu1 %3411 }
 0xa1e   : > { %v3413_v52 = vmul.f32 0.03125, %v3412_v51 }
 0xa20   : > { %v3414_v53 = vadd.f32 1e-05, %v3413_v52 }
 0xa22   : > { %6677 = vrsqrt.f32 %v3414_v53 }
 0xa2c   : > { %v6678_v54 = vpop.eup %6677 }
 0xa2d   : > { %v3416_v56 = vmul.f32 %v6678_v54, %v3408_v21  ;;  %v5571_v21 = vld [vmem:[%s7938_s7 + $0x98] sm:$0xff] }
 0xa2e   : > { %v6555_v22 = vpack.c.bf16 %v5571_v21, %v5570_v20 }
 0xa2f   : > { %v3423_v58 = vmul.f32 %v5561_v55, %v3416_v56 }
 0xa31   : > { %v3430_v59 = vadd.f32 %v5562_v57, %v3423_v58 }
 0xa33   : > { %6186 = vmatmul.mubr.msk.f32.vlgmr.msra.gmra.mrb[36].mxu1 %vm711_vm1, %v3430_v59 }
 0xa34   : > { %6231 = vmatprep.mubr.msk.f32.mxu1 %vm6770_vm0, %v6771_v6  ;;  %6553 = vmatpush3.bf16.msra.mxu1 %v6552_v19 }
 0xa35   : > { %6554 = vmatprep.subr.bf16.mxu1 %v6769_v3 }
 0xa38   : > { %6556 = vmatpush3.bf16.msra.mxu1 %v6555_v22 }
 0xa39   : > { %6557 = vmatprep.subr.bf16.mxu1 %v6769_v3 }
 0xb06   : > { %v3511_v0 = vpop.f32.mrb[36].mxu1 }
 0xb07   : > { %v3512_v1 = vadd.f32 %v5563_v63, %v3511_v0  ;;  %v6187_v2 = vpop.f32.mrb[37].mxu1 }
 0xb09   : > { %v3515_v4 = vmax.f32 %v3512_v1, 0.0 }
 0xb0b   : > { %6221 = vmatmul.mubr.f32.vlgmr.msra.gmra.mrb[30].mxu0 %v3515_v4 }
 0xb0c   : > { %6269 = vmatprep.mubr.msk.f32.mxu0 %vm6770_vm0, %v6771_v6 }
 0xbde   : > { %v3605_v7 = vpop.f32.mrb[30].mxu0 }
 0xbdf   : > { %v3606_v8 = vadd.f32 %v5565_v5, %v3605_v7  ;;  %v6222_v9 = vpop.f32.mrb[31].mxu0 }
 0xbe1   : > { %v3609_v10 = vadd.f32 %v3606_v8, %v3430_v59 }
 0xbe3   : > { %v3612_v11 = vsel %vm711_vm1, %v3609_v10, 0.0 }
 0xbe4   : > { %3613 = vadd.xlane.f32.xlu0 %v3612_v11 }
 0xc71   : > { %v3614_v12 = vpop.xlane.xlu0 %3613 }
 0xc72   : > { %v3615_v13 = vmul.f32 0.03125, %v3614_v12 }
 0xc74   : > { %v3616_v14 = vsub.f32 %v3609_v10, %v3615_v13 }
 0xc76   : > { %v3617_v15 = vmul.f32 %v3616_v14, %v3616_v14 }
 0xc78   : > { %v3618_v16 = vsel %vm711_vm1, %v3617_v15, 0.0 }
 0xc79   : > { %3619 = vadd.xlane.f32.xlu0 %v3618_v16 }
 0xd06   : > { %v3620_v23 = vpop.xlane.xlu0 %3619 }
 0xd07   : > { %v3621_v24 = vmul.f32 0.03125, %v3620_v23 }
 0xd09   : > { %v3622_v25 = vadd.f32 1e-05, %v3621_v24 }
 0xd0b   : > { %6679 = vrsqrt.f32 %v3622_v25 }
 0xd15   : > { %v6680_v26 = vpop.eup %6679 }
 0xd16   : > { %v3624_v27 = vmul.f32 %v6680_v26, %v3616_v14 }
 0xd18   : > { %v3631_v31 = vmul.f32 %v5566_v32, %v3624_v27 }
 0xd1a   : > { %v7590_v34 = vadd.f32 %v5567_v30, %v3631_v31 }
 0xd1c   : > { %6232 = vmatmul.mubr.msk.f32.vlgmr.msra.gmra.mrb[38].mxu1 %vm711_vm1, %v7590_v34 }
 0xd1d   : > { %6559 = vmatpush3.bf16.msra.mxu1 %v6558_v33  ;;  %6242 = vmatprep.mubr.msk.f32.mxu1 %vm6770_vm0, %v6771_v6 }
 0xd1e   : > { %6560 = vmatprep.subr.bf16.mxu1 %v6769_v3 }
 0xd21   : > { %6562 = vmatpush3.bf16.msra.mxu1 %v6561_v37 }
 0xd22   : > { %6563 = vmatprep.subr.bf16.mxu1 %v6769_v3 }
 0xd24   : > { %6243 = vmatmul.mubr.msk.f32.vlgmr.msra.gmra.mrb[40].mxu1 %vm711_vm1, %v7590_v34 }
 0xd25   : > { %6565 = vmatpush3.bf16.msra.mxu1 %v6564_v40  ;;  %6253 = vmatprep.mubr.msk.f32.mxu1 %vm6770_vm0, %v6771_v6 }
 0xd26   : > { %6566 = vmatprep.subr.bf16.mxu1 %v6769_v3 }
 0xd29   : > { %6568 = vmatpush3.bf16.msra.mxu1 %v6567_v43 }
 0xd2a   : > { %6569 = vmatprep.subr.bf16.mxu1 %v6769_v3 }
 0xd2c   : > { %6254 = vmatmul.mubr.msk.f32.vlgmr.msra.gmra.mrb[42].mxu1 %vm711_vm1, %v7590_v34 }
 0xd2d   : > { %6571 = vmatpush3.bf16.msra.mxu1 %v6570_v46  ;;  %6264 = vmatprep.mubr.msk.f32.mxu1 %vm6770_vm0, %v6771_v6 }
 0xd2e   : > { %6572 = vmatprep.subr.bf16.mxu1 %v6769_v3 }
 0xd31   : > { %6574 = vmatpush3.bf16.msra.mxu1 %v6573_v49 }
 0xd32   : > { %6272 = vmatprep.subr.mxu1 %v6771_v6 }
 0xd34   : > { %6265 = vmatmul.mubr.msk.f32.vlgmr.msra.gmra.mrb[44].mxu1 %vm711_vm1, %v7590_v34 }
 0xd35   : > { %6274 = vmatprep.mubr.msk.f32.mxu1 %vm6770_vm0, %v6771_v6 }
 0xdef   : > { %v3725_v50 = vpop.f32.mrb[38].mxu1 }
 0xdf0   : > { %3940 = vrot.lane.b32.xlu1 %v3725_v50, %s6772_s6  ;;  %v6233_v51 = vpop.f32.mrb[39].mxu1 }
 0xdf7   : > { %v7645_v52 = vpop.f32.mrb[40].mxu1 }
 0xdf8   : > { %4017 = vrot.lane.b32.xlu0 %v7645_v52, %s6772_s6  ;;  %v6244_v53 = vpop.f32.mrb[41].mxu1 }
 0xdf9   : > { %v5604_v53 = vld [vmem:[%s7940_s9 + $0x20] sm:$0xff] }
 0xdff   : > { %v7649_v54 = vpop.f32.mrb[42].mxu1 }
 0xe00   : > { %4094 = vrot.lane.b32.xlu1 %v7649_v54, %s6772_s6  ;;  %v6255_v55 = vpop.f32.mrb[43].mxu1 }
 0xe01   : > { %v5606_v55 = vld [vmem:[%s7940_s9 + $0x30] sm:$0xff] }
 0xe07   : > { %v7653_v56 = vpop.f32.mrb[44].mxu1 }
 0xe08   : > { %4171 = vrot.lane.b32.xlu1 %v7653_v56, %s6772_s6  ;;  %v6266_v57 = vpop.f32.mrb[45].mxu1  ;;  %s7999_s6 = sld [smem:[#allocation22_spill]] }
 0xe62   : > { %v3941_v58 = vpop.permute.xlu1 %3940 }
 0xe63   : > { %6268 = vmatpush3.xpose.msk.msra.mxu0 %vm2353_vm7, %v3941_v58  ;;  %v5612_v58 = vld [vmem:[%s7939_s8 + $0x20] sm:$0xff] }
 0xe64   : > { %6277 = vmatprep.subr.mxu0 %v6771_v6 }
 0xe66   : > { %6270 = vmatmul.mubr.msk.f32.vlgmr.msra.gmra.mrb[32].mxu0 %vm2353_vm7, %v3725_v50 }
 0xe67   : > { %6279 = vmatprep.mubr.msk.f32.mxu0 %vm6770_vm0, %v6771_v6 }
 0xe6a   : > { %v4018_v59 = vpop.permute.xlu0 %4017 }
 0xe6b   : > { %6273 = vmatpush3.xpose.msk.msra.mxu1 %vm2353_vm7, %v4018_v59  ;;  %v5613_v59 = vld [vmem:[%s7939_s8 + $0x28] sm:$0xff] }
 0xe6c   : > { %6282 = vmatprep.subr.mxu1 %v6771_v6 }
 0xe6e   : > { %6275 = vmatmul.mubr.msk.f32.vlgmr.msra.gmra.mrb[46].mxu1 %vm2353_vm7, %v7645_v52 }
 0xe6f   : > { %6284 = vmatprep.mubr.msk.f32.mxu1 %vm6770_vm0, %v6771_v6 }
 0xe72   : > { %v4095_v60 = vpop.permute.xlu1 %4094 }
 0xe73   : > { %6278 = vmatpush3.xpose.msk.msra.mxu0 %vm2353_vm7, %v4095_v60  ;;  %v6576_v60 = vpack.c.bf16 %v5613_v59, %v5612_v58  ;;  %v5641_v58 = vld [vmem:[%s7946_s15 + $0xd8] sm:$0xff] }
 0xe74   : > { %6287 = vmatprep.subr.mxu0 %v6771_v6 }
 0xe76   : > { %6280 = vmatmul.mubr.msk.f32.vlgmr.msra.gmra.mrb[34].mxu0 %vm2353_vm7, %v7649_v54 }
 0xe77   : > { %6289 = vmatprep.mubr.msk.f32.mxu0 %vm6770_vm0, %v6771_v6 }
 0xe7a   : > { %v4172_v61 = vpop.permute.xlu1 %4171 }
 0xe7b   : > { %6283 = vmatpush3.xpose.msk.msra.mxu1 %vm2353_vm7, %v4172_v61  ;;  %v5614_v61 = vld [vmem:[%s7939_s8 + $0x30] sm:$0xff] }
 0xe7c   : > { %6292 = vmatprep.subr.mxu1 %v6771_v6 }
 0xe7e   : > { %6285 = vmatmul.mubr.msk.f32.vlgmr.msra.gmra.mrb[48].mxu1 %vm2353_vm7, %v7653_v56 }
 0xe7f   : > { %6294 = vmatprep.mubr.msk.f32.mxu1 %vm6770_vm0, %v6771_v6 }
 0xf39   : > { %v4012_v62 = vpop.f32.mrb[32].mxu0 }
 0xf3a   : > { %v4247_v63 = vmul.f32 0.35355338, %v4012_v62  ;;  %v6271_v0 = vpop.f32.mrb[33].mxu0  ;;  %v5615_v62 = vld [vmem:[%s7939_s8 + $0x38] sm:$0xff] }
 0xf3c   : > { %v4251_v1 = vsel %vm2353_vm7, %v4247_v63, -inf }
 0xf3d   : > { %4252 = vmax.xlane.f32.xlu0 %v4251_v1 }
 0xf41   : > { %v4089_v2 = vpop.f32.mrb[46].mxu1 }
 0xf42   : > { %v4248_v4 = vmul.f32 0.35355338, %v4089_v2  ;;  %v6276_v5 = vpop.f32.mrb[47].mxu1 }
 0xf43   : > { %v6579_v5 = vpack.c.bf16 %v5615_v62, %v5614_v61  ;;  %v5643_v61 = vld [vmem:[%s7946_s15 + $0xe8] sm:$0xff] }
 0xf44   : > { %v4254_v7 = vsel %vm2353_vm7, %v4248_v4, -inf }
 0xf45   : > { %4255 = vmax.xlane.f32.xlu1 %v4254_v7 }
 0xf49   : > { %v4166_v8 = vpop.f32.mrb[34].mxu0 }
 0xf4a   : > { %v4249_v9 = vmul.f32 0.35355338, %v4166_v8  ;;  %v6281_v10 = vpop.f32.mrb[35].mxu0 }
 0xf4c   : > { %v4257_v11 = vsel %vm2353_vm7, %v4249_v9, -inf }
 0xf4d   : > { %4258 = vmax.xlane.f32.xlu0 %v4257_v11 }
 0xf51   : > { %v4243_v12 = vpop.f32.mrb[48].mxu1 }
 0xf52   : > { %v4250_v13 = vmul.f32 0.35355338, %v4243_v12  ;;  %v6286_v14 = vpop.f32.mrb[49].mxu1 }
 0xf54   : > { %v4260_v15 = vsel %vm2353_vm7, %v4250_v13, -inf }
 0xf55   : > { %4261 = vmax.xlane.f32.xlu0 %v4260_v15 }
 0xf56   : > { %4300 = vrot.lane.b32.xlu1 %v3725_v50, %s6773_s21 }
 0xfca   : > { %v4253_v16 = vpop.xlane.xlu0 %4252 }
 0xfcb   : > { %v4263_v17 = vsub.f32 %v4247_v63, %v4253_v16  ;;  %v5607_v63 = vld [vmem:[%s7940_s9 + $0x38] sm:$0xff] }
 0xfcd   : > { %v4267_v18 = vmul.f32 1.442695, %v4263_v17 }
 0xfcf   : > { %6681 = vpow2.f32 %v4267_v18 }
 0xfd2   : > { %v4256_v19 = vpop.xlane.xlu1 %4255 }
 0xfd3   : > { %v4264_v20 = vsub.f32 %v4248_v4, %v4256_v19 }
 0xfd5   : > { %v4269_v21 = vmul.f32 1.442695, %v4264_v20 }
 0xfd6   : > { %v4301_v22 = vpop.permute.xlu1 %4300 }
 0xfd7   : > { %6683 = vpow2.f32 %v4269_v21  ;;  %6288 = vmatpush3.msra.mxu0 %v4301_v22 }
 0xfd8   : > { %6297 = vmatprep.subr.mxu0 %v6771_v6 }
 0xfd9   : > { %v6682_v23 = vpop.eup %6681 }
 0xfda   : > { %v4259_v24 = vpop.xlane.xlu0 %4258  ;;  %v4275_v25 = vsel %vm2353_vm7, %v6682_v23, 0.0 }
 0xfdb   : > { %v4265_v26 = vsub.f32 %v4249_v9, %v4259_v24  ;;  %4276 = vadd.xlane.f32.xlu1 %v4275_v25 }
 0xfdd   : > { %v4271_v32 = vmul.f32 1.442695, %v4265_v26  ;;  %v5618_v26 = vld [vmem:[%s7941_s10 + $0x1] ss:$0 sm:$0xff] }
 0xfdf   : > { %6685 = vpow2.f32 %v4271_v32 }
 0xfe1   : > { %v6684_v27 = vpop.eup %6683 }
 0xfe2   : > { %v4262_v28 = vpop.xlane.xlu0 %4261  ;;  %v4278_v29 = vsel %vm2353_vm7, %v6684_v27, 0.0 }
 0xfe3   : > { %v4266_v30 = vsub.f32 %v4250_v13, %v4262_v28  ;;  %4279 = vadd.xlane.f32.xlu0 %v4278_v29 }
 0xfe5   : > { %v4273_v31 = vmul.f32 1.442695, %v4266_v30 }
 0xfe7   : > { %6687 = vpow2.f32 %v4273_v31 }
 0xfe9   : > { %v6686_v33 = vpop.eup %6685 }
 0xfea   : > { %v4281_v35 = vsel %vm2353_vm7, %v6686_v33, 0.0 }
 0xfeb   : > { %4282 = vadd.xlane.f32.xlu1 %v4281_v35 }
 0xff1   : > { %v6688_v36 = vpop.eup %6687 }
 0xff2   : > { %v4284_v37 = vsel %vm2353_vm7, %v6688_v36, 0.0 }
 0xff3   : > { %4285 = vadd.xlane.f32.xlu0 %v4284_v37  ;;  %v5623_v37 = vld [vmem:[%s7944_s13 + $0x20] sm:$0xff] }
 0xffc   : > { %4452 = vrot.lane.b32.xlu1 %v7649_v54, %s6773_s21  ;;  %v5605_v54 = vld [vmem:[%s7940_s9 + $0x28] sm:$0xff] }
0x1000   : > { %4528 = vrot.lane.b32.xlu1 %v7653_v56, %s6773_s21 }
0x1009   : > { %4376 = vrot.lane.b32.xlu0 %v7645_v52, %s6773_s21  ;;  %s8000_s21 = sld [smem:[#allocation10_spill]] }
0x100f   : > { %s5655_s28 = sshll.u32 %s8000_s21, 7 }
0x1010   : > { %s7889_s20 = scalar_lea.hbm %s8002_s25, %s5655_s28 }
0x1068   : > { %v4277_v38 = vpop.xlane.xlu1 %4276 }
0x1069   : > { %6689 = vrcp.f32 %v4277_v38  ;;  %v5624_v38 = vld [vmem:[%s7944_s13 + $0x28] sm:$0xff] }
0x1070   : > { %v4280_v39 = vpop.xlane.xlu0 %4279 }
0x1071   : > { %6691 = vrcp.f32 %v4280_v39  ;;  %v6582_v39 = vpack.c.bf16 %v5624_v38, %v5623_v37 }
0x1073   : > { %v6690_v40 = vpop.eup %6689 }
0x1074   : > { %v4288_v41 = vmul.f32 %v6690_v40, %v6682_v23  ;;  %v5626_v40 = vld [vmem:[%s7944_s13 + $0x38] sm:$0xff] }
0x1076   : > { %5596 = vst.msk [vmem:[%s7394_s23 + $0x20] sm:$0xff] %vm2353_vm7, %v4288_v41  ;;  %6290 = vmatmul.mubr.msk.f32.vlgmr.msra.gmra.mrb[36].mxu0 %vm2353_vm7, %v4288_v41 }
0x1077   : > { %6299 = vmatprep.mubr.msk.f32.mxu0 %vm6770_vm0, %v6771_v6 }
0x1078   : > { %v4283_v42 = vpop.xlane.xlu1 %4282 }
0x1079   : > { %6693 = vrcp.f32 %v4283_v42  ;;  %v5630_v42 = vld [vmem:[%s7946_s15 + $0x80] sm:$0xff] }
0x107b   : > { %v6692_v43 = vpop.eup %6691 }
0x107c   : > { %v4290_v44 = vmul.f32 %v6692_v43, %v6684_v27  ;;  %v4453_v45 = vpop.permute.xlu1 %4452  ;;  %v5631_v43 = vld [vmem:[%s7946_s15 + $0x88] sm:$0xff] }
0x107d   : > { %6298 = vmatpush3.msra.mxu0 %v4453_v45  ;;  %v6588_v45 = vpack.c.bf16 %v5631_v43, %v5630_v42 }
0x107e   : > { %5597 = vst.msk [vmem:[%s7394_s23 + $0x28] sm:$0xff] %vm2353_vm7, %v4290_v44  ;;  %6307 = vmatprep.subr.mxu0 %v6771_v6 }
0x1080   : > { %v4286_v46 = vpop.xlane.xlu0 %4285  ;;  %v4529_v50 = vpop.permute.xlu1 %4528 }
0x1081   : > { %6695 = vrcp.f32 %v4286_v46  ;;  %v5633_v46 = vld [vmem:[%s7946_s15 + $0x98] sm:$0xff] }
0x1083   : > { %v6694_v47 = vpop.eup %6693 }
0x1084   : > { %v4292_v48 = vmul.f32 %v6694_v47, %v6686_v33  ;;  %v4377_v49 = vpop.permute.xlu0 %4376 }
0x1085   : > { %6293 = vmatpush3.msra.mxu1 %v4377_v49  ;;  %v5635_v49 = vld [vmem:[%s7946_s15 + $0xa8] sm:$0xff] }
0x1086   : > { %5598 = vst.msk [vmem:[%s7394_s23 + $0x30] sm:$0xff] %vm2353_vm7, %v4292_v48  ;;  %6295 = vmatmul.mubr.msk.f32.vlgmr.msra.gmra.mrb[50].mxu1 %vm2353_vm7, %v4290_v44  ;;  %6300 = vmatmul.mubr.msk.f32.vlgmr.msra.gmra.mrb[38].mxu0 %vm2353_vm7, %v4292_v48  ;;  %v5632_v44 = vld [vmem:[%s7946_s15 + $0x90] sm:$0xff]  ;;  %v5634_v48 = vld [vmem:[%s7946_s15 + $0xa0] sm:$0xff] }
0x1087   : > { %6302 = vmatprep.subr.mxu1 %v6771_v6  ;;  %6304 = vmatprep.mubr.msk.f32.mxu1 %vm6770_vm0, %v6771_v6  ;;  %v6591_v47 = vpack.c.bf16 %v5633_v46, %v5632_v44 }
0x1088   : > { %6303 = vmatpush3.msra.mxu1 %v4529_v50  ;;  %6309 = vmatprep.mubr.msk.f32.mxu0 %vm6770_vm0, %v6771_v6  ;;  %v6594_v50 = vpack.c.bf16 %v5635_v49, %v5634_v48 }
0x1089   : > { %6312 = vmatprep.subr.mxu1 %v6771_v6  ;;  %6308 = vmatpush3.msra.mxu0 %v5604_v53 }
0x108a   : > { %6317 = vmatprep.subr.mxu0 %v6771_v6 }
0x108b   : > { %v6696_v51 = vpop.eup %6695 }
0x108c   : > { %v4294_v52 = vmul.f32 %v6696_v51, %v6688_v36  ;;  %v5636_v51 = vld [vmem:[%s7946_s15 + $0xb0] sm:$0xff] }
0x108e   : > { %5599 = vst.msk [vmem:[%s7394_s23 + $0x38] sm:$0xff] %vm2353_vm7, %v4294_v52  ;;  %6305 = vmatmul.mubr.msk.f32.vlgmr.msra.gmra.mrb[52].mxu1 %vm2353_vm7, %v4294_v52  ;;  %v5637_v52 = vld [vmem:[%s7946_s15 + $0xb8] sm:$0xff]  ;;  %s5456_s23 = sshll.u32 %s687_s27, 3 }
0x108f   : > { %6314 = vmatprep.mubr.msk.f32.mxu1 %vm6770_vm0, %v6771_v6  ;;  %6313 = vmatpush3.msra.mxu1 %v5605_v54  ;;  %v6597_v53 = vpack.c.bf16 %v5637_v52, %v5636_v51  ;;  %v5638_v54 = vld [vmem:[%s7946_s15 + $0xc0] sm:$0xff]  ;;  %s689_s3 = scalar_lea.vmem [#allocation4], %s5456_s23 }
0x1090   : > { %6322 = vmatprep.subr.mxu1 %v6771_v6  ;;  %s5353_s24 = sshll.u32 %s689_s3, 4  ;;  %s7891_s24 = int_to_ptr.vmem [resolvable:$true] %s5353_s24 }
0x1091   : > { %s6705_s30 = scalar_lea.vmem %s7891_s24, 128  ;;  %p6712_p0 = scmp.lt.s32.totalorder %s7891_s24, %s6710_s26 }
0x1092   : > { %p6706_p11 = scmp.ne.s32.totalorder %s7891_s24, %s6705_s30 }
0x1094   : > { %p6707_p12 = pnand %p6706_p11, %p6931_p5 }
0x1096   : > { %p6708_p13 = pneg %p6707_p12 }
0x1149   : > { %v4372_v56 = vpop.f32.mrb[36].mxu0 }
0x114a   : > { %v6291_v57 = vpop.f32.mrb[37].mxu0  ;;  %6310 = vmatmul.mubr.msk.f32.vlgmr.msra.gmra.mrb[40].mxu0 %vm2353_vm7, %v4372_v56 }
0x114b   : > { %6318 = vmatpush3.msra.mxu0 %v5606_v55  ;;  %6319 = vmatprep.mubr.msk.f32.mxu0 %vm6770_vm0, %v6771_v6  ;;  %v5639_v55 = vld [vmem:[%s7946_s15 + $0xc8] sm:$0xff]  ;;  %v5640_v57 = vld [vmem:[%s7946_s15 + $0xd0] sm:$0xff] }
0x114c   : > { %6575 = vmatprep.subr.bf16.mxu0 %v6769_v3  ;;  %v6600_v56 = vpack.c.bf16 %v5639_v55, %v5638_v54  ;;  %v6603_v59 = vpack.c.bf16 %v5641_v58, %v5640_v57 }
0x1159   : > { %v4448_v0 = vpop.f32.mrb[50].mxu1  ;;  %v4524_v1 = vpop.f32.mrb[38].mxu0 }
0x115a   : > { %v6296_v2 = vpop.f32.mrb[51].mxu1  ;;  %v6301_v4 = vpop.f32.mrb[39].mxu0  ;;  %6315 = vmatmul.mubr.msk.f32.vlgmr.msra.gmra.mrb[54].mxu1 %vm2353_vm7, %v4448_v0  ;;  %6320 = vmatmul.mubr.msk.f32.vlgmr.msra.gmra.mrb[42].mxu0 %vm2353_vm7, %v4524_v1 }
0x115b   : > { %6577 = vmatpush3.bf16.msra.mxu0 %v6576_v60  ;;  %6323 = vmatpush3.msra.mxu1 %v5607_v63  ;;  %v5642_v60 = vld [vmem:[%s7946_s15 + $0xe0] sm:$0xff] }
0x115c   : > { %6578 = vmatprep.subr.bf16.mxu0 %v6769_v3  ;;  %6335 = vmatprep.mubr.msk.f32.mxu0 %vm6770_vm0, %v6771_v6  ;;  %v6606_v62 = vpack.c.bf16 %v5643_v61, %v5642_v60  ;;  %v5621_v4 = vld [vmem:[%s7942_s11 + $0x1] ss:$0 sm:$0xff] }
0x115d   : > { %6324 = vmatprep.mubr.msk.f32.mxu1 %vm6770_vm0, %v6771_v6  ;;  %6581 = vmatprep.subr.bf16.mxu1 %v6769_v3 }
0x115f   : > { %6580 = vmatpush3.bf16.msra.mxu0 %v6579_v5 }
0x1160   : > { %6587 = vmatprep.subr.bf16.mxu0 %v6769_v3 }
0x1161   : > { %v4600_v7 = vpop.f32.mrb[52].mxu1 }
0x1162   : > { %6336 = vmatmul.mubr.msk.f32.vlgmr.msra.gmra.mrb[44].mxu0 %vm711_vm1, %v7590_v34  ;;  %v6306_v8 = vpop.f32.mrb[53].mxu1  ;;  %6325 = vmatmul.mubr.msk.f32.vlgmr.msra.gmra.mrb[56].mxu1 %vm2353_vm7, %v4600_v7  ;;  %v5622_v7 = vld [vmem:[%s7943_s12 + $0x1] ss:$0 sm:$0xff] }
0x1163   : > { %6346 = vmatprep.mubr.msk.f32.mxu1 %vm6770_vm0, %v6771_v6  ;;  %6381 = vmatprep.mubr.msk.f32.mxu0 %vm6770_vm0, %v6771_v6 }
0x1164   : > { %6583 = vmatpush3.bf16.msra.mxu1 %v6582_v39  ;;  %6589 = vmatpush3.bf16.msra.mxu0 %v6588_v45  ;;  %v5650_v39 = vld [vmem:[%s7948_s17 + $0x1] ss:$0 sm:$0xff] }
0x1165   : > { %6584 = vmatprep.subr.bf16.mxu1 %v6769_v3  ;;  %6590 = vmatprep.subr.bf16.mxu0 %v6769_v3 }
0x1168   : > { %6592 = vmatpush3.bf16.msra.mxu0 %v6591_v47 }
0x1169   : > { %6593 = vmatprep.subr.bf16.mxu0 %v6769_v3 }
0x116c   : > { %6595 = vmatpush3.bf16.msra.mxu0 %v6594_v50 }
0x116d   : > { %6596 = vmatprep.subr.bf16.mxu0 %v6769_v3 }
0x1170   : > { %6598 = vmatpush3.bf16.msra.mxu0 %v6597_v53 }
0x1171   : > { %6599 = vmatprep.subr.bf16.mxu0 %v6769_v3 }
0x1174   : > { %6601 = vmatpush3.bf16.msra.mxu0 %v6600_v56 }
0x1175   : > { %6602 = vmatprep.subr.bf16.mxu0 %v6769_v3 }
0x1178   : > { %6604 = vmatpush3.bf16.msra.mxu0 %v6603_v59 }
0x1179   : > { %6605 = vmatprep.subr.bf16.mxu0 %v6769_v3 }
0x117c   : > { %6607 = vmatpush3.bf16.msra.mxu0 %v6606_v62 }
0x117d   : > { %6608 = vmatprep.subr.bf16.mxu0 %v6769_v3 }
0x121d   : > { %v4678_v9 = vpop.f32.mrb[40].mxu0 }
0x121e   : > { %v6311_v10 = vpop.f32.mrb[41].mxu0  ;;  %v4906_v13 = vsel %vm711_vm1, %v4678_v9, 0.0 }
0x121f   : > { %v5644_v10 = vld [vmem:[%s7946_s15 + $0xf0] sm:$0xff] }
0x122d   : > { %v4751_v11 = vpop.f32.mrb[54].mxu1  ;;  %v4824_v12 = vpop.f32.mrb[42].mxu0 }
0x122e   : > { %v4907_v14 = vsel %vm711_vm1, %v4751_v11, 0.0  ;;  %v6316_v15 = vpop.f32.mrb[55].mxu1  ;;  %v6321_v16 = vpop.f32.mrb[43].mxu0  ;;  %v4909_v18 = vsel %vm711_vm1, %v4824_v12, 0.0  ;;  %v5645_v11 = vld [vmem:[%s7946_s15 + $0xf8] sm:$0xff] }
0x122f   : > { %v4908_v17 = vadd.f32 %v4907_v14, %v4906_v13  ;;  %v6609_v12 = vpack.c.bf16 %v5645_v11, %v5644_v10  ;;  %v5628_v13 = vld [vmem:[%s7945_s14 + $0x1] ss:$0 sm:$0xff] }
0x1231   : > { %v4910_v19 = vadd.f32 %v4909_v18, %v4908_v17  ;;  %6610 = vmatpush3.bf16.msra.mxu0 %v6609_v12 }
0x1235   : > { %v4979_v20 = vpop.f32.mrb[44].mxu0  ;;  %v4897_v21 = vpop.f32.mrb[56].mxu1 }
0x1236   : > { %v4911_v22 = vsel %vm711_vm1, %v4897_v21, 0.0  ;;  %v6337_v23 = vpop.f32.mrb[45].mxu0  ;;  %v6326_v24 = vpop.f32.mrb[57].mxu1 }
0x1237   : > { %v4912_v25 = vadd.f32 %v4911_v22, %v4910_v19 }
0x1239   : > { %v4980_v32 = vadd.f32 %v4979_v20, %v4912_v25 }
0x123b   : > { %v4991_v27 = vadd.f32 %v5618_v26, %v4980_v32 }
0x123d   : > { %v4992_v28 = vadd.f32 %v4991_v27, %v7590_v34  ;;  %v5625_v34 = vld [vmem:[%s7944_s13 + $0x30] sm:$0xff]  ;;  %v5238_v27 = vld [vmem:[%s7950_s19] sm:$0xff] }
0x123e   : > { %v6585_v41 = vpack.c.bf16 %v5626_v40, %v5625_v34  ;;  %v5651_v40 = vld [vmem:[%s7949_s18 + $0x1] ss:$0 sm:$0xff] }
0x123f   : > { %v4997_v29 = vsel %vm711_vm1, %v4992_v28, 0.0 }
0x1240   : > { %4998 = vadd.xlane.f32.xlu0 %v4997_v29  ;;  %6586 = vmatpush3.bf16.msra.mxu1 %v6585_v41 }
0x1241   : > { %6611 = vmatprep.subr.bf16.mxu1 %v6769_v3 }
0x12cd   : > { %v4999_v30 = vpop.xlane.xlu0 %4998 }
0x12ce   : > { %v5000_v31 = vmul.f32 0.03125, %v4999_v30  ;;  %v5240_v30 = vld [vmem:[%s7950_s19 + $0x10] sm:$0xff] }
0x12d0   : > { %v5001_v33 = vsub.f32 %v4992_v28, %v5000_v31  ;;  %v5239_v28 = vld [vmem:[%s7950_s19 + $0x8] sm:$0xff]  ;;  %v5241_v31 = vld [vmem:[%s7950_s19 + $0x18] sm:$0xff] }
0x12d1   : > { %v6612_v29 = vpack.c.bf16 %v5239_v28, %v5238_v27 }
0x12d2   : > { %v5002_v35 = vmul.f32 %v5001_v33, %v5001_v33 }
0x12d4   : > { %v5003_v36 = vsel %vm711_vm1, %v5002_v35, 0.0 }
0x12d5   : > { %5004 = vadd.xlane.f32.xlu1 %v5003_v36 }
0x1362   : > { %v5005_v63 = vpop.xlane.xlu1 %5004 }
0x1363   : > { %v5006_v0 = vmul.f32 0.03125, %v5005_v63 }
0x1365   : > { %v5007_v1 = vadd.f32 1e-05, %v5006_v0 }
0x1367   : > { %6697 = vrsqrt.f32 %v5007_v1 }
0x1371   : > { %v6698_v2 = vpop.eup %6697 }
0x1372   : > { %v5009_v5 = vmul.f32 %v6698_v2, %v5001_v33  ;;  %v6615_v33 = vpack.c.bf16 %v5241_v31, %v5240_v30 }
0x1374   : > { %v5016_v8 = vmul.f32 %v5621_v4, %v5009_v5 }
0x1376   : > { %v5023_v9 = vadd.f32 %v5622_v7, %v5016_v8 }
0x1378   : > { %6347 = vmatmul.mubr.msk.f32.vlgmr.msra.gmra.mrb[58].mxu1 %vm711_vm1, %v5023_v9 }
0x1379   : > { %6392 = vmatprep.mubr.msk.f32.mxu1 %vm6770_vm0, %v6771_v6  ;;  %v5647_v6 = vld [vmem:[%s7947_s16 + $0x1] ss:$0 sm:$0xff]  ;;  %6613 = vmatpush3.bf16.msra.mxu1 %v6612_v29 }
0x137a   : > { %6614 = vmatprep.subr.bf16.mxu1 %v6769_v3  ;;  %v5652_v3 = vld [vmem:[%s7999_s6] ss:$0 sm:$0xff]  ;;  %s6711_s6 = scalar_lea.vmem %s6710_s26, 256 }
0x137b   : > { %p6713_p1 = scmp.lt.s32.totalorder %s6711_s6, %s6705_s30 }
0x137d   : > { %6616 = vmatpush3.bf16.msra.mxu1 %v6615_v33  ;;  %p6714_p2 = por %p6713_p1, %p6712_p0 }
0x137f   : > { %p6715_p3 = pnand %p6714_p2, %p6708_p13 }
0x144b   : > { %v5106_v14 = vpop.f32.mrb[58].mxu1 }
0x144c   : > { %v5107_v15 = vadd.f32 %v5628_v13, %v5106_v14  ;;  %v6348_v16 = vpop.f32.mrb[59].mxu1 }
0x144e   : > { %v5110_v17 = vmax.f32 %v5107_v15, 0.0 }
0x1450   : > { %6382 = vmatmul.mubr.f32.vlgmr.msra.gmra.mrb[46].mxu0 %v5110_v17 }
0x1523   : > { %v5202_v18 = vpop.f32.mrb[46].mxu0 }
0x1524   : > { %v5203_v19 = vadd.f32 %v5647_v6, %v5202_v18  ;;  %v6383_v20 = vpop.f32.mrb[47].mxu0 }
0x1526   : > { %v5206_v21 = vadd.f32 %v5203_v19, %v5023_v9 }
0x1528   : > { %v5211_v22 = vsel %vm711_vm1, %v5206_v21, 0.0 }
0x1529   : > { %5212 = vadd.xlane.f32.xlu0 %v5211_v22 }
0x15b6   : > { %v5213_v23 = vpop.xlane.xlu0 %5212 }
0x15b7   : > { %v5214_v24 = vmul.f32 0.03125, %v5213_v23 }
0x15b9   : > { %v5215_v25 = vsub.f32 %v5206_v21, %v5214_v24 }
0x15bb   : > { %v5216_v26 = vmul.f32 %v5215_v25, %v5215_v25 }
0x15bd   : > { %v5217_v32 = vsel %vm711_vm1, %v5216_v26, 0.0 }
0x15be   : > { %5218 = vadd.xlane.f32.xlu0 %v5217_v32 }
0x164b   : > { %v5219_v35 = vpop.xlane.xlu0 %5218 }
0x164c   : > { %v5220_v36 = vmul.f32 0.03125, %v5219_v35 }
0x164e   : > { %v5221_v37 = vadd.f32 1e-05, %v5220_v36 }
0x1650   : > { %6699 = vrsqrt.f32 %v5221_v37 }
0x165a   : > { %v6700_v38 = vpop.eup %6699 }
0x165b   : > { %v5223_v34 = vmul.f32 %v6700_v38, %v5215_v25 }
0x165d   : > { %v5230_v41 = vmul.f32 %v5650_v39, %v5223_v34 }
0x165f   : > { %v5237_v42 = vadd.f32 %v5651_v40, %v5230_v41 }
0x1661   : > { %6393 = vmatmul.mubr.msk.f32.vlgmr.msra.gmra.mrb[60].mxu1 %vm711_vm1, %v5237_v42 }
0x1734   : > { %v5318_v43 = vpop.f32.mrb[60].mxu1 }
0x1735   : > { %v5319_v44 = vadd.f32 %v5652_v3, %v5318_v43  ;;  %v6394_v45 = vpop.f32.mrb[61].mxu1 }
0x1737   : > { %5322 = vmax.xlane.f32.xlu1 %v5319_v44 }
0x17c4   : > { %v5323_v46 = vpop.xlane.xlu1 %5322 }
0x17c5   : > { %v5324_v47 = vsub.f32 %v5319_v44, %v5323_v46 }
0x17c7   : > { %v5325_v48 = vmul.f32 1.442695, %v5324_v47 }
0x17c9   : > { %6701 = vpow2.f32 %v5325_v48 }
0x17d3   : > { %v6702_v49 = vpop.eup %6701 }
0x17d4   : > { %5327 = vadd.xlane.f32.xlu0 %v6702_v49 }
0x1861   : > { %v5328_v50 = vpop.xlane.xlu0 %5327 }
0x1862   : > { %6703 = vlog2.f32 %v5328_v50 }
0x186c   : > { %v6704_v51 = vpop.eup %6703 }
0x186d   : > { %v5330_v52 = vmul.f32 0.6931472, %v6704_v51 }
0x186f   : > { %v5331_v53 = vadd.f32 %v5330_v52, %v5323_v46 }
0x1871   : > { %v5332_v54 = vsub.f32 %v5319_v44, %v5331_v53 }
0x1873   : > { %5333 = vst [vmem:[%s689_s3] sm:$0xff] %v5332_v54 }
0x1874   : > { %6718 = shalt.err (!%p6715_p3)
}
0x1875   : > { %s6719_s21 = scalar_lea.hbm %s7889_s20, 128  ;;  %s6723_s28 = scalar_lea.hbm %s8002_s25, 256 }
0x1876   : > { %p6720_p4 = scmp.ne.s32.totalorder %s7889_s20, %s6719_s21  ;;  %p6724_p9 = scmp.lt.u32.totalorder %s7889_s20, %s8002_s25 }
0x1877   : > { %p6725_p10 = scmp.lt.u32.totalorder %s6723_s28, %s6719_s21  ;;  %p6727_p12 = scmp.lt.u32.totalorder %s6719_s21, %s7889_s20 }
0x1878   : > { %p6721_p7 = pnand %p6720_p4, %p6931_p5 }
0x1879   : > { %p6726_p11 = por %p6725_p10, %p6724_p9 }
0x187a   : > { %p6722_p8 = pneg %p6721_p7 }
0x187b   : > { %p6728_p13 = por %p6727_p12, %p6726_p11 }
0x187d   : > { %p6729_p0 = pnand %p6728_p13, %p6722_p8 }
0x187f   : > { %6732 = shalt.err (!%p6729_p0)
}
0x1880   : > { %6617 = dma.vmem_to_hbm [thread:$0]  (%p6931_p5), %s7891_s24, 128, %s7889_s20, %s5335_s1  }
0x1881 PF: > { %s8003_s29 = sld [smem:[#allocation9_spill]]  ;;  %s8004_s30 = sld [smem:[#allocation7_spill]] }
0x1887   : > { %p6623_p1 = scmp.ge.s32.totalorder %s8003_s29, 2  ;;  %s5368_s26 = sand.u32 1, %s8004_s30  }
0x1888   : > { %s5369_s6 = scalar_lea.sflag [#allocation5], %s5368_s26 }
0x1889   : > { %p6620_p2 = pnand %p6623_p1, %p6935_p6 }
0x188b   : > { %6750 = dma.done.wait (!%p6620_p2), %s5369_s6, 128  }
0x188c   : > { %6752 = vsyncadd (!%p6620_p2), %s5369_s6, 4294967168  ;;  %s8006_s23 = sld [smem:[#allocation11_spill]]  ;;  %s8007_s21 = sld [smem:[#allocation8_spill]] }
0x188d   : > { %s8008_s0 = sld [smem:[#allocation12_spill]]  ;;  %s8009_s30 = smov %s6759_s4 }
0x1892   : > { %p34_p3 = scmp.ge.s32.totalorder %s8006_s23, 4   ;;  %s8010_s4 = smov %s8007_s21 }
0x1894   :  { %36 = sbr.rel (!%p34_p3) target bundleno = 14 (0xe), region = 183 }
0x189b   :  { %5382 = vsyncpa [#allocation5], 1 }
0x189c   :  { %5384 = vsyncpa [#allocation5 + $0x1], 1 }

</bundles_post_ra>
